<compile_context>
chip_gen: v7x
topology: tpu7x:2x2x1
jax: 0.10.0
libtpu: 0.0.40
codegen_flags: <defaults>
</compile_context>

<pallas_src>
import jax
import jax.numpy as jnp
from jax.experimental import pallas as pl
from jax.experimental.pallas import tpu as pltpu

LANE = 128


def _round_up(x, m):
    return ((x + m - 1) // m) * m


def _pad2(a, rows, cols):
    r, c = a.shape
    return jnp.pad(a, ((0, rows - r), (0, cols - c)))


# ---------------------------------------------------------------------------
# Kernel
# ---------------------------------------------------------------------------
def _small_classifier_kernel(x_ref, w1t_ref, b1_ref, w2t_ref, b2_ref,
                             w3t_ref, b3_ref, wfct_ref, bfc_ref,
                             out_ref, acc_ref):
    k = pl.program_id(1)

    @pl.when(k == 0)
    def _init():
        acc_ref[...] = jnp.zeros_like(acc_ref)

    # downsample0: FGL as masked weight-normed dense matmul, K-tiled over F_in.
    # bf16 operands, f32 accumulation on the MXU.
    acc_ref[...] += jnp.dot(x_ref[...], w1t_ref[...],
                            preferred_element_type=jnp.float32)

    @pl.when(k == pl.num_programs(1) - 1)
    def _finalize():
        # activation0/1/2 are identity (empty nn.Sequential).
        h1 = acc_ref[...] + b1_ref[...]
        h2 = jnp.dot(h1.astype(jnp.bfloat16), w2t_ref[...],
                     preferred_element_type=jnp.float32) + b2_ref[...]      # downsample1
        h3 = jnp.dot(h2.astype(jnp.bfloat16), w3t_ref[...],
                     preferred_element_type=jnp.float32) + b3_ref[...]      # downsample2
        logits = jnp.dot(h3.astype(jnp.bfloat16), wfct_ref[...],
                         preferred_element_type=jnp.float32) + bfc_ref[...]  # fc
        out_ref[...] = logits.astype(out_ref.dtype)


# ---------------------------------------------------------------------------
# One-time parameter preparation (weight-load time, NOT the per-call path)
# ---------------------------------------------------------------------------
def prepare_params(w1_eff, b1, w2_eff, b2, w3_eff, b3, wfc_eff, bfc, *, tk=512):
    """Transpose, bf16-cast and lane-pad the effective (masked, weight-normed) weights.

    w*_eff use the PyTorch Linear layout (out_features, in_features); biases (out,).
    """
    f_in = w1_eff.shape[1]
    h1, h2, h3 = w1_eff.shape[0], w2_eff.shape[0], w3_eff.shape[0]
    c = wfc_eff.shape[0]
    f_in_p = _round_up(f_in, tk)
    h1_p, h2_p, h3_p = (_round_up(h, LANE) for h in (h1, h2, h3))
    c_p = _round_up(max(c, LANE), LANE)            # lane-dense logits (avoid vst.msk)

    def wt(w, rows_p, cols_p):
        return _pad2(jnp.asarray(w, jnp.float32).T, rows_p, cols_p).astype(jnp.bfloat16)

    def brow(b, cols_p):
        return _pad2(jnp.asarray(b, jnp.float32).reshape(1, -1), 1, cols_p)

    return dict(
        f_in=f_in, f_in_p=f_in_p, h1_p=h1_p, h2_p=h2_p, h3_p=h3_p, c=c, c_p=c_p, tk=tk,
        w1t=wt(w1_eff, f_in_p, h1_p), b1=brow(b1, h1_p),
        w2t=wt(w2_eff, h1_p, h2_p),   b2=brow(b2, h2_p),
        w3t=wt(w3_eff, h2_p, h3_p),   b3=brow(b3, h3_p),
        wfct=wt(wfc_eff, h3_p, c_p),  bfc=brow(bfc, c_p),
    )


# ---------------------------------------------------------------------------
# Forward wrapper
# ---------------------------------------------------------------------------
def _forward_impl(x, prep, *, block_n, single_buffer_invariants):
    n, f_in = x.shape
    assert f_in == prep["f_in"]
    tk, f_in_p = prep["tk"], prep["f_in_p"]
    h1_p, h2_p, h3_p, c_p = prep["h1_p"], prep["h2_p"], prep["h3_p"], prep["c_p"]

    n_p = _round_up(max(n, 1), block_n)                    # pad batch instead of asserting
    x_p = _pad2(jnp.asarray(x, jnp.float32), n_p, f_in_p).astype(jnp.bfloat16)

    grid = (n_p // block_n, f_in_p // tk)                  # reduction (K) axis last

    def invariant(shape):
        # Grid-invariant operand: one VMEM buffer is enough (no double-buffer waste).
        if single_buffer_invariants:
            return pl.BlockSpec(shape, lambda i, k: (0, 0),
                                pipeline_mode=pl.Buffered(1))
        return pl.BlockSpec(shape, lambda i, k: (0, 0))

    in_specs = [
        pl.BlockSpec((block_n, tk), lambda i, k: (i, k)),   # x: batch tile x K tile
        pl.BlockSpec((tk, h1_p), lambda i, k: (k, 0)),      # W1^T: K tile (double-buffered)
        invariant((1, h1_p)),                               # b1
        invariant((h1_p, h2_p)),                            # W2^T (resident)
        invariant((1, h2_p)),                               # b2
        invariant((h2_p, h3_p)),                            # W3^T (resident)
        invariant((1, h3_p)),                               # b3
        invariant((h3_p, c_p)),                             # Wfc^T (resident)
        invariant((1, c_p)),                                # bfc
    ]
    out_spec = pl.BlockSpec((block_n, c_p), lambda i, k: (i, 0))

    # Explicit VMEM budget from the actual tile sizes (+ headroom), per the review.
    bf16, f32 = 2, 4
    est = (2 * block_n * tk * bf16                      # x tile, double-buffered
           + 2 * tk * h1_p * bf16                       # W1^T tile, double-buffered
           + 2 * block_n * c_p * f32                    # out tile, double-buffered
           + block_n * h1_p * f32                       # f32 accumulator scratch
           + (h1_p * h2_p + h2_p * h3_p + h3_p * c_p) * bf16   # resident weights
           + (h1_p + h2_p + h3_p + c_p) * f32)                 # resident biases
    vmem_limit = int(min(64 << 20, max(2 * est + (4 << 20), 16 << 20)))

    out = pl.pallas_call(
        _small_classifier_kernel,
        out_shape=jax.ShapeDtypeStruct((n_p, c_p), jnp.float32),
        grid_spec=pltpu.PrefetchScalarGridSpec(
            num_scalar_prefetch=0,
            grid=grid,
            in_specs=in_specs,
            out_specs=out_spec,
            scratch_shapes=[pltpu.VMEM((block_n, h1_p), jnp.float32)],
        ),
        compiler_params=pltpu.CompilerParams(
            dimension_semantics=("parallel", "arbitrary"),
            vmem_limit_bytes=vmem_limit,
        ),
    )(x_p, prep["w1t"], prep["b1"], prep["w2t"], prep["b2"],
      prep["w3t"], prep["b3"], prep["wfct"], prep["bfc"])

    return out[:n, :prep["c"]]


def small_classifier_forward(x, prep, *, block_n=256):
    """Fused SmallClassifier forward.

    block_n: batch tile; multiples of 256 fill the v6e/v7x 256x256 MXU (128 already
    saturates v5e); raise toward 512-1024 for large N if VMEM allows.
    """
    try:
        return _forward_impl(x, prep, block_n=block_n, single_buffer_invariants=True)
    except Exception:
        # Fallback for environments where BlockSpec(pipeline_mode=pl.Buffered(1)) is
        # unavailable; identical math, just default double-buffered invariants.
        return _forward_impl(x, prep, block_n=block_n, single_buffer_invariants=False)


# ---------------------------------------------------------------------------
# Demo parameter construction (stand-ins for fgl.make_weight_normed_FGL / wtree)
# ---------------------------------------------------------------------------
def _weight_norm(v, g, eps=1e-12):
    # PyTorch weight_norm (dim=0): per-output-row L2 norm over remaining dims.
    # eps guards all-zero masked rows (possible with a real FGL adjacency).
    norm = jnp.sqrt(jnp.sum(v * v, axis=1, keepdims=True))
    return g[:, None] * v / jnp.maximum(norm, eps)


def _fgl_effective_weight(key, c_in, n_in, c_out, n_out, scale=0.05):
    """Effective dense weight of one weight-normed FGL layer.

    Tree-coarsening adjacency: output node j pools the contiguous group of
    n_in // n_out input nodes; all (c_out, c_in) channel pairs share that node mask.
    Flattening is channel-major, matching cur_z.view(N, -1) in the module.
    """
    kv, kg, kb = jax.random.split(key, 3)
    group = n_in // n_out
    owner = jnp.arange(n_in) // group
    node_mask = (owner[None, :] == jnp.arange(n_out)[:, None]).astype(jnp.float32)
    mask = jnp.tile(node_mask, (c_out, c_in))                  # (c_out*n_out, c_in*n_in)
    v = scale * jax.random.normal(kv, (c_out * n_out, c_in * n_in), jnp.float32)
    g = 1.0 + 0.1 * jax.random.normal(kg, (c_out * n_out,), jnp.float32)
    b = 0.01 * jax.random.normal(kb, (c_out * n_out,), jnp.float32)
    return _weight_norm(v * mask, g), b


def _fc_effective_weight(key, in_features, num_classes, scale=0.05):
    kv, kg, kb = jax.random.split(key, 3)
    v = scale * jax.random.normal(kv, (num_classes, in_features), jnp.float32)
    g = 1.0 + 0.1 * jax.random.normal(kg, (num_classes,), jnp.float32)
    b = 0.01 * jax.random.normal(kb, (num_classes,), jnp.float32)
    return _weight_norm(v, g), b


if __name__ == "__main__":
    # Small stand-ins for the module's sizes (real: node_sizes=[masked_nnz,4096,1024,64],
    # channel_sizes=[1,32,64,128], num_classes=len(meta['c2i'])).
    N = 16
    node_sizes = [512, 64, 16, 8]
    channel_sizes = [1, 4, 8, 16]
    num_classes = 10

    key = jax.random.PRNGKey(0)
    kx, k0, k1, k2, kfc = jax.random.split(key, 5)

    x = jax.random.normal(kx, (N, node_sizes[0]), jnp.float32)

    w1, b1 = _fgl_effective_weight(k0, channel_sizes[0], node_sizes[0],
                                   channel_sizes[1], node_sizes[1])
    w2, b2 = _fgl_effective_weight(k1, channel_sizes[1], node_sizes[1],
                                   channel_sizes[2], node_sizes[2])
    w3, b3 = _fgl_effective_weight(k2, channel_sizes[2], node_sizes[2],
                                   channel_sizes[3], node_sizes[3])
    wfc, bfc = _fc_effective_weight(kfc, channel_sizes[3] * node_sizes[3], num_classes)

    # One-time parameter prep (transpose / bf16 / lane padding), outside the call path.
    prep = prepare_params(w1, b1, w2, b2, w3, b3, wfc, bfc, tk=256)

    out = small_classifier_forward(x, prep, block_n=256)
    out = jax.block_until_ready(out)

    # Plain-JAX reference using the SAME bf16 effective weights (mixed-precision
    # matmuls with f32 accumulation, like the kernel).
    xp = _pad2(x, N, prep["f_in_p"]).astype(jnp.bfloat16)
    h = jnp.dot(xp, prep["w1t"], preferred_element_type=jnp.float32) + prep["b1"]
    h = jnp.dot(h.astype(jnp.bfloat16), prep["w2t"], preferred_element_type=jnp.float32) + prep["b2"]
    h = jnp.dot(h.astype(jnp.bfloat16), prep["w3t"], preferred_element_type=jnp.float32) + prep["b3"]
    ref = jnp.dot(h.astype(jnp.bfloat16), prep["wfct"], preferred_element_type=jnp.float32) + prep["bfc"]
    ref = ref[:, :num_classes]

    assert out.shape == (N, num_classes)
    err = jnp.max(jnp.abs(out - ref))
    assert jnp.allclose(out, ref, atol=1e-2, rtol=1e-2), f"kernel/reference mismatch: {err}"

    print("KERNEL_OK")
</pallas_src>

<mosaic_0001>
module attributes {stable_mosaic.version = 11 : i64} {
  func.func @_small_classifier_kernel(%arg0: i32, %arg1: i32, %arg2: memref<256x256xbf16, #tpu.memory_space<vmem>>, %arg3: memref<256x256xbf16, #tpu.memory_space<vmem>>, %arg4: memref<1x256xf32, #tpu.memory_space<vmem>>, %arg5: memref<256x128xbf16, #tpu.memory_space<vmem>>, %arg6: memref<1x128xf32, #tpu.memory_space<vmem>>, %arg7: memref<128x128xbf16, #tpu.memory_space<vmem>>, %arg8: memref<1x128xf32, #tpu.memory_space<vmem>>, %arg9: memref<128x128xbf16, #tpu.memory_space<vmem>>, %arg10: memref<1x128xf32, #tpu.memory_space<vmem>>, %arg11: memref<256x128xf32, #tpu.memory_space<vmem>>, %arg12: memref<256x256xf32, #tpu.memory_space<vmem>>) attributes {dimension_semantics = [#tpu.dimension_semantics<parallel>, #tpu.dimension_semantics<arbitrary>], iteration_bounds = array<i64: 1, 2>, scalar_prefetch = 0 : i64, scratch_operands = 1 : i64, tpu.core_type = #tpu.core_type<tc>, window_params = [{transform_indices = @transform_0, window_bounds = array<i64: 256, 256>}, {transform_indices = @transform_1, window_bounds = array<i64: 256, 256>}, {pipeline_mode = #tpu.pipeline_mode<synchronous>, transform_indices = @transform_2, window_bounds = array<i64: 1, 256>}, {pipeline_mode = #tpu.pipeline_mode<synchronous>, transform_indices = @transform_3, window_bounds = array<i64: 256, 128>}, {pipeline_mode = #tpu.pipeline_mode<synchronous>, transform_indices = @transform_4, window_bounds = array<i64: 1, 128>}, {pipeline_mode = #tpu.pipeline_mode<synchronous>, transform_indices = @transform_5, window_bounds = array<i64: 128, 128>}, {pipeline_mode = #tpu.pipeline_mode<synchronous>, transform_indices = @transform_6, window_bounds = array<i64: 1, 128>}, {pipeline_mode = #tpu.pipeline_mode<synchronous>, transform_indices = @transform_7, window_bounds = array<i64: 128, 128>}, {pipeline_mode = #tpu.pipeline_mode<synchronous>, transform_indices = @transform_8, window_bounds = array<i64: 1, 128>}, {transform_indices = @transform_9, window_bounds = array<i64: 256, 128>}]} {
    %c0_i32 = arith.constant 0 : i32
    %0 = arith.cmpi eq, %arg1, %c0_i32 : i32
    %1 = arith.extui %0 : i1 to i32
    %c0_i32_0 = arith.constant 0 : i32
    %2 = arith.cmpi ne, %1, %c0_i32_0 : i32
    scf.if %2 {
      %cst_9 = arith.constant 0.000000e+00 : f32
      %12 = vector.broadcast %cst_9 : f32 to vector<256x256xf32>
      %c0_10 = arith.constant 0 : index
      %c0_11 = arith.constant 0 : index
      %13 = vector.load %arg12[%c0_10, %c0_11] : memref<256x256xf32, #tpu.memory_space<vmem>>, vector<256x256xf32>
      tpu.vector_store %arg12[%c0_10, %c0_11], %12 {strides = array<i32>} : memref<256x256xf32, #tpu.memory_space<vmem>>, vector<256x256xf32>,
    } else {
    }
    %c0 = arith.constant 0 : index
    %c0_1 = arith.constant 0 : index
    %3 = vector.load %arg12[%c0, %c0_1] : memref<256x256xf32, #tpu.memory_space<vmem>>, vector<256x256xf32>
    %c0_2 = arith.constant 0 : index
    %c0_3 = arith.constant 0 : index
    %4 = vector.load %arg2[%c0_2, %c0_3] : memref<256x256xbf16, #tpu.memory_space<vmem>>, vector<256x256xbf16>
    %c0_4 = arith.constant 0 : index
    %c0_5 = arith.constant 0 : index
    %5 = vector.load %arg3[%c0_4, %c0_5] : memref<256x256xbf16, #tpu.memory_space<vmem>>, vector<256x256xbf16>
    %cst = arith.constant dense<0.000000e+00> : vector<256x256xf32>
    %6 = tpu.matmul %4, %5, %cst {dimension_numbers = #tpu.dot_dimension_numbers<[1], [0], [0], [1], [0, 0, 1, 1], [], []>} : vector<256x256xbf16>, vector<256x256xbf16>, vector<256x256xf32> -> vector<256x256xf32>
    %7 = arith.addf %3, %6 : vector<256x256xf32>
    %c0_6 = arith.constant 0 : index
    %c0_7 = arith.constant 0 : index
    %8 = vector.load %arg12[%c0_6, %c0_7] : memref<256x256xf32, #tpu.memory_space<vmem>>, vector<256x256xf32>
    tpu.vector_store %arg12[%c0_6, %c0_7], %7 {strides = array<i32>} : memref<256x256xf32, #tpu.memory_space<vmem>>, vector<256x256xf32>,
    %c1_i32 = arith.constant 1 : i32
    %9 = arith.cmpi eq, %arg1, %c1_i32 : i32
    %10 = arith.extui %9 : i1 to i32
    %c0_i32_8 = arith.constant 0 : i32
    %11 = arith.cmpi ne, %10, %c0_i32_8 : i32
    scf.if %11 {
      %c0_9 = arith.constant 0 : index
      %c0_10 = arith.constant 0 : index
      %12 = vector.load %arg12[%c0_9, %c0_10] : memref<256x256xf32, #tpu.memory_space<vmem>>, vector<256x256xf32>
      %c0_11 = arith.constant 0 : index
      %c0_12 = arith.constant 0 : index
      %13 = vector.load %arg4[%c0_11, %c0_12] : memref<1x256xf32, #tpu.memory_space<vmem>>, vector<1x256xf32>
      %14 = vector.broadcast %13 : vector<1x256xf32> to vector<256x256xf32>
      %15 = arith.addf %12, %14 : vector<256x256xf32>
      %16 = arith.truncf %15 : vector<256x256xf32> to vector<256x256xbf16>
      %c0_13 = arith.constant 0 : index
      %c0_14 = arith.constant 0 : index
      %17 = vector.load %arg5[%c0_13, %c0_14] : memref<256x128xbf16, #tpu.memory_space<vmem>>, vector<256x128xbf16>
      %cst_15 = arith.constant dense<0.000000e+00> : vector<256x128xf32>
      %18 = tpu.matmul %16, %17, %cst_15 {dimension_numbers = #tpu.dot_dimension_numbers<[1], [0], [0], [1], [0, 0, 1, 1], [], []>} : vector<256x256xbf16>, vector<256x128xbf16>, vector<256x128xf32> -> vector<256x128xf32>
      %c0_16 = arith.constant 0 : index
      %c0_17 = arith.constant 0 : index
      %19 = vector.load %arg6[%c0_16, %c0_17] : memref<1x128xf32, #tpu.memory_space<vmem>>, vector<1x128xf32>
      %20 = vector.broadcast %19 : vector<1x128xf32> to vector<256x128xf32>
      %21 = arith.addf %18, %20 : vector<256x128xf32>
      %22 = arith.truncf %21 : vector<256x128xf32> to vector<256x128xbf16>
      %c0_18 = arith.constant 0 : index
      %c0_19 = arith.constant 0 : index
      %23 = vector.load %arg7[%c0_18, %c0_19] : memref<128x128xbf16, #tpu.memory_space<vmem>>, vector<128x128xbf16>
      %cst_20 = arith.constant dense<0.000000e+00> : vector<256x128xf32>
      %24 = tpu.matmul %22, %23, %cst_20 {dimension_numbers = #tpu.dot_dimension_numbers<[1], [0], [0], [1], [0, 0, 1, 1], [], []>} : vector<256x128xbf16>, vector<128x128xbf16>, vector<256x128xf32> -> vector<256x128xf32>
      %c0_21 = arith.constant 0 : index
      %c0_22 = arith.constant 0 : index
      %25 = vector.load %arg8[%c0_21, %c0_22] : memref<1x128xf32, #tpu.memory_space<vmem>>, vector<1x128xf32>
      %26 = vector.broadcast %25 : vector<1x128xf32> to vector<256x128xf32>
      %27 = arith.addf %24, %26 : vector<256x128xf32>
      %28 = arith.truncf %27 : vector<256x128xf32> to vector<256x128xbf16>
      %c0_23 = arith.constant 0 : index
      %c0_24 = arith.constant 0 : index
      %29 = vector.load %arg9[%c0_23, %c0_24] : memref<128x128xbf16, #tpu.memory_space<vmem>>, vector<128x128xbf16>
      %cst_25 = arith.constant dense<0.000000e+00> : vector<256x128xf32>
      %30 = tpu.matmul %28, %29, %cst_25 {dimension_numbers = #tpu.dot_dimension_numbers<[1], [0], [0], [1], [0, 0, 1, 1], [], []>} : vector<256x128xbf16>, vector<128x128xbf16>, vector<256x128xf32> -> vector<256x128xf32>
      %c0_26 = arith.constant 0 : index
      %c0_27 = arith.constant 0 : index
      %31 = vector.load %arg10[%c0_26, %c0_27] : memref<1x128xf32, #tpu.memory_space<vmem>>, vector<1x128xf32>
      %32 = vector.broadcast %31 : vector<1x128xf32> to vector<256x128xf32>
      %33 = arith.addf %30, %32 : vector<256x128xf32>
      %c0_28 = arith.constant 0 : index
      %c0_29 = arith.constant 0 : index
      %34 = vector.load %arg11[%c0_28, %c0_29] : memref<256x128xf32, #tpu.memory_space<vmem>>, vector<256x128xf32>
      tpu.vector_store %arg11[%c0_28, %c0_29], %33 {strides = array<i32>} : memref<256x128xf32, #tpu.memory_space<vmem>>, vector<256x128xf32>,
    } else {
    }
    return
  }
  func.func @transform_0(%arg0: i32, %arg1: i32) -> (i32, i32) {
    %c0_i32 = arith.constant 0 : i32
    return %arg0, %arg1 : i32, i32
  }
  func.func @transform_1(%arg0: i32, %arg1: i32) -> (i32, i32) {
    %c0_i32 = arith.constant 0 : i32
    %c0_i32_0 = arith.constant 0 : i32
    return %arg1, %c0_i32 : i32, i32
  }
  func.func @transform_2(%arg0: i32, %arg1: i32) -> (i32, i32) {
    %c0_i32 = arith.constant 0 : i32
    %c0_i32_0 = arith.constant 0 : i32
    %c0_i32_1 = arith.constant 0 : i32
    return %c0_i32, %c0_i32_0 : i32, i32
  }
  func.func @transform_3(%arg0: i32, %arg1: i32) -> (i32, i32) {
    %c0_i32 = arith.constant 0 : i32
    %c0_i32_0 = arith.constant 0 : i32
    %c0_i32_1 = arith.constant 0 : i32
    return %c0_i32, %c0_i32_0 : i32, i32
  }
  func.func @transform_4(%arg0: i32, %arg1: i32) -> (i32, i32) {
    %c0_i32 = arith.constant 0 : i32
    %c0_i32_0 = arith.constant 0 : i32
    %c0_i32_1 = arith.constant 0 : i32
    return %c0_i32, %c0_i32_0 : i32, i32
  }
  func.func @transform_5(%arg0: i32, %arg1: i32) -> (i32, i32) {
    %c0_i32 = arith.constant 0 : i32
    %c0_i32_0 = arith.constant 0 : i32
    %c0_i32_1 = arith.constant 0 : i32
    return %c0_i32, %c0_i32_0 : i32, i32
  }
  func.func @transform_6(%arg0: i32, %arg1: i32) -> (i32, i32) {
    %c0_i32 = arith.constant 0 : i32
    %c0_i32_0 = arith.constant 0 : i32
    %c0_i32_1 = arith.constant 0 : i32
    return %c0_i32, %c0_i32_0 : i32, i32
  }
  func.func @transform_7(%arg0: i32, %arg1: i32) -> (i32, i32) {
    %c0_i32 = arith.constant 0 : i32
    %c0_i32_0 = arith.constant 0 : i32
    %c0_i32_1 = arith.constant 0 : i32
    return %c0_i32, %c0_i32_0 : i32, i32
  }
  func.func @transform_8(%arg0: i32, %arg1: i32) -> (i32, i32) {
    %c0_i32 = arith.constant 0 : i32
    %c0_i32_0 = arith.constant 0 : i32
    %c0_i32_1 = arith.constant 0 : i32
    return %c0_i32, %c0_i32_0 : i32, i32
  }
  func.func @transform_9(%arg0: i32, %arg1: i32) -> (i32, i32) {
    %c0_i32 = arith.constant 0 : i32
    %c0_i32_0 = arith.constant 0 : i32
    return %arg0, %c0_i32 : i32, i32
  }
}

module attributes {stable_mosaic.version = 11 : i64} {
  func.func @_small_classifier_kernel(%arg0: i32, %arg1: i32, %arg2: memref<256x256xbf16, #tpu.memory_space<vmem>>, %arg3: memref<256x256xbf16, #tpu.memory_space<vmem>>, %arg4: memref<1x256xf32, #tpu.memory_space<vmem>>, %arg5: memref<256x128xbf16, #tpu.memory_space<vmem>>, %arg6: memref<1x128xf32, #tpu.memory_space<vmem>>, %arg7: memref<128x128xbf16, #tpu.memory_space<vmem>>, %arg8: memref<1x128xf32, #tpu.memory_space<vmem>>, %arg9: memref<128x128xbf16, #tpu.memory_space<vmem>>, %arg10: memref<1x128xf32, #tpu.memory_space<vmem>>, %arg11: memref<256x128xf32, #tpu.memory_space<vmem>>, %arg12: memref<256x256xf32, #tpu.memory_space<vmem>>) attributes {dimension_semantics = [#tpu.dimension_semantics<parallel>, #tpu.dimension_semantics<arbitrary>], iteration_bounds = array<i64: 1, 2>, scalar_prefetch = 0 : i64, scratch_operands = 1 : i64, tpu.core_type = #tpu.core_type<tc>, window_params = [{transform_indices = @transform_0, window_bounds = array<i64: 256, 256>}, {transform_indices = @transform_1, window_bounds = array<i64: 256, 256>}, {pipeline_mode = #tpu.pipeline_mode<synchronous>, transform_indices = @transform_2, window_bounds = array<i64: 1, 256>}, {pipeline_mode = #tpu.pipeline_mode<synchronous>, transform_indices = @transform_3, window_bounds = array<i64: 256, 128>}, {pipeline_mode = #tpu.pipeline_mode<synchronous>, transform_indices = @transform_4, window_bounds = array<i64: 1, 128>}, {pipeline_mode = #tpu.pipeline_mode<synchronous>, transform_indices = @transform_5, window_bounds = array<i64: 128, 128>}, {pipeline_mode = #tpu.pipeline_mode<synchronous>, transform_indices = @transform_6, window_bounds = array<i64: 1, 128>}, {pipeline_mode = #tpu.pipeline_mode<synchronous>, transform_indices = @transform_7, window_bounds = array<i64: 128, 128>}, {pipeline_mode = #tpu.pipeline_mode<synchronous>, transform_indices = @transform_8, window_bounds = array<i64: 1, 128>}, {transform_indices = @transform_9, window_bounds = array<i64: 256, 128>}]} {
    %c0_i32 = arith.constant 0 : i32
    %0 = arith.cmpi eq, %arg1, %c0_i32 : i32
    %1 = arith.extui %0 : i1 to i32
    %c0_i32_0 = arith.constant 0 : i32
    %2 = arith.cmpi ne, %1, %c0_i32_0 : i32
    scf.if %2 {
      %cst_9 = arith.constant 0.000000e+00 : f32
      %12 = vector.broadcast %cst_9 : f32 to vector<256x256xf32>
      %c0_10 = arith.constant 0 : index
      %c0_11 = arith.constant 0 : index
      %13 = vector.load %arg12[%c0_10, %c0_11] : memref<256x256xf32, #tpu.memory_space<vmem>>, vector<256x256xf32>
      tpu.vector_store %arg12[%c0_10, %c0_11], %12 {strides = array<i32>} : memref<256x256xf32, #tpu.memory_space<vmem>>, vector<256x256xf32>,
    } else {
    }
    %c0 = arith.constant 0 : index
    %c0_1 = arith.constant 0 : index
    %3 = vector.load %arg12[%c0, %c0_1] : memref<256x256xf32, #tpu.memory_space<vmem>>, vector<256x256xf32>
    %c0_2 = arith.constant 0 : index
    %c0_3 = arith.constant 0 : index
    %4 = vector.load %arg2[%c0_2, %c0_3] : memref<256x256xbf16, #tpu.memory_space<vmem>>, vector<256x256xbf16>
    %c0_4 = arith.constant 0 : index
    %c0_5 = arith.constant 0 : index
    %5 = vector.load %arg3[%c0_4, %c0_5] : memref<256x256xbf16, #tpu.memory_space<vmem>>, vector<256x256xbf16>
    %cst = arith.constant dense<0.000000e+00> : vector<256x256xf32>
    %6 = tpu.matmul %4, %5, %cst {dimension_numbers = #tpu.dot_dimension_numbers<[1], [0], [0], [1], [0, 0, 1, 1], [], []>} : vector<256x256xbf16>, vector<256x256xbf16>, vector<256x256xf32> -> vector<256x256xf32>
    %7 = arith.addf %3, %6 : vector<256x256xf32>
    %c0_6 = arith.constant 0 : index
    %c0_7 = arith.constant 0 : index
    %8 = vector.load %arg12[%c0_6, %c0_7] : memref<256x256xf32, #tpu.memory_space<vmem>>, vector<256x256xf32>
    tpu.vector_store %arg12[%c0_6, %c0_7], %7 {strides = array<i32>} : memref<256x256xf32, #tpu.memory_space<vmem>>, vector<256x256xf32>,
    %c1_i32 = arith.constant 1 : i32
    %9 = arith.cmpi eq, %arg1, %c1_i32 : i32
    %10 = arith.extui %9 : i1 to i32
    %c0_i32_8 = arith.constant 0 : i32
    %11 = arith.cmpi ne, %10, %c0_i32_8 : i32
    scf.if %11 {
      %c0_9 = arith.constant 0 : index
      %c0_10 = arith.constant 0 : index
      %12 = vector.load %arg12[%c0_9, %c0_10] : memref<256x256xf32, #tpu.memory_space<vmem>>, vector<256x256xf32>
      %c0_11 = arith.constant 0 : index
      %c0_12 = arith.constant 0 : index
      %13 = vector.load %arg4[%c0_11, %c0_12] : memref<1x256xf32, #tpu.memory_space<vmem>>, vector<1x256xf32>
      %14 = vector.broadcast %13 : vector<1x256xf32> to vector<256x256xf32>
      %15 = arith.addf %12, %14 : vector<256x256xf32>
      %16 = arith.truncf %15 : vector<256x256xf32> to vector<256x256xbf16>
      %c0_13 = arith.constant 0 : index
      %c0_14 = arith.constant 0 : index
      %17 = vector.load %arg5[%c0_13, %c0_14] : memref<256x128xbf16, #tpu.memory_space<vmem>>, vector<256x128xbf16>
      %cst_15 = arith.constant dense<0.000000e+00> : vector<256x128xf32>
      %18 = tpu.matmul %16, %17, %cst_15 {dimension_numbers = #tpu.dot_dimension_numbers<[1], [0], [0], [1], [0, 0, 1, 1], [], []>} : vector<256x256xbf16>, vector<256x128xbf16>, vector<256x128xf32> -> vector<256x128xf32>
      %c0_16 = arith.constant 0 : index
      %c0_17 = arith.constant 0 : index
      %19 = vector.load %arg6[%c0_16, %c0_17] : memref<1x128xf32, #tpu.memory_space<vmem>>, vector<1x128xf32>
      %20 = vector.broadcast %19 : vector<1x128xf32> to vector<256x128xf32>
      %21 = arith.addf %18, %20 : vector<256x128xf32>
      %22 = arith.truncf %21 : vector<256x128xf32> to vector<256x128xbf16>
      %c0_18 = arith.constant 0 : index
      %c0_19 = arith.constant 0 : index
      %23 = vector.load %arg7[%c0_18, %c0_19] : memref<128x128xbf16, #tpu.memory_space<vmem>>, vector<128x128xbf16>
      %cst_20 = arith.constant dense<0.000000e+00> : vector<256x128xf32>
      %24 = tpu.matmul %22, %23, %cst_20 {dimension_numbers = #tpu.dot_dimension_numbers<[1], [0], [0], [1], [0, 0, 1, 1], [], []>} : vector<256x128xbf16>, vector<128x128xbf16>, vector<256x128xf32> -> vector<256x128xf32>
      %c0_21 = arith.constant 0 : index
      %c0_22 = arith.constant 0 : index
      %25 = vector.load %arg8[%c0_21, %c0_22] : memref<1x128xf32, #tpu.memory_space<vmem>>, vector<1x128xf32>
      %26 = vector.broadcast %25 : vector<1x128xf32> to vector<256x128xf32>
      %27 = arith.addf %24, %26 : vector<256x128xf32>
      %28 = arith.truncf %27 : vector<256x128xf32> to vector<256x128xbf16>
      %c0_23 = arith.constant 0 : index
      %c0_24 = arith.constant 0 : index
      %29 = vector.load %arg9[%c0_23, %c0_24] : memref<128x128xbf16, #tpu.memory_space<vmem>>, vector<128x128xbf16>
      %cst_25 = arith.constant dense<0.000000e+00> : vector<256x128xf32>
      %30 = tpu.matmul %28, %29, %cst_25 {dimension_numbers = #tpu.dot_dimension_numbers<[1], [0], [0], [1], [0, 0, 1, 1], [], []>} : vector<256x128xbf16>, vector<128x128xbf16>, vector<256x128xf32> -> vector<256x128xf32>
      %c0_26 = arith.constant 0 : index
      %c0_27 = arith.constant 0 : index
      %31 = vector.load %arg10[%c0_26, %c0_27] : memref<1x128xf32, #tpu.memory_space<vmem>>, vector<1x128xf32>
      %32 = vector.broadcast %31 : vector<1x128xf32> to vector<256x128xf32>
      %33 = arith.addf %30, %32 : vector<256x128xf32>
      %c0_28 = arith.constant 0 : index
      %c0_29 = arith.constant 0 : index
      %34 = vector.load %arg11[%c0_28, %c0_29] : memref<256x128xf32, #tpu.memory_space<vmem>>, vector<256x128xf32>
      tpu.vector_store %arg11[%c0_28, %c0_29], %33 {strides = array<i32>} : memref<256x128xf32, #tpu.memory_space<vmem>>, vector<256x128xf32>,
    } else {
    }
    return
  }
  func.func @transform_0(%arg0: i32, %arg1: i32) -> (i32, i32) {
    %c0_i32 = arith.constant 0 : i32
    return %arg0, %arg1 : i32, i32
  }
  func.func @transform_1(%arg0: i32, %arg1: i32) -> (i32, i32) {
    %c0_i32 = arith.constant 0 : i32
    %c0_i32_0 = arith.constant 0 : i32
    return %arg1, %c0_i32 : i32, i32
  }
  func.func @transform_2(%arg0: i32, %arg1: i32) -> (i32, i32) {
    %c0_i32 = arith.constant 0 : i32
    %c0_i32_0 = arith.constant 0 : i32
    %c0_i32_1 = arith.constant 0 : i32
    return %c0_i32, %c0_i32_0 : i32, i32
  }
  func.func @transform_3(%arg0: i32, %arg1: i32) -> (i32, i32) {
    %c0_i32 = arith.constant 0 : i32
    %c0_i32_0 = arith.constant 0 : i32
    %c0_i32_1 = arith.constant 0 : i32
    return %c0_i32, %c0_i32_0 : i32, i32
  }
  func.func @transform_4(%arg0: i32, %arg1: i32) -> (i32, i32) {
    %c0_i32 = arith.constant 0 : i32
    %c0_i32_0 = arith.constant 0 : i32
    %c0_i32_1 = arith.constant 0 : i32
    return %c0_i32, %c0_i32_0 : i32, i32
  }
  func.func @transform_5(%arg0: i32, %arg1: i32) -> (i32, i32) {
    %c0_i32 = arith.constant 0 : i32
    %c0_i32_0 = arith.constant 0 : i32
    %c0_i32_1 = arith.constant 0 : i32
    return %c0_i32, %c0_i32_0 : i32, i32
  }
  func.func @transform_6(%arg0: i32, %arg1: i32) -> (i32, i32) {
    %c0_i32 = arith.constant 0 : i32
    %c0_i32_0 = arith.constant 0 : i32
    %c0_i32_1 = arith.constant 0 : i32
    return %c0_i32, %c0_i32_0 : i32, i32
  }
  func.func @transform_7(%arg0: i32, %arg1: i32) -> (i32, i32) {
    %c0_i32 = arith.constant 0 : i32
    %c0_i32_0 = arith.constant 0 : i32
    %c0_i32_1 = arith.constant 0 : i32
    return %c0_i32, %c0_i32_0 : i32, i32
  }
  func.func @transform_8(%arg0: i32, %arg1: i32) -> (i32, i32) {
    %c0_i32 = arith.constant 0 : i32
    %c0_i32_0 = arith.constant 0 : i32
    %c0_i32_1 = arith.constant 0 : i32
    return %c0_i32, %c0_i32_0 : i32, i32
  }
  func.func @transform_9(%arg0: i32, %arg1: i32) -> (i32, i32) {
    %c0_i32 = arith.constant 0 : i32
    %c0_i32_0 = arith.constant 0 : i32
    return %arg0, %c0_i32 : i32, i32
  }
}

</mosaic_0001>

<bundles_post_ra>
// kernel: tpu_custom_call.1
= control target key start
LH: loop header
LB: loop body
LE: loop exit
PB: predicated region body
PF: predicated region fallthrough
CT: control target
= control target key end

     0   :  { %s3980_s0 = inlined_call_operand.hbm [shape: bf16[256,512], index: 0, kind: input, shape index: {}]   ;;  %s3981_s1 = inlined_call_operand.hbm [shape: bf16[512,256], index: 1, kind: input, shape index: {}]   ;;  %s3982_s2 = inlined_call_operand.vmem [shape: f32[1,256], index: 2, kind: input, shape index: {}]   ;;  %s3983_s3 = inlined_call_operand.hbm [shape: bf16[256,128], index: 3, kind: input, shape index: {}]   ;;  %s3984_s4 = inlined_call_operand.vmem [shape: f32[1,128], index: 4, kind: input, shape index: {}]   ;;  %s3985_s5 = inlined_call_operand.hbm [shape: bf16[128,128], index: 5, kind: input, shape index: {}]   ;;  %s3986_s6 = inlined_call_operand.vmem [shape: f32[1,128], index: 6, kind: input, shape index: {}]   ;;  %s3987_s7 = inlined_call_operand.hbm [shape: bf16[128,128], index: 7, kind: input, shape index: {}]   ;;  %s3988_s8 = inlined_call_operand.vmem [shape: f32[1,128], index: 8, kind: input, shape index: {}]   ;;  %s3989_s9 = inlined_call_operand.hbm [shape: f32[256,128], index: 9, kind: output, shape index: {}]  }
   0x1   :  { %3995 = sst [smem:[#allocation18_spill]] %s3980_s0 }
   0x2   :  { %3996 = sst [smem:[#allocation19_spill]] %s3983_s3 }
   0x3   :  { %3997 = sst [smem:[#allocation20_spill]] %s3985_s5 }
   0x4   :  { %3998 = sst [smem:[#allocation21_spill]] %s3986_s6 }
   0x5   :  { %3999 = sst [smem:[#allocation22_spill]] %s3988_s8 }
   0x6   :  { %4000 = sst [smem:[#allocation23_spill]] %s3989_s9 }
   0x7   :  { %14 = vsyncpa [#allocation4], 0 }
   0x8   :  { %16 = vsyncpa [#allocation4 + $0x1], 0 }
   0x9   :  { %17 = vsyncpa [#allocation7], 0 }
   0xa   :  { %19 = vsyncpa [#allocation7 + $0x1], 0 }
   0xb   :  { %20 = vsyncpa [#allocation10], 0 }
   0xc   :  { %21 = vsyncpa [#allocation5], 0  ;;  %s3365_s30 = smov 0   ;;  %s3367_s10 = smov 0  }
   0xd   :  { %s3369_s11 = smov 0   ;;  %s3371_s12 = smov 0  }
   0xe   :  { %s3373_s13 = smov 0   ;;  %s3375_s14 = smov 0  }
   0xf LB: > { %s3394_s15 = sadd.s32 4294967295, %s3299_s14   ;;  %p55_p0 = scmp.ne.s32.totalorder %s3287_s11, %s3283_s10  ;;  %s3299_s14 = sphi %s3375_s14, %s27_s14   ;;  %s3295_s13 = sphi %s3373_s13, %s4025_s13   ;;  %s3291_s12 = sphi %s3371_s12, %s4024_s12   ;;  %s3287_s11 = sphi %s3369_s11, %s4023_s11   ;;  %s3283_s10 = sphi %s3367_s10, %s4022_s10   ;;  %s3279_s30 = sphi %s3365_s30, %s4021_s30  }
  0x10   : > { %p56_p1 = scmp.eq.s32.totalorder %s3299_s14, 0  ;;  %p61_p2 = scmp.ne.s32.totalorder %s3283_s10, %s3279_s30 }
  0x11   : > { %p3990_p3 = scmp.eq.s32.totalorder %s3394_s15, 0  ;;  %p2415_p5 = scmp.ge.s32.totalorder %s3299_s14, 1 }
  0x12   : > { %p57_p4 = por %p56_p1, %p55_p0  ;;  %p271_p7 = scmp.lt.s32.totalorder %s3299_s14, 3 }
  0x13   : > { %p3405_p6 = por %p3990_p3, %p61_p2  ;;  %s3301_s19 = smov [#allocation8]  }
  0x14   : > { %p3410_p8 = pnand %p2415_p5, %p271_p7  ;;  %s286_s20 = sshll.u32 %s3301_s19, 4  ;;  %s3414_s20 = int_to_ptr.vmem [resolvable:$true] %s286_s20 }
  0x15   : > { %s4001_s17 = scalar_select %p3405_p6, 1, 0 }
  0x16   : > { %s4002_s18 = scalar_select %p3410_p8, 1, 0 }
  0x17   : > { %p2849_p9 = pneg %p3410_p8  ;;  %p2869_p10 = scmp.lt.s32.totalorder %s3299_s14, 2 }
  0x18   : > { %s3302_s23 = smov [#allocation9]   ;;  %s4005_s3 = sld [smem:[#allocation19_spill]] }
  0x19   : > { %p3421_p11 = pnand %p2849_p9, %p3990_p3  ;;  %p3425_p12 = pnand %p2869_p10, %p57_p4 }
  0x1a   : > { %s302_s24 = sshll.u32 %s3302_s23, 4  ;;  %s3429_s24 = int_to_ptr.vmem [resolvable:$true] %s302_s24 }
  0x1b   : > { %s4004_s22 = scalar_select %p3425_p12, 1, 0 }
  0x1c   : > { %p3439_p0 = pneg %p3421_p11 }
  0x1e   : > { %s3063_s27 = scalar_lea.hbm %s4005_s3, 2048 }
  0x1f   : > { %p3064_p13 = scmp.ne.s32.totalorder %s4005_s3, %s3063_s27  ;;  %p3070_p4 = scmp.lt.u32.totalorder %s3063_s27, %s4005_s3 }
  0x21   : > { %p3066_p1 = pnand %p3439_p0, %p3064_p13 }
  0x23   : > { %p3067_p2 = pneg %p3066_p1 }
  0x25   : > { %p3072_p5 = pnand %p3070_p4, %p3067_p2 }
  0x27   : > { %3075 = shalt.err (!%p3072_p5)
}
  0x28   : > { %s3076_s25 = scalar_lea.vmem %s3414_s20, 2048  ;;  %p3084_p3 = scmp.lt.s32.totalorder %s3414_s20, %s3414_s20 }
  0x29   : > { %p3077_p7 = scmp.ne.s32.totalorder %s3414_s20, %s3076_s25  ;;  %p3085_p6 = scmp.lt.s32.totalorder %s3076_s25, %s3076_s25 }
  0x2b   : > { %p3079_p9 = pnand %p3077_p7, %p3439_p0  ;;  %p3086_p13 = por %p3085_p6, %p3084_p3 }
  0x2d   : > { %p3080_p10 = pneg %p3079_p9 }
  0x2f   : > { %p3087_p1 = pnand %p3086_p13, %p3080_p10 }
  0x31   : > { %3090 = shalt.err (!%p3087_p1)
}
  0x32   : > { %s3303_s26 = smov 64   ;;  %s3304_s27 = smov 4  }
  0x33   : > { %2852 = dma.hbm_to_vmem [thread:$0]  (!%p3421_p11), %s4005_s3, 2048, %s3414_s20, [#allocation7], %s3303_s26, %s3303_s26, %s3304_s27  }
  0x34   : > { %s4007_s5 = sld [smem:[#allocation20_spill]] }
  0x3a   : > { %s3091_s25 = scalar_lea.hbm %s4007_s5, 1024 }
  0x3b   : > { %p3092_p3 = scmp.ne.s32.totalorder %s4007_s5, %s3091_s25  ;;  %p3098_p4 = scmp.lt.u32.totalorder %s3091_s25, %s4007_s5 }
  0x3d   : > { %p3094_p6 = pnand %p3092_p3, %p3439_p0 }
  0x3f   : > { %p3095_p2 = pneg %p3094_p6 }
  0x41   : > { %p3100_p5 = pnand %p3098_p4, %p3095_p2 }
  0x43   : > { %3103 = shalt.err (!%p3100_p5)
}
  0x44   : > { %s3104_s20 = scalar_lea.vmem %s3429_s24, 1024  ;;  %p3112_p13 = scmp.lt.s32.totalorder %s3429_s24, %s3429_s24 }
  0x45   : > { %p3105_p7 = scmp.ne.s32.totalorder %s3429_s24, %s3104_s20  ;;  %p3113_p1 = scmp.lt.s32.totalorder %s3104_s20, %s3104_s20 }
  0x47   : > { %p3107_p9 = pnand %p3105_p7, %p3439_p0  ;;  %p3114_p3 = por %p3113_p1, %p3112_p13 }
  0x49   : > { %p3108_p10 = pneg %p3107_p9 }
  0x4b   : > { %p3115_p6 = pnand %p3114_p3, %p3108_p10 }
  0x4d   : > { %3118 = shalt.err (!%p3115_p6)
}
  0x4e   : > { %2855 = dma.hbm_to_vmem [thread:$0]  (!%p3421_p11), %s4007_s5, 1024, %s3429_s24, [#allocation10], %s3303_s26, %s3303_s26, %s3304_s27  }
  0x4f   : > { %s3305_s9 = smov [#allocation11]   ;;  %s3119_s19 = scalar_lea.hbm %s3987_s7, 1024 }
  0x50   : > { %s318_s16 = sshll.u32 %s3305_s9, 4  ;;  %p3120_p2 = scmp.ne.s32.totalorder %s3987_s7, %s3119_s19  ;;  %s319_s16 = int_to_ptr.vmem [resolvable:$true] %s318_s16 }
  0x51   : > { %p3126_p7 = scmp.lt.u32.totalorder %s3119_s19, %s3987_s7 }
  0x52   : > { %p3122_p4 = pnand %p3120_p2, %p3439_p0 }
  0x54   : > { %p3123_p5 = pneg %p3122_p4 }
  0x56   : > { %p3128_p9 = pnand %p3126_p7, %p3123_p5 }
  0x58   : > { %3131 = shalt.err (!%p3128_p9)
}
  0x59   : > { %s3132_s24 = scalar_lea.vmem %s319_s16, 1024  ;;  %p3140_p3 = scmp.lt.s32.totalorder %s319_s16, %s319_s16 }
  0x5a   : > { %p3133_p10 = scmp.ne.s32.totalorder %s319_s16, %s3132_s24  ;;  %p3141_p6 = scmp.lt.s32.totalorder %s3132_s24, %s3132_s24 }
  0x5c   : > { %p3135_p13 = pnand %p3133_p10, %p3439_p0  ;;  %p3142_p8 = por %p3141_p6, %p3140_p3 }
  0x5e   : > { %p3136_p1 = pneg %p3135_p13 }
  0x60   : > { %p3143_p12 = pnand %p3142_p8, %p3136_p1 }
  0x62   : > { %3146 = shalt.err (!%p3143_p12)
}
  0x63   : > { %2858 = dma.hbm_to_vmem [thread:$0]  (!%p3421_p11), %s3987_s7, 1024, %s319_s16, [#allocation10], %s3303_s26, %s3303_s26, %s3304_s27  }
  0x64   : > { %s36_s30 = sadd.s32 1, %s3295_s13  ;;  %s335_s8 = sand.u32 1, %s3287_s11  }
  0x65   : > { %p37_p8 = scmp.ge.s32.totalorder %s36_s30, 2  ;;  %s3512_s21 = sshll.u32 %s335_s8, 8 }
  0x66   : > { %s2538_s9 = sshll.u32 %s3295_s13, 7  ;;  %s4008_s0 = sld [smem:[#allocation18_spill]] }
  0x67   : > { %s4027_s30 = smov (%p37_p8, %s36_s30), 0  ;;  %s339_s27 = scalar_lea.vmem [#allocation3], %s3512_s21 }
  0x68   : > { %s44_s26 = ssub.s32 %s3295_s13, %s4027_s30  ;;  %s349_s16 = sshll.u32 %s339_s27, 4  ;;  %s3525_s16 = int_to_ptr.vmem [resolvable:$true] %s349_s16 }
  0x69   : > { %p46_p11 = scmp.eq.s32.totalorder %s44_s26, 0  ;;  %s4009_s23 = sadd.s32 1, %s3287_s11 }
  0x6a   : > { %s359_s20 = sand.u32 1, %s3299_s14   ;;  %s3533_s24 = scalar_lea.sflag [#allocation4], %s335_s8 }
  0x6b   : > { %s3530_s25 = scalar_select %p46_p11, %s3287_s11, %s4009_s23  }
  0x6c   : > { %s3520_s19 = scalar_lea.hbm %s4008_s0, %s2538_s9  ;;  %p4010_p0 = scmp.ne.s32.totalorder %s4004_s22, 0 }
  0x6d   : > { %s3147_s3 = scalar_lea.hbm %s3520_s19, 4096  ;;  %s3152_s28 = scalar_lea.hbm %s4008_s0, 8192 }
  0x6e   : > { %p3148_p12 = scmp.ne.s32.totalorder %s3520_s19, %s3147_s3  ;;  %p3149_p2 = pneg %p4010_p0 }
  0x6f   : > { %p3153_p7 = scmp.lt.u32.totalorder %s3520_s19, %s4008_s0  ;;  %p3154_p9 = scmp.lt.u32.totalorder %s3152_s28, %s3147_s3 }
  0x70   : > { %p3150_p4 = pnand %p3149_p2, %p3148_p12  ;;  %p3156_p13 = scmp.lt.u32.totalorder %s3147_s3, %s3520_s19 }
  0x71   : > { %p3155_p10 = por %p3154_p9, %p3153_p7 }
  0x72   : > { %p3151_p5 = pneg %p3150_p4 }
  0x73   : > { %p3157_p1 = por %p3156_p13, %p3155_p10 }
  0x75   : > { %p3158_p3 = pnand %p3157_p1, %p3151_p5 }
  0x77   : > { %3161 = shalt.err (!%p3158_p3)
}
  0x78   : > { %s3162_s8 = scalar_lea.vmem %s3525_s16, 4096  ;;  %s3306_s27 = smov [#allocation3]  }
  0x79   : > { %p3163_p6 = scmp.ne.s32.totalorder %s3525_s16, %s3162_s8  ;;  %s3167_s23 = sshll.u32 %s3306_s27, 4  ;;  %s3168_s23 = int_to_ptr.vmem [resolvable:$false] %s3167_s23 }
  0x7a   : > { %s3169_s6 = scalar_lea.vmem %s3168_s23, 8192  ;;  %p3170_p12 = scmp.lt.s32.totalorder %s3525_s16, %s3168_s23 }
  0x7b   : > { %p3165_p8 = pnand %p3163_p6, %p3149_p2  ;;  %p3171_p4 = scmp.lt.s32.totalorder %s3169_s6, %s3162_s8 }
  0x7d   : > { %p3166_p11 = pneg %p3165_p8  ;;  %p3172_p7 = por %p3171_p4, %p3170_p12 }
  0x7f   : > { %p3173_p9 = pnand %p3172_p7, %p3166_p11 }
  0x81   : > { %3176 = shalt.err (!%p3173_p9)
}
  0x82   : > { %s3307_s3 = smov 256   ;;  %s3308_s9 = smov 128  }
  0x83   : > { %s3309_s28 = smov 8   ;;  %s2540_s29 = sshll.u32 %s3295_s13, 12 }
  0x84   : > { %2862 = dma.hbm_to_vmem [thread:$0]  (!%p4010_p0), %s3520_s19, 4096, %s3525_s16, %s3533_s24, %s3307_s3, %s3308_s9, %s3309_s28  }
  0x85   : > { %s363_s26 = scalar_lea.vmem [#allocation6], %s3512_s21  ;;  %s3568_s6 = scalar_lea.hbm %s3981_s1, %s2540_s29 }
  0x86   : > { %s371_s8 = sshll.u32 %s363_s26, 4  ;;  %s3574_s0 = scalar_lea.sflag [#allocation7], %s359_s20  ;;  %s3570_s8 = int_to_ptr.vmem [resolvable:$true] %s371_s8 }
  0x87   : > { %s3177_s5 = scalar_lea.hbm %s3568_s6, 4096  ;;  %s3182_s16 = scalar_lea.hbm %s3981_s1, 8192 }
  0x88   : > { %p3178_p5 = scmp.ne.s32.totalorder %s3568_s6, %s3177_s5  ;;  %p3183_p1 = scmp.lt.u32.totalorder %s3568_s6, %s3981_s1 }
  0x89   : > { %p3184_p3 = scmp.lt.u32.totalorder %s3182_s16, %s3177_s5  ;;  %p3186_p8 = scmp.lt.u32.totalorder %s3177_s5, %s3568_s6 }
  0x8a   : > { %p3180_p10 = pnand %p3178_p5, %p3149_p2 }
  0x8b   : > { %p3185_p6 = por %p3184_p3, %p3183_p1 }
  0x8c   : > { %p3181_p13 = pneg %p3180_p10 }
  0x8d   : > { %p3187_p11 = por %p3186_p8, %p3185_p6 }
  0x8f   : > { %p3188_p12 = pnand %p3187_p11, %p3181_p13 }
  0x91   : > { %3191 = shalt.err (!%p3188_p12)
}
  0x92   : > { %s3192_s20 = scalar_lea.vmem %s3570_s8, 4096  ;;  %s3310_s29 = smov [#allocation6]  }
  0x93   : > { %p3193_p4 = scmp.ne.s32.totalorder %s3570_s8, %s3192_s20  ;;  %s3197_s26 = sshll.u32 %s3310_s29, 4  ;;  %s3198_s26 = int_to_ptr.vmem [resolvable:$false] %s3197_s26 }
  0x94   : > { %s3199_s27 = scalar_lea.vmem %s3198_s26, 8192  ;;  %p3200_p5 = scmp.lt.s32.totalorder %s3570_s8, %s3198_s26 }
  0x95   : > { %p3195_p7 = pnand %p3193_p4, %p3149_p2  ;;  %p3201_p10 = scmp.lt.s32.totalorder %s3199_s27, %s3192_s20 }
  0x97   : > { %p3196_p9 = pneg %p3195_p7  ;;  %p3202_p1 = por %p3201_p10, %p3200_p5 }
  0x99   : > { %p3203_p3 = pnand %p3202_p1, %p3196_p9 }
  0x9b   : > { %3206 = shalt.err (!%p3203_p3)
}
  0x9c   : > { %2865 = dma.hbm_to_vmem [thread:$0]  (!%p4010_p0), %s3568_s6, 4096, %s3570_s8, %s3574_s0, %s3308_s9, %s3308_s9, %s3309_s28  }
  0x9d   : > { %p4011_p2 = scmp.ne.s32.totalorder %s4002_s18, 0 }
  0x9e   : > { %s385_s5 = sand.u32 (!%p4011_p2), 1, %s3283_s10   ;;  %p4012_p13 = scmp.ne.s32.totalorder (!%p4011_p2), %s4001_s17, 0 }
  0x9f   : > { %383 = sbr.rel (%p4011_p2) target bundleno = 1373 (0x55d), region = 56  ;;  %s2428_s23 = sshll.u32 (!%p4011_p2), %s385_s5, 8 }
  0xa0   : > { %s386_s21 = scalar_lea.sflag (!%p4011_p2), [#allocation4], %s385_s5  ;;  %s3606_s19 = scalar_lea.vmem (!%p4011_p2), [#allocation3], %s2428_s23 }
  0xa6   : > { %3258 = dma.done.wait (%p4012_p13), %s386_s21, 4096  }
  0xa7   : > { %3260 = vsyncadd (%p4012_p13), %s386_s21, 4294963200  ;;  %s394_s22 = sand.u32 1, %s3394_s15   ;;  %s3613_s0 = scalar_lea.vmem [#allocation6], %s2428_s23 }
  0xa8   : > { %s395_s16 = scalar_lea.sflag [#allocation7], %s394_s22 }
  0xa9   : > { %3262 = dma.done.wait (%p4012_p13), %s395_s16, 4096  }
  0xaa   : > { %3264 = vsyncadd (%p4012_p13), %s395_s16, 4294963200  ;;  %p4013_p0 = scmp.eq.s32.totalorder %s3394_s15, 0 }
  0xac   : > { %3266 = dma.done.wait (%p4013_p0), [#allocation7], 2048   ;;  %p4014_p6 = pmov %p4013_p0 }
  0xad   : > { %p4015_p8 = pmov %p4013_p0 }
  0xae   : > { %3268 = vsyncadd (%p4014_p6), [#allocation7], 4294965248 }
  0xaf   : > { %3270 = dma.done.wait (%p4015_p8), [#allocation10], 2048   ;;  %p4016_p11 = pmov %p4013_p0 }
  0xb0   : > { %p2433_p12 = scmp.ne.s32.totalorder %s3291_s12, 0 }
  0xb1   : > { %3272 = vsyncadd (%p4016_p11), [#allocation10], 4294965248  ;;  %v3311_v0 = vmov (!%p2433_p12), 0.0  }
  0xb2   : > { %453 = sbr.rel (%p2433_p12) target bundleno = 210 (0xd2), region = 80  ;;  %454 = vst [vmem:[#allocation2] sm:$0xff] (!%p2433_p12), %v3311_v0  ;;  %455 = vst [vmem:[#allocation2 + $0x8] sm:$0xff] (!%p2433_p12), %v3311_v0 }
  0xb3   : > { %456 = vst [vmem:[#allocation2 + $0x10] sm:$0xff] (!%p2433_p12), %v3311_v0  ;;  %457 = vst [vmem:[#allocation2 + $0x18] sm:$0xff] (!%p2433_p12), %v3311_v0 }
  0xb4   : > { %458 = vst [vmem:[#allocation2 + $0x20] sm:$0xff] (!%p2433_p12), %v3311_v0  ;;  %459 = vst [vmem:[#allocation2 + $0x28] sm:$0xff] (!%p2433_p12), %v3311_v0 }
  0xb5   : > { %460 = vst [vmem:[#allocation2 + $0x30] sm:$0xff] (!%p2433_p12), %v3311_v0  ;;  %461 = vst [vmem:[#allocation2 + $0x38] sm:$0xff] (!%p2433_p12), %v3311_v0 }
  0xb6   : > { %462 = vst [vmem:[#allocation2 + $0x40] sm:$0xff] (!%p2433_p12), %v3311_v0  ;;  %463 = vst [vmem:[#allocation2 + $0x48] sm:$0xff] (!%p2433_p12), %v3311_v0 }
  0xb7   : > { %464 = vst [vmem:[#allocation2 + $0x50] sm:$0xff] (!%p2433_p12), %v3311_v0  ;;  %465 = vst [vmem:[#allocation2 + $0x58] sm:$0xff] (!%p2433_p12), %v3311_v0 }
  0xb8   : > { %466 = vst [vmem:[#allocation2 + $0x60] sm:$0xff] (!%p2433_p12), %v3311_v0  ;;  %467 = vst [vmem:[#allocation2 + $0x68] sm:$0xff] (!%p2433_p12), %v3311_v0 }
  0xb9   : > { %468 = vst [vmem:[#allocation2 + $0x70] sm:$0xff] %v3311_v0  ;;  %469 = vst [vmem:[#allocation2 + $0x78] sm:$0xff] %v3311_v0 }
  0xba   : > { %470 = vst [vmem:[#allocation2 + $0x80] sm:$0xff] %v3311_v0  ;;  %471 = vst [vmem:[#allocation2 + $0x88] sm:$0xff] %v3311_v0 }
  0xbb   : > { %472 = vst [vmem:[#allocation2 + $0x90] sm:$0xff] %v3311_v0  ;;  %473 = vst [vmem:[#allocation2 + $0x98] sm:$0xff] %v3311_v0 }
  0xbc   : > { %474 = vst [vmem:[#allocation2 + $0xa0] sm:$0xff] %v3311_v0  ;;  %475 = vst [vmem:[#allocation2 + $0xa8] sm:$0xff] %v3311_v0 }
  0xbd   : > { %476 = vst [vmem:[#allocation2 + $0xb0] sm:$0xff] %v3311_v0  ;;  %477 = vst [vmem:[#allocation2 + $0xb8] sm:$0xff] %v3311_v0 }
  0xbe   : > { %478 = vst [vmem:[#allocation2 + $0xc0] sm:$0xff] %v3311_v0  ;;  %479 = vst [vmem:[#allocation2 + $0xc8] sm:$0xff] %v3311_v0 }
  0xbf   : > { %480 = vst [vmem:[#allocation2 + $0xd0] sm:$0xff] %v3311_v0  ;;  %481 = vst [vmem:[#allocation2 + $0xd8] sm:$0xff] %v3311_v0 }
  0xc0   : > { %482 = vst [vmem:[#allocation2 + $0xe0] sm:$0xff] %v3311_v0  ;;  %483 = vst [vmem:[#allocation2 + $0xe8] sm:$0xff] %v3311_v0 }
  0xc1   : > { %484 = vst [vmem:[#allocation2 + $0xf0] sm:$0xff] %v3311_v0  ;;  %485 = vst [vmem:[#allocation2 + $0xf8] sm:$0xff] %v3311_v0 }
  0xc2   : > { %486 = vst [vmem:[#allocation2 + $0x100] sm:$0xff] %v3311_v0  ;;  %487 = vst [vmem:[#allocation2 + $0x108] sm:$0xff] %v3311_v0 }
  0xc3   : > { %488 = vst [vmem:[#allocation2 + $0x110] sm:$0xff] %v3311_v0  ;;  %489 = vst [vmem:[#allocation2 + $0x118] sm:$0xff] %v3311_v0 }
  0xc4   : > { %490 = vst [vmem:[#allocation2 + $0x120] sm:$0xff] %v3311_v0  ;;  %491 = vst [vmem:[#allocation2 + $0x128] sm:$0xff] %v3311_v0 }
  0xc5   : > { %492 = vst [vmem:[#allocation2 + $0x130] sm:$0xff] %v3311_v0  ;;  %493 = vst [vmem:[#allocation2 + $0x138] sm:$0xff] %v3311_v0 }
  0xc6   : > { %494 = vst [vmem:[#allocation2 + $0x140] sm:$0xff] %v3311_v0  ;;  %495 = vst [vmem:[#allocation2 + $0x148] sm:$0xff] %v3311_v0 }
  0xc7   : > { %496 = vst [vmem:[#allocation2 + $0x150] sm:$0xff] %v3311_v0  ;;  %497 = vst [vmem:[#allocation2 + $0x158] sm:$0xff] %v3311_v0 }
  0xc8   : > { %498 = vst [vmem:[#allocation2 + $0x160] sm:$0xff] %v3311_v0  ;;  %499 = vst [vmem:[#allocation2 + $0x168] sm:$0xff] %v3311_v0 }
  0xc9   : > { %500 = vst [vmem:[#allocation2 + $0x170] sm:$0xff] %v3311_v0  ;;  %501 = vst [vmem:[#allocation2 + $0x178] sm:$0xff] %v3311_v0 }
  0xca   : > { %502 = vst [vmem:[#allocation2 + $0x180] sm:$0xff] %v3311_v0  ;;  %503 = vst [vmem:[#allocation2 + $0x188] sm:$0xff] %v3311_v0 }
  0xcb   : > { %504 = vst [vmem:[#allocation2 + $0x190] sm:$0xff] %v3311_v0  ;;  %505 = vst [vmem:[#allocation2 + $0x198] sm:$0xff] %v3311_v0 }
  0xcc   : > { %506 = vst [vmem:[#allocation2 + $0x1a0] sm:$0xff] %v3311_v0  ;;  %507 = vst [vmem:[#allocation2 + $0x1a8] sm:$0xff] %v3311_v0 }
  0xcd   : > { %508 = vst [vmem:[#allocation2 + $0x1b0] sm:$0xff] %v3311_v0  ;;  %509 = vst [vmem:[#allocation2 + $0x1b8] sm:$0xff] %v3311_v0 }
  0xce   : > { %510 = vst [vmem:[#allocation2 + $0x1c0] sm:$0xff] %v3311_v0  ;;  %511 = vst [vmem:[#allocation2 + $0x1c8] sm:$0xff] %v3311_v0 }
  0xcf   : > { %512 = vst [vmem:[#allocation2 + $0x1d0] sm:$0xff] %v3311_v0  ;;  %513 = vst [vmem:[#allocation2 + $0x1d8] sm:$0xff] %v3311_v0 }
  0xd0   : > { %514 = vst [vmem:[#allocation2 + $0x1e0] sm:$0xff] %v3311_v0  ;;  %515 = vst [vmem:[#allocation2 + $0x1e8] sm:$0xff] %v3311_v0 }
  0xd1   : > { %516 = vst [vmem:[#allocation2 + $0x1f0] sm:$0xff] %v3311_v0  ;;  %517 = vst [vmem:[#allocation2 + $0x1f8] sm:$0xff] %v3311_v0 }
  0xd2 PF: > { %v2935_v1 = vld [vmem:[%s3613_s0 + $0x4] ss:$8 sps:$4 sm:$0xff]   ;;  %v2937_v2 = vld [vmem:[%s3613_s0] ss:$8 sps:$4 sm:$0xff]   ;;  %v2938_v3 = vld [vmem:[%s3613_s0 + $0x14] ss:$8 sps:$4 sm:$0xff]  }
  0xd3   : > { %966 = vmatprep.subr.bf16.mxu0 %v2935_v1  ;;  %2797 = vmatprep.subr.bf16.mxu1 %v2935_v1  ;;  %v2940_v4 = vld [vmem:[%s3613_s0 + $0x10] ss:$8 sps:$4 sm:$0xff]   ;;  %v2941_v5 = vld [vmem:[%s3613_s0 + $0x24] ss:$8 sps:$4 sm:$0xff]   ;;  %v2943_v6 = vld [vmem:[%s3613_s0 + $0x20] ss:$8 sps:$4 sm:$0xff]  }
  0xd4   : > { %967 = vmatpush1.bf16.msra.mxu0 %v2937_v2  ;;  %2813 = vmatpush1.bf16.msra.mxu1 %v2937_v2  ;;  %v2944_v7 = vld [vmem:[%s3613_s0 + $0x34] ss:$8 sps:$4 sm:$0xff]   ;;  %v2946_v8 = vld [vmem:[%s3613_s0 + $0x30] ss:$8 sps:$4 sm:$0xff]   ;;  %v2947_v9 = vld [vmem:[%s3613_s0 + $0x44] ss:$8 sps:$4 sm:$0xff]  }
  0xd5   : > { %968 = vmatprep.subr.bf16.mxu0 %v2938_v3  ;;  %2798 = vmatprep.subr.bf16.mxu1 %v2938_v3  ;;  %v2949_v10 = vld [vmem:[%s3613_s0 + $0x40] ss:$8 sps:$4 sm:$0xff]   ;;  %v2950_v11 = vld [vmem:[%s3613_s0 + $0x54] ss:$8 sps:$4 sm:$0xff]   ;;  %v2952_v12 = vld [vmem:[%s3613_s0 + $0x50] ss:$8 sps:$4 sm:$0xff]  }
  0xd6   : > { %v2953_v13 = vld [vmem:[%s3613_s0 + $0x64] ss:$8 sps:$4 sm:$0xff]   ;;  %v2955_v15 = vld [vmem:[%s3613_s0 + $0x60] ss:$8 sps:$4 sm:$0xff]   ;;  %v2956_v17 = vld [vmem:[%s3613_s0 + $0x74] ss:$8 sps:$4 sm:$0xff]  }
  0xd7   : > { %v2985_v14 = vld [vmem:[%s3606_s19 + $0x4] ss:$8 sps:$4 sm:$0xff]   ;;  %v2958_v18 = vld [vmem:[%s3613_s0 + $0x70] ss:$8 sps:$4 sm:$0xff]   ;;  %v2961_v20 = vld [vmem:[%s3613_s0 + $0x80] ss:$8 sps:$4 sm:$0xff]  }
  0xd8   : > { %969 = vmatpush1.bf16.msra.mxu0 %v2940_v4  ;;  %2814 = vmatpush1.bf16.msra.mxu1 %v2940_v4  ;;  %v2988_v16 = vld [vmem:[%s3606_s19 + $0x84] ss:$8 sps:$4 sm:$0xff]   ;;  %v2962_v21 = vld [vmem:[%s3613_s0 + $0x94] ss:$8 sps:$4 sm:$0xff]   ;;  %v2964_v22 = vld [vmem:[%s3613_s0 + $0x90] ss:$8 sps:$4 sm:$0xff]  }
  0xd9   : > { %970 = vmatprep.subr.bf16.mxu0 %v2941_v5  ;;  %2799 = vmatprep.subr.bf16.mxu1 %v2941_v5  ;;  %v2959_v19 = vld [vmem:[%s3613_s0 + $0x84] ss:$8 sps:$4 sm:$0xff]   ;;  %v2967_v24 = vld [vmem:[%s3613_s0 + $0xa0] ss:$8 sps:$4 sm:$0xff]   ;;  %v2968_v25 = vld [vmem:[%s3613_s0 + $0xb4] ss:$8 sps:$4 sm:$0xff]  }
  0xda   : > { %998 = vmatprep.mubr.bf16.mxu0 %v2985_v14  ;;  %1078 = vmatprep.mubr.bf16.mxu1 %v2988_v16  ;;  %v2965_v23 = vld [vmem:[%s3613_s0 + $0xa4] ss:$8 sps:$4 sm:$0xff]   ;;  %v2970_v26 = vld [vmem:[%s3613_s0 + $0xb0] ss:$8 sps:$4 sm:$0xff]   ;;  %v2973_v28 = vld [vmem:[%s3613_s0 + $0xc0] ss:$8 sps:$4 sm:$0xff]  }
  0xdb   : > { %v2971_v27 = vld [vmem:[%s3613_s0 + $0xc4] ss:$8 sps:$4 sm:$0xff]   ;;  %v2974_v29 = vld [vmem:[%s3613_s0 + $0xd4] ss:$8 sps:$4 sm:$0xff]   ;;  %v2976_v30 = vld [vmem:[%s3613_s0 + $0xd0] ss:$8 sps:$4 sm:$0xff]  }
  0xdc   : > { %971 = vmatpush1.bf16.msra.mxu0 %v2943_v6  ;;  %2815 = vmatpush1.bf16.msra.mxu1 %v2943_v6  ;;  %v2977_v31 = vld [vmem:[%s3613_s0 + $0xe4] ss:$8 sps:$4 sm:$0xff]   ;;  %v2979_v32 = vld [vmem:[%s3613_s0 + $0xe0] ss:$8 sps:$4 sm:$0xff]   ;;  %v2980_v33 = vld [vmem:[%s3613_s0 + $0xf4] ss:$8 sps:$4 sm:$0xff]  }
  0xdd   : > { %972 = vmatprep.subr.bf16.mxu0 %v2944_v7  ;;  %2800 = vmatprep.subr.bf16.mxu1 %v2944_v7  ;;  %v2982_v34 = vld [vmem:[%s3613_s0 + $0xf0] ss:$8 sps:$4 sm:$0xff]   ;;  %v2983_v35 = vld [vmem:[%s3606_s19] ss:$8 sps:$4 sm:$0xff]   ;;  %v2989_v37 = vld [vmem:[%s3606_s19 + $0x14] ss:$8 sps:$4 sm:$0xff]  }
  0xde   : > { %v2986_v36 = vld [vmem:[%s3606_s19 + $0x80] ss:$8 sps:$4 sm:$0xff]   ;;  %v2991_v38 = vld [vmem:[%s3606_s19 + $0x94] ss:$8 sps:$4 sm:$0xff]   ;;  %v2993_v39 = vld [vmem:[%s3606_s19 + $0x10] ss:$8 sps:$4 sm:$0xff]  }
  0xdf   : > { %v2994_v40 = vld [vmem:[%s3606_s19 + $0x90] ss:$8 sps:$4 sm:$0xff]   ;;  %v2995_v41 = vld [vmem:[%s3606_s19 + $0x24] ss:$8 sps:$4 sm:$0xff]   ;;  %v2999_v43 = vld [vmem:[%s3606_s19 + $0x20] ss:$8 sps:$4 sm:$0xff]  }
  0xe0   : > { %973 = vmatpush1.bf16.msra.mxu0 %v2946_v8  ;;  %2816 = vmatpush1.bf16.msra.mxu1 %v2946_v8  ;;  %v2997_v42 = vld [vmem:[%s3606_s19 + $0xa4] ss:$8 sps:$4 sm:$0xff]   ;;  %v3000_v44 = vld [vmem:[%s3606_s19 + $0xa0] ss:$8 sps:$4 sm:$0xff]   ;;  %v3001_v45 = vld [vmem:[%s3606_s19 + $0x34] ss:$8 sps:$4 sm:$0xff]  }
  0xe1   : > { %974 = vmatprep.subr.bf16.mxu0 %v2947_v9  ;;  %2801 = vmatprep.subr.bf16.mxu1 %v2947_v9  ;;  %v3003_v46 = vld [vmem:[%s3606_s19 + $0xb4] ss:$8 sps:$4 sm:$0xff]   ;;  %v3005_v47 = vld [vmem:[%s3606_s19 + $0x30] ss:$8 sps:$4 sm:$0xff]   ;;  %v3007_v49 = vld [vmem:[%s3606_s19 + $0x44] ss:$8 sps:$4 sm:$0xff]  }
  0xe2   : > { %v3006_v48 = vld [vmem:[%s3606_s19 + $0xb0] ss:$8 sps:$4 sm:$0xff]   ;;  %v3009_v50 = vld [vmem:[%s3606_s19 + $0xc4] ss:$8 sps:$4 sm:$0xff]   ;;  %v3011_v51 = vld [vmem:[%s3606_s19 + $0x40] ss:$8 sps:$4 sm:$0xff]  }
  0xe3   : > { %v3012_v52 = vld [vmem:[%s3606_s19 + $0xc0] ss:$8 sps:$4 sm:$0xff]   ;;  %v3013_v53 = vld [vmem:[%s3606_s19 + $0x54] ss:$8 sps:$4 sm:$0xff]   ;;  %v3017_v55 = vld [vmem:[%s3606_s19 + $0x50] ss:$8 sps:$4 sm:$0xff]  }
  0xe4   : > { %975 = vmatpush1.bf16.msra.mxu0 %v2949_v10  ;;  %2817 = vmatpush1.bf16.msra.mxu1 %v2949_v10  ;;  %v3015_v54 = vld [vmem:[%s3606_s19 + $0xd4] ss:$8 sps:$4 sm:$0xff]   ;;  %v3018_v56 = vld [vmem:[%s3606_s19 + $0xd0] ss:$8 sps:$4 sm:$0xff]   ;;  %v3019_v57 = vld [vmem:[%s3606_s19 + $0x64] ss:$8 sps:$4 sm:$0xff]  }
  0xe5   : > { %976 = vmatprep.subr.bf16.mxu0 %v2950_v11  ;;  %2802 = vmatprep.subr.bf16.mxu1 %v2950_v11  ;;  %v3021_v58 = vld [vmem:[%s3606_s19 + $0xe4] ss:$8 sps:$4 sm:$0xff]   ;;  %v3023_v59 = vld [vmem:[%s3606_s19 + $0x60] ss:$8 sps:$4 sm:$0xff]   ;;  %v3025_v61 = vld [vmem:[%s3606_s19 + $0x74] ss:$8 sps:$4 sm:$0xff]  }
  0xe6   : > { %v3024_v60 = vld [vmem:[%s3606_s19 + $0xe0] ss:$8 sps:$4 sm:$0xff]   ;;  %v3027_v62 = vld [vmem:[%s3606_s19 + $0xf4] ss:$8 sps:$4 sm:$0xff]   ;;  %v3029_v63 = vld [vmem:[%s3606_s19 + $0x70] ss:$8 sps:$4 sm:$0xff]  }
  0xe7   : > { %v3030_v0 = vld [vmem:[%s3606_s19 + $0xf0] ss:$8 sps:$4 sm:$0xff]   ;;  %v518_v1 = vld [vmem:[#allocation2] sm:$0xff]  ;;  %v519_v3 = vld [vmem:[#allocation2 + $0x8] sm:$0xff]  ;;  %p2498_p4 = scmp.ne.s32.totalorder %s3291_s12, 1 }
  0xe8   : > { %977 = vmatpush1.bf16.msra.mxu0 %v2952_v12  ;;  %2818 = vmatpush1.bf16.msra.mxu1 %v2952_v12  ;;  %v550_v2 = vld [vmem:[#allocation2 + $0x100] sm:$0xff]  ;;  %v551_v4 = vld [vmem:[#allocation2 + $0x108] sm:$0xff]  ;;  %v520_v7 = vld [vmem:[#allocation2 + $0x10] sm:$0xff]  ;;  %s4017_s6 = sld [smem:[#allocation21_spill]] (!%p2498_p4)  ;;  %s4018_s20 = sld [smem:[#allocation22_spill]] (!%p2498_p4) }
  0xe9   : > { %978 = vmatprep.subr.bf16.mxu0 %v2953_v13  ;;  %2803 = vmatprep.subr.bf16.mxu1 %v2953_v13  ;;  %v552_v8 = vld [vmem:[#allocation2 + $0x110] sm:$0xff]  ;;  %v521_v13 = vld [vmem:[#allocation2 + $0x18] sm:$0xff] }
  0xea   : > { %v553_v14 = vld [vmem:[#allocation2 + $0x118] sm:$0xff] }
  0xec   : > { %979 = vmatpush1.bf16.msra.mxu0 %v2955_v15  ;;  %2819 = vmatpush1.bf16.msra.mxu1 %v2955_v15 }
  0xed   : > { %980 = vmatprep.subr.bf16.mxu0 %v2956_v17  ;;  %2804 = vmatprep.subr.bf16.mxu1 %v2956_v17 }
  0xf0   : > { %981 = vmatpush1.bf16.msra.mxu0 %v2958_v18  ;;  %2820 = vmatpush1.bf16.msra.mxu1 %v2958_v18 }
  0xf1   : > { %982 = vmatprep.subr.bf16.mxu0 %v2959_v19  ;;  %2805 = vmatprep.subr.bf16.mxu1 %v2959_v19 }
  0xf4   : > { %983 = vmatpush1.bf16.msra.mxu0 %v2961_v20  ;;  %2821 = vmatpush1.bf16.msra.mxu1 %v2961_v20 }
  0xf5   : > { %984 = vmatprep.subr.bf16.mxu0 %v2962_v21  ;;  %2806 = vmatprep.subr.bf16.mxu1 %v2962_v21 }
  0xf8   : > { %985 = vmatpush1.bf16.msra.mxu0 %v2964_v22  ;;  %2822 = vmatpush1.bf16.msra.mxu1 %v2964_v22 }
  0xf9   : > { %986 = vmatprep.subr.bf16.mxu0 %v2965_v23  ;;  %2807 = vmatprep.subr.bf16.mxu1 %v2965_v23 }
  0xfc   : > { %987 = vmatpush1.bf16.msra.mxu0 %v2967_v24  ;;  %2823 = vmatpush1.bf16.msra.mxu1 %v2967_v24 }
  0xfd   : > { %988 = vmatprep.subr.bf16.mxu0 %v2968_v25  ;;  %2808 = vmatprep.subr.bf16.mxu1 %v2968_v25  ;;  %v522_v25 = vld [vmem:[#allocation2 + $0x20] sm:$0xff] }
 0x100   : > { %989 = vmatpush1.bf16.msra.mxu0 %v2970_v26  ;;  %2824 = vmatpush1.bf16.msra.mxu1 %v2970_v26  ;;  %v554_v26 = vld [vmem:[#allocation2 + $0x120] sm:$0xff] }
 0x101   : > { %990 = vmatprep.subr.bf16.mxu0 %v2971_v27  ;;  %2809 = vmatprep.subr.bf16.mxu1 %v2971_v27  ;;  %v523_v27 = vld [vmem:[#allocation2 + $0x28] sm:$0xff] }
 0x104   : > { %991 = vmatpush1.bf16.msra.mxu0 %v2973_v28  ;;  %2825 = vmatpush1.bf16.msra.mxu1 %v2973_v28  ;;  %v555_v28 = vld [vmem:[#allocation2 + $0x128] sm:$0xff] }
 0x105   : > { %992 = vmatprep.subr.bf16.mxu0 %v2974_v29  ;;  %2810 = vmatprep.subr.bf16.mxu1 %v2974_v29 }
 0x108   : > { %993 = vmatpush1.bf16.msra.mxu0 %v2976_v30  ;;  %2826 = vmatpush1.bf16.msra.mxu1 %v2976_v30 }
 0x109   : > { %994 = vmatprep.subr.bf16.mxu0 %v2977_v31  ;;  %2811 = vmatprep.subr.bf16.mxu1 %v2977_v31  ;;  %v524_v31 = vld [vmem:[#allocation2 + $0x30] sm:$0xff] }
 0x10c   : > { %995 = vmatpush1.bf16.msra.mxu0 %v2979_v32  ;;  %2827 = vmatpush1.bf16.msra.mxu1 %v2979_v32  ;;  %v556_v32 = vld [vmem:[#allocation2 + $0x130] sm:$0xff] }
 0x10d   : > { %996 = vmatprep.subr.bf16.mxu0 %v2980_v33  ;;  %2812 = vmatprep.subr.bf16.mxu1 %v2980_v33 }
 0x110   : > { %997 = vmatpush1.bf16.msra.mxu0 %v2982_v34  ;;  %2828 = vmatpush1.bf16.msra.mxu1 %v2982_v34 }
 0x113   : > { %999 = vmatmul.mubr.bf16.vlgmr.msra.gmra.mrb[0].mxu0 %v2983_v35  ;;  %1079 = vmatmul.mubr.bf16.vlgmr.msra.gmra.mrb[0].mxu1 %v2986_v36 }
 0x114   : > { %1008 = vmatprep.mubr.bf16.mxu0 %v2989_v37  ;;  %1088 = vmatprep.mubr.bf16.mxu1 %v2991_v38  ;;  %v525_v37 = vld [vmem:[#allocation2 + $0x38] sm:$0xff] }
 0x115   : > { %v557_v38 = vld [vmem:[#allocation2 + $0x138] sm:$0xff] }
 0x11b   : > { %1009 = vmatmul.mubr.bf16.gmra.mrb[4].mxu0 %v2993_v39  ;;  %1089 = vmatmul.mubr.bf16.gmra.mrb[4].mxu1 %v2994_v40 }
 0x11c   : > { %1018 = vmatprep.mubr.bf16.mxu0 %v2995_v41  ;;  %1098 = vmatprep.mubr.bf16.mxu1 %v2997_v42 }
 0x123   : > { %1019 = vmatmul.mubr.bf16.gmra.mrb[8].mxu0 %v2999_v43  ;;  %1099 = vmatmul.mubr.bf16.gmra.mrb[8].mxu1 %v3000_v44 }
 0x124   : > { %1028 = vmatprep.mubr.bf16.mxu0 %v3001_v45  ;;  %1108 = vmatprep.mubr.bf16.mxu1 %v3003_v46 }
 0x12b   : > { %1029 = vmatmul.mubr.bf16.gmra.mrb[12].mxu0 %v3005_v47  ;;  %1109 = vmatmul.mubr.bf16.gmra.mrb[12].mxu1 %v3006_v48 }
 0x12c   : > { %1038 = vmatprep.mubr.bf16.mxu0 %v3007_v49  ;;  %1118 = vmatprep.mubr.bf16.mxu1 %v3009_v50  ;;  %v526_v49 = vld [vmem:[#allocation2 + $0x40] sm:$0xff] }
 0x12d   : > { %v558_v50 = vld [vmem:[#allocation2 + $0x140] sm:$0xff] }
 0x133   : > { %1039 = vmatmul.mubr.bf16.gmra.mrb[16].mxu0 %v3011_v51  ;;  %1119 = vmatmul.mubr.bf16.gmra.mrb[16].mxu1 %v3012_v52  ;;  %v527_v51 = vld [vmem:[#allocation2 + $0x48] sm:$0xff] }
 0x134   : > { %1048 = vmatprep.mubr.bf16.mxu0 %v3013_v53  ;;  %1128 = vmatprep.mubr.bf16.mxu1 %v3015_v54  ;;  %v559_v52 = vld [vmem:[#allocation2 + $0x148] sm:$0xff] }
 0x13b   : > { %1049 = vmatmul.mubr.bf16.gmra.mrb[20].mxu0 %v3017_v55  ;;  %1129 = vmatmul.mubr.bf16.gmra.mrb[20].mxu1 %v3018_v56  ;;  %v528_v55 = vld [vmem:[#allocation2 + $0x50] sm:$0xff] }
 0x13c   : > { %1058 = vmatprep.mubr.bf16.mxu0 %v3019_v57  ;;  %1138 = vmatprep.mubr.bf16.mxu1 %v3021_v58  ;;  %v560_v56 = vld [vmem:[#allocation2 + $0x150] sm:$0xff] }
 0x143   : > { %1059 = vmatmul.mubr.bf16.gmra.mrb[24].mxu0 %v3023_v59  ;;  %1139 = vmatmul.mubr.bf16.gmra.mrb[24].mxu1 %v3024_v60 }
 0x144   : > { %1068 = vmatprep.mubr.bf16.mxu0 %v3025_v61  ;;  %1148 = vmatprep.mubr.bf16.mxu1 %v3027_v62  ;;  %v529_v61 = vld [vmem:[#allocation2 + $0x58] sm:$0xff] }
 0x145   : > { %v561_v62 = vld [vmem:[#allocation2 + $0x158] sm:$0xff] }
 0x14b   : > { %1069 = vmatmul.mubr.bf16.gmra.mrb[28].mxu0 %v3029_v63  ;;  %1149 = vmatmul.mubr.bf16.gmra.mrb[28].mxu1 %v3030_v0 }
 0x1e6   : > { %v1000_v5 = vpop.f32.mrb[0].mxu0  ;;  %v1080_v6 = vpop.f32.mrb[0].mxu1 }
 0x1e7   : > { %v1159_v9 = vadd.f32 %v1000_v5, %v518_v1  ;;  %v1191_v10 = vadd.f32 %v1080_v6, %v550_v2  ;;  %v1002_v11 = vpop.f32.mrb[1].mxu0  ;;  %v1082_v12 = vpop.f32.mrb[1].mxu1 }
 0x1e8   : > { %v1160_v15 = vadd.f32 %v1002_v11, %v519_v3  ;;  %v1192_v16 = vadd.f32 %v1082_v12, %v551_v4  ;;  %v1004_v17 = vpop.f32.mrb[2].mxu0  ;;  %v1084_v18 = vpop.f32.mrb[2].mxu1  ;;  %v531_v11 = vld [vmem:[#allocation2 + $0x68] sm:$0xff] }
 0x1e9   : > { %1223 = vst [vmem:[#allocation2] sm:$0xff] %v1159_v9  ;;  %1255 = vst [vmem:[#allocation2 + $0x100] sm:$0xff] %v1191_v10  ;;  %v1161_v19 = vadd.f32 %v1004_v17, %v520_v7  ;;  %v1193_v20 = vadd.f32 %v1084_v18, %v552_v8  ;;  %v1006_v21 = vpop.f32.mrb[3].mxu0  ;;  %v1086_v22 = vpop.f32.mrb[3].mxu1  ;;  %v530_v9 = vld [vmem:[#allocation2 + $0x60] sm:$0xff]  ;;  %v563_v12 = vld [vmem:[#allocation2 + $0x168] sm:$0xff] }
 0x1ea   : > { %1224 = vst [vmem:[#allocation2 + $0x8] sm:$0xff] %v1160_v15  ;;  %1256 = vst [vmem:[#allocation2 + $0x108] sm:$0xff] %v1192_v16  ;;  %v1162_v23 = vadd.f32 %v1006_v21, %v521_v13  ;;  %v1194_v24 = vadd.f32 %v1086_v22, %v553_v14  ;;  %v562_v10 = vld [vmem:[#allocation2 + $0x160] sm:$0xff]  ;;  %v532_v15 = vld [vmem:[#allocation2 + $0x70] sm:$0xff] }
 0x1eb   : > { %1225 = vst [vmem:[#allocation2 + $0x10] sm:$0xff] %v1161_v19  ;;  %1257 = vst [vmem:[#allocation2 + $0x110] sm:$0xff] %v1193_v20  ;;  %v564_v16 = vld [vmem:[#allocation2 + $0x170] sm:$0xff]  ;;  %v533_v21 = vld [vmem:[#allocation2 + $0x78] sm:$0xff] }
 0x1ec   : > { %1226 = vst [vmem:[#allocation2 + $0x18] sm:$0xff] %v1162_v23  ;;  %1258 = vst [vmem:[#allocation2 + $0x118] sm:$0xff] %v1194_v24  ;;  %v565_v22 = vld [vmem:[#allocation2 + $0x178] sm:$0xff] }
 0x1ee   : > { %v1010_v29 = vpop.f32.mrb[4].mxu0  ;;  %v1090_v30 = vpop.f32.mrb[4].mxu1 }
 0x1ef   : > { %v1163_v33 = vadd.f32 %v1010_v29, %v522_v25  ;;  %v1195_v34 = vadd.f32 %v1090_v30, %v554_v26  ;;  %v1012_v35 = vpop.f32.mrb[5].mxu0  ;;  %v1092_v36 = vpop.f32.mrb[5].mxu1 }
 0x1f0   : > { %v1164_v39 = vadd.f32 %v1012_v35, %v523_v27  ;;  %v1196_v40 = vadd.f32 %v1092_v36, %v555_v28  ;;  %v1014_v41 = vpop.f32.mrb[6].mxu0  ;;  %v1094_v42 = vpop.f32.mrb[6].mxu1  ;;  %v535_v35 = vld [vmem:[#allocation2 + $0x88] sm:$0xff] }
 0x1f1   : > { %1227 = vst [vmem:[#allocation2 + $0x20] sm:$0xff] %v1163_v33  ;;  %1259 = vst [vmem:[#allocation2 + $0x120] sm:$0xff] %v1195_v34  ;;  %v1165_v43 = vadd.f32 %v1014_v41, %v524_v31  ;;  %v1197_v44 = vadd.f32 %v1094_v42, %v556_v32  ;;  %v1016_v45 = vpop.f32.mrb[7].mxu0  ;;  %v1096_v46 = vpop.f32.mrb[7].mxu1  ;;  %v534_v33 = vld [vmem:[#allocation2 + $0x80] sm:$0xff]  ;;  %v567_v36 = vld [vmem:[#allocation2 + $0x188] sm:$0xff] }
 0x1f2   : > { %1228 = vst [vmem:[#allocation2 + $0x28] sm:$0xff] %v1164_v39  ;;  %1260 = vst [vmem:[#allocation2 + $0x128] sm:$0xff] %v1196_v40  ;;  %v1166_v47 = vadd.f32 %v1016_v45, %v525_v37  ;;  %v1198_v48 = vadd.f32 %v1096_v46, %v557_v38  ;;  %v566_v34 = vld [vmem:[#allocation2 + $0x180] sm:$0xff]  ;;  %v536_v39 = vld [vmem:[#allocation2 + $0x90] sm:$0xff] }
 0x1f3   : > { %1229 = vst [vmem:[#allocation2 + $0x30] sm:$0xff] %v1165_v43  ;;  %1261 = vst [vmem:[#allocation2 + $0x130] sm:$0xff] %v1197_v44  ;;  %v568_v40 = vld [vmem:[#allocation2 + $0x190] sm:$0xff]  ;;  %v537_v45 = vld [vmem:[#allocation2 + $0x98] sm:$0xff] }
 0x1f4   : > { %1230 = vst [vmem:[#allocation2 + $0x38] sm:$0xff] %v1166_v47  ;;  %1262 = vst [vmem:[#allocation2 + $0x138] sm:$0xff] %v1198_v48  ;;  %v569_v46 = vld [vmem:[#allocation2 + $0x198] sm:$0xff] }
 0x1f6   : > { %v1020_v53 = vpop.f32.mrb[8].mxu0  ;;  %v1100_v54 = vpop.f32.mrb[8].mxu1 }
 0x1f7   : > { %v1167_v57 = vadd.f32 %v1020_v53, %v526_v49  ;;  %v1199_v58 = vadd.f32 %v1100_v54, %v558_v50  ;;  %v1022_v59 = vpop.f32.mrb[9].mxu0  ;;  %v1102_v60 = vpop.f32.mrb[9].mxu1 }
 0x1f8   : > { %v1168_v63 = vadd.f32 %v1022_v59, %v527_v51  ;;  %v1200_v0 = vadd.f32 %v1102_v60, %v559_v52  ;;  %v1024_v1 = vpop.f32.mrb[10].mxu0  ;;  %v1104_v2 = vpop.f32.mrb[10].mxu1  ;;  %v539_v59 = vld [vmem:[#allocation2 + $0xa8] sm:$0xff] }
 0x1f9   : > { %1231 = vst [vmem:[#allocation2 + $0x40] sm:$0xff] %v1167_v57  ;;  %1263 = vst [vmem:[#allocation2 + $0x140] sm:$0xff] %v1199_v58  ;;  %v1169_v3 = vadd.f32 %v1024_v1, %v528_v55  ;;  %v1201_v4 = vadd.f32 %v1104_v2, %v560_v56  ;;  %v1026_v5 = vpop.f32.mrb[11].mxu0  ;;  %v1106_v6 = vpop.f32.mrb[11].mxu1  ;;  %v538_v57 = vld [vmem:[#allocation2 + $0xa0] sm:$0xff]  ;;  %v571_v60 = vld [vmem:[#allocation2 + $0x1a8] sm:$0xff] }
 0x1fa   : > { %1232 = vst [vmem:[#allocation2 + $0x48] sm:$0xff] %v1168_v63  ;;  %1264 = vst [vmem:[#allocation2 + $0x148] sm:$0xff] %v1200_v0  ;;  %v1170_v7 = vadd.f32 %v1026_v5, %v529_v61  ;;  %v1202_v8 = vadd.f32 %v1106_v6, %v561_v62  ;;  %v570_v58 = vld [vmem:[#allocation2 + $0x1a0] sm:$0xff]  ;;  %v540_v63 = vld [vmem:[#allocation2 + $0xb0] sm:$0xff] }
 0x1fb   : > { %1233 = vst [vmem:[#allocation2 + $0x50] sm:$0xff] %v1169_v3  ;;  %1265 = vst [vmem:[#allocation2 + $0x150] sm:$0xff] %v1201_v4  ;;  %v572_v0 = vld [vmem:[#allocation2 + $0x1b0] sm:$0xff]  ;;  %v541_v5 = vld [vmem:[#allocation2 + $0xb8] sm:$0xff] }
 0x1fc   : > { %1234 = vst [vmem:[#allocation2 + $0x58] sm:$0xff] %v1170_v7  ;;  %1266 = vst [vmem:[#allocation2 + $0x158] sm:$0xff] %v1202_v8  ;;  %v573_v6 = vld [vmem:[#allocation2 + $0x1b8] sm:$0xff] }
 0x1fe   : > { %v1030_v13 = vpop.f32.mrb[12].mxu0  ;;  %v1110_v14 = vpop.f32.mrb[12].mxu1 }
 0x1ff   : > { %v1171_v17 = vadd.f32 %v1030_v13, %v530_v9  ;;  %v1203_v18 = vadd.f32 %v1110_v14, %v562_v10  ;;  %v1032_v19 = vpop.f32.mrb[13].mxu0  ;;  %v1112_v20 = vpop.f32.mrb[13].mxu1 }
 0x200   : > { %v1172_v23 = vadd.f32 %v1032_v19, %v531_v11  ;;  %v1204_v24 = vadd.f32 %v1112_v20, %v563_v12  ;;  %v1034_v25 = vpop.f32.mrb[14].mxu0  ;;  %v1114_v26 = vpop.f32.mrb[14].mxu1  ;;  %v543_v19 = vld [vmem:[#allocation2 + $0xc8] sm:$0xff] }
 0x201   : > { %1235 = vst [vmem:[#allocation2 + $0x60] sm:$0xff] %v1171_v17  ;;  %1267 = vst [vmem:[#allocation2 + $0x160] sm:$0xff] %v1203_v18  ;;  %v1173_v27 = vadd.f32 %v1034_v25, %v532_v15  ;;  %v1205_v28 = vadd.f32 %v1114_v26, %v564_v16  ;;  %v1036_v29 = vpop.f32.mrb[15].mxu0  ;;  %v1116_v30 = vpop.f32.mrb[15].mxu1  ;;  %v542_v17 = vld [vmem:[#allocation2 + $0xc0] sm:$0xff]  ;;  %v575_v20 = vld [vmem:[#allocation2 + $0x1c8] sm:$0xff] }
 0x202   : > { %1236 = vst [vmem:[#allocation2 + $0x68] sm:$0xff] %v1172_v23  ;;  %1268 = vst [vmem:[#allocation2 + $0x168] sm:$0xff] %v1204_v24  ;;  %v1174_v31 = vadd.f32 %v1036_v29, %v533_v21  ;;  %v1206_v32 = vadd.f32 %v1116_v30, %v565_v22  ;;  %v574_v18 = vld [vmem:[#allocation2 + $0x1c0] sm:$0xff]  ;;  %v544_v23 = vld [vmem:[#allocation2 + $0xd0] sm:$0xff] }
 0x203   : > { %1237 = vst [vmem:[#allocation2 + $0x70] sm:$0xff] %v1173_v27  ;;  %1269 = vst [vmem:[#allocation2 + $0x170] sm:$0xff] %v1205_v28  ;;  %v576_v24 = vld [vmem:[#allocation2 + $0x1d0] sm:$0xff]  ;;  %v545_v29 = vld [vmem:[#allocation2 + $0xd8] sm:$0xff] }
 0x204   : > { %1238 = vst [vmem:[#allocation2 + $0x78] sm:$0xff] %v1174_v31  ;;  %1270 = vst [vmem:[#allocation2 + $0x178] sm:$0xff] %v1206_v32  ;;  %v577_v30 = vld [vmem:[#allocation2 + $0x1d8] sm:$0xff] }
 0x206   : > { %v1040_v37 = vpop.f32.mrb[16].mxu0  ;;  %v1120_v38 = vpop.f32.mrb[16].mxu1 }
 0x207   : > { %v1175_v41 = vadd.f32 %v1040_v37, %v534_v33  ;;  %v1207_v42 = vadd.f32 %v1120_v38, %v566_v34  ;;  %v1042_v43 = vpop.f32.mrb[17].mxu0  ;;  %v1122_v44 = vpop.f32.mrb[17].mxu1 }
 0x208   : > { %v1176_v47 = vadd.f32 %v1042_v43, %v535_v35  ;;  %v1208_v48 = vadd.f32 %v1122_v44, %v567_v36  ;;  %v1044_v49 = vpop.f32.mrb[18].mxu0  ;;  %v1124_v50 = vpop.f32.mrb[18].mxu1  ;;  %v547_v43 = vld [vmem:[#allocation2 + $0xe8] sm:$0xff] }
 0x209   : > { %1239 = vst [vmem:[#allocation2 + $0x80] sm:$0xff] %v1175_v41  ;;  %1271 = vst [vmem:[#allocation2 + $0x180] sm:$0xff] %v1207_v42  ;;  %v1177_v51 = vadd.f32 %v1044_v49, %v536_v39  ;;  %v1209_v52 = vadd.f32 %v1124_v50, %v568_v40  ;;  %v1046_v53 = vpop.f32.mrb[19].mxu0  ;;  %v1126_v54 = vpop.f32.mrb[19].mxu1  ;;  %v546_v41 = vld [vmem:[#allocation2 + $0xe0] sm:$0xff]  ;;  %v579_v44 = vld [vmem:[#allocation2 + $0x1e8] sm:$0xff] }
 0x20a   : > { %1240 = vst [vmem:[#allocation2 + $0x88] sm:$0xff] %v1176_v47  ;;  %1272 = vst [vmem:[#allocation2 + $0x188] sm:$0xff] %v1208_v48  ;;  %v1178_v55 = vadd.f32 %v1046_v53, %v537_v45  ;;  %v1210_v56 = vadd.f32 %v1126_v54, %v569_v46  ;;  %v578_v42 = vld [vmem:[#allocation2 + $0x1e0] sm:$0xff]  ;;  %v548_v47 = vld [vmem:[#allocation2 + $0xf0] sm:$0xff] }
 0x20b   : > { %1241 = vst [vmem:[#allocation2 + $0x90] sm:$0xff] %v1177_v51  ;;  %1273 = vst [vmem:[#allocation2 + $0x190] sm:$0xff] %v1209_v52  ;;  %v580_v48 = vld [vmem:[#allocation2 + $0x1f0] sm:$0xff]  ;;  %v549_v53 = vld [vmem:[#allocation2 + $0xf8] sm:$0xff] }
 0x20c   : > { %1242 = vst [vmem:[#allocation2 + $0x98] sm:$0xff] %v1178_v55  ;;  %1274 = vst [vmem:[#allocation2 + $0x198] sm:$0xff] %v1210_v56  ;;  %v581_v54 = vld [vmem:[#allocation2 + $0x1f8] sm:$0xff] }
 0x20e   : > { %v1050_v61 = vpop.f32.mrb[20].mxu0  ;;  %v1130_v62 = vpop.f32.mrb[20].mxu1 }
 0x20f   : > { %v1179_v1 = vadd.f32 %v1050_v61, %v538_v57  ;;  %v1211_v2 = vadd.f32 %v1130_v62, %v570_v58  ;;  %v1052_v3 = vpop.f32.mrb[21].mxu0  ;;  %v1132_v4 = vpop.f32.mrb[21].mxu1 }
 0x210   : > { %v1180_v7 = vadd.f32 %v1052_v3, %v539_v59  ;;  %v1212_v8 = vadd.f32 %v1132_v4, %v571_v60  ;;  %v1054_v9 = vpop.f32.mrb[22].mxu0  ;;  %v1134_v10 = vpop.f32.mrb[22].mxu1  ;;  %v3033_v3 = vld [vmem:[#allocation8 + $0x48] sm:$0xff] (!%p2498_p4)  }
 0x211   : > { %1243 = vst [vmem:[#allocation2 + $0xa0] sm:$0xff] %v1179_v1  ;;  %1275 = vst [vmem:[#allocation2 + $0x1a0] sm:$0xff] %v1211_v2  ;;  %v1181_v11 = vadd.f32 %v1054_v9, %v540_v63  ;;  %v1213_v12 = vadd.f32 %v1134_v10, %v572_v0  ;;  %v1056_v13 = vpop.f32.mrb[23].mxu0  ;;  %v1136_v14 = vpop.f32.mrb[23].mxu1  ;;  %v3031_v1 = vld [vmem:[#allocation8 + $0x40] sm:$0xff] (!%p2498_p4)   ;;  %v3034_v4 = vld [vmem:[#allocation8 + $0x8] sm:$0xff] (!%p2498_p4)  }
 0x212   : > { %1244 = vst [vmem:[#allocation2 + $0xa8] sm:$0xff] %v1180_v7  ;;  %1276 = vst [vmem:[#allocation2 + $0x1a8] sm:$0xff] %v1212_v8  ;;  %v1182_v15 = vadd.f32 %v1056_v13, %v541_v5  ;;  %v1214_v16 = vadd.f32 %v1136_v14, %v573_v6  ;;  %v3032_v2 = vld [vmem:[#allocation8] sm:$0xff] (!%p2498_p4)   ;;  %2541 = vmatprep.subr.bf16.mxu0 (!%p2498_p4), %v3031_v1  ;;  %v3035_v5 = vld [vmem:[#allocation8 + $0x50] sm:$0xff] (!%p2498_p4)   ;;  %v1357_v6 = vlaneseq (!%p2498_p4) }
 0x213   : > { %1245 = vst [vmem:[#allocation2 + $0xb0] sm:$0xff] %v1181_v11  ;;  %1277 = vst [vmem:[#allocation2 + $0x1b0] sm:$0xff] %v1213_v12  ;;  %2542 = vmatpush3.bf16.msra.mxu0 (!%p2498_p4), %v3032_v2  ;;  %v3036_v7 = vld [vmem:[#allocation8 + $0x10] sm:$0xff] (!%p2498_p4)   ;;  %v3037_v8 = vld [vmem:[#allocation8 + $0x58] sm:$0xff] (!%p2498_p4)  }
 0x214   : > { %1246 = vst [vmem:[#allocation2 + $0xb8] sm:$0xff] %v1182_v15  ;;  %1278 = vst [vmem:[#allocation2 + $0x1b8] sm:$0xff] %v1214_v16  ;;  %2543 = vmatprep.subr.bf16.mxu0 (!%p2498_p4), %v3033_v3  ;;  %v1358_v9 = vshrl.u32 (!%p2498_p4), %v1357_v6, 7  ;;  %v3038_v10 = vld [vmem:[#allocation8 + $0x18] sm:$0xff] (!%p2498_p4)   ;;  %v3039_v11 = vld [vmem:[#allocation8 + $0x60] sm:$0xff] (!%p2498_p4)  }
 0x215   : > { %v3040_v13 = vld [vmem:[#allocation8 + $0x20] sm:$0xff] (!%p2498_p4)   ;;  %v3041_v14 = vld [vmem:[#allocation8 + $0x68] sm:$0xff] (!%p2498_p4)   ;;  %v1294_v16 = vld [vmem:[#allocation2 + $0x18] sm:$0xff] (!%p2498_p4) }
 0x216   : > { %v1060_v21 = vpop.f32.mrb[24].mxu0  ;;  %v1140_v22 = vpop.f32.mrb[24].mxu1  ;;  %v1363_v12 = vsub.s32 (!%p2498_p4), 1, %v1358_v9  ;;  %v1292_v15 = vld [vmem:[#allocation2 + $0x8] sm:$0xff] (!%p2498_p4)  ;;  %v1310_v1 = vld [vmem:[#allocation2 + $0x98] sm:$0xff] (!%p2498_p4) }
 0x217   : > { %v1183_v25 = vadd.f32 %v1060_v21, %v542_v17  ;;  %v1215_v26 = vadd.f32 %v1140_v22, %v574_v18  ;;  %v1062_v27 = vpop.f32.mrb[25].mxu0  ;;  %v1142_v28 = vpop.f32.mrb[25].mxu1  ;;  %2544 = vmatpush3.bf16.msra.mxu0 (!%p2498_p4), %v3034_v4  ;;  %v1355_v17 = vld [vmem:[%s3982_s2] sm:$0x3] (!%p2498_p4) }
 0x218   : > { %v1184_v31 = vadd.f32 %v1062_v27, %v543_v19  ;;  %v1216_v32 = vadd.f32 %v1142_v28, %v575_v20  ;;  %v1064_v33 = vpop.f32.mrb[26].mxu0  ;;  %v1144_v34 = vpop.f32.mrb[26].mxu1  ;;  %2545 = vmatprep.subr.bf16.mxu0 (!%p2498_p4), %v3035_v5  ;;  %v3760_v18 = vrot.slane (!%p2498_p4), %v1355_v17, %v1363_v12  ;;  %v1359_v19 = vsub.s32 (!%p2498_p4), 0, %v1358_v9  ;;  %v3042_v20 = vld [vmem:[#allocation8 + $0x28] sm:$0xff] (!%p2498_p4)   ;;  %v1291_v27 = vld [vmem:[#allocation2] sm:$0xff] (!%p2498_p4)  ;;  %v1293_v28 = vld [vmem:[#allocation2 + $0x10] sm:$0xff] (!%p2498_p4) }
 0x219   : > { %1247 = vst [vmem:[#allocation2 + $0xc0] sm:$0xff] %v1183_v25  ;;  %1279 = vst [vmem:[#allocation2 + $0x1c0] sm:$0xff] %v1215_v26  ;;  %v1185_v35 = vadd.f32 %v1064_v33, %v544_v23  ;;  %v1217_v36 = vadd.f32 %v1144_v34, %v576_v24  ;;  %v1066_v37 = vpop.f32.mrb[27].mxu0  ;;  %v1146_v38 = vpop.f32.mrb[27].mxu1  ;;  %v3043_v23 = vld [vmem:[#allocation8 + $0x70] sm:$0xff] (!%p2498_p4)   ;;  %v3046_v34 = vld [vmem:[#allocation8 + $0x38] sm:$0xff] (!%p2498_p4)  }
 0x21a   : > { %1248 = vst [vmem:[#allocation2 + $0xc8] sm:$0xff] %v1184_v31  ;;  %1280 = vst [vmem:[#allocation2 + $0x1c8] sm:$0xff] %v1216_v32  ;;  %v1186_v39 = vadd.f32 %v1066_v37, %v545_v29  ;;  %v1218_v40 = vadd.f32 %v1146_v38, %v577_v30  ;;  %v1368_v21 = vadd.f32 (!%p2498_p4), %v3760_v18, %v1292_v15  ;;  %v3044_v26 = vld [vmem:[#allocation8 + $0x30] sm:$0xff] (!%p2498_p4)   ;;  %v3045_v29 = vld [vmem:[#allocation8 + $0x78] sm:$0xff] (!%p2498_p4)  }
 0x21b   : > { %1249 = vst [vmem:[#allocation2 + $0xd0] sm:$0xff] %v1185_v35  ;;  %1281 = vst [vmem:[#allocation2 + $0x1d0] sm:$0xff] %v1217_v36  ;;  %2546 = vmatpush3.bf16.msra.mxu0 (!%p2498_p4), %v3036_v7  ;;  %v1370_v22 = vadd.f32 (!%p2498_p4), %v3760_v18, %v1294_v16  ;;  %v3764_v25 = vrot.slane (!%p2498_p4), %v1355_v17, %v1359_v19  ;;  %v1296_v30 = vld [vmem:[#allocation2 + $0x28] sm:$0xff] (!%p2498_p4)  ;;  %v1298_v31 = vld [vmem:[#allocation2 + $0x38] sm:$0xff] (!%p2498_p4)  ;;  %v1386_v6 = vadd.f32 (!%p2498_p4), %v3760_v18, %v1310_v1 }
 0x21c   : > { %1250 = vst [vmem:[#allocation2 + $0xd8] sm:$0xff] %v1186_v39  ;;  %1282 = vst [vmem:[#allocation2 + $0x1d8] sm:$0xff] %v1218_v40  ;;  %2547 = vmatprep.subr.bf16.mxu0 (!%p2498_p4), %v3037_v8  ;;  %v1372_v35 = vadd.f32 (!%p2498_p4), %v3760_v18, %v1296_v30  ;;  %v1374_v36 = vadd.f32 (!%p2498_p4), %v3760_v18, %v1298_v31  ;;  %v1295_v39 = vld [vmem:[#allocation2 + $0x20] sm:$0xff] (!%p2498_p4)  ;;  %v1297_v40 = vld [vmem:[#allocation2 + $0x30] sm:$0xff] (!%p2498_p4) }
 0x21d   : > { %v1432_v24 = vpack.c.bf16 (!%p2498_p4), %v1370_v22, %v1368_v21  ;;  %v1367_v32 = vadd.f32 (!%p2498_p4), %v3764_v25, %v1291_v27  ;;  %v1369_v33 = vadd.f32 (!%p2498_p4), %v3764_v25, %v1293_v28  ;;  %v1307_v9 = vld [vmem:[#allocation2 + $0x80] sm:$0xff] (!%p2498_p4)  ;;  %v1314_v12 = vld [vmem:[#allocation2 + $0xb8] sm:$0xff] (!%p2498_p4)  ;;  %v1313_v21 = vld [vmem:[#allocation2 + $0xb0] sm:$0xff] (!%p2498_p4) }
 0x21e   : > { %v1070_v45 = vpop.f32.mrb[28].mxu0  ;;  %v1150_v46 = vpop.f32.mrb[28].mxu1  ;;  %1290 = sbr.rel (%p2498_p4) target bundleno = 1341 (0x53d), region = 84  ;;  %v1434_v38 = vpack.c.bf16 (!%p2498_p4), %v1374_v36, %v1372_v35  ;;  %v1390_v16 = vadd.f32 (!%p2498_p4), %v3760_v18, %v1314_v12 }
 0x21f   : > { %v1187_v49 = vadd.f32 %v1070_v45, %v546_v41  ;;  %v1219_v50 = vadd.f32 %v1150_v46, %v578_v42  ;;  %v1072_v51 = vpop.f32.mrb[29].mxu0  ;;  %v1152_v52 = vpop.f32.mrb[29].mxu1  ;;  %2548 = vmatpush3.bf16.msra.mxu0 (!%p2498_p4), %v3038_v10  ;;  %1630 = vmatprep.mubr.bf16.mxu0 (!%p2498_p4), %v1432_v24  ;;  %v1431_v37 = vpack.c.bf16 (!%p2498_p4), %v1369_v33, %v1367_v32  ;;  %v1300_v41 = vld [vmem:[#allocation2 + $0x48] sm:$0xff] (!%p2498_p4)  ;;  %v1302_v42 = vld [vmem:[#allocation2 + $0x58] sm:$0xff] (!%p2498_p4)  ;;  %v1309_v10 = vld [vmem:[#allocation2 + $0x90] sm:$0xff] (!%p2498_p4) }
 0x220   : > { %v1188_v55 = vadd.f32 %v1072_v51, %v547_v43  ;;  %v1220_v56 = vadd.f32 %v1152_v52, %v579_v44  ;;  %v1074_v57 = vpop.f32.mrb[30].mxu0  ;;  %v1154_v58 = vpop.f32.mrb[30].mxu1  ;;  %2549 = vmatprep.subr.bf16.mxu0 (!%p2498_p4), %v3039_v11  ;;  %v1371_v43 = vadd.f32 (!%p2498_p4), %v3764_v25, %v1295_v39  ;;  %v1373_v44 = vadd.f32 (!%p2498_p4), %v3764_v25, %v1297_v40  ;;  %v3047_v51 = vld [vmem:[#allocation9] sm:$0xff] (!%p2498_p4)   ;;  %v1312_v11 = vld [vmem:[#allocation2 + $0xa8] sm:$0xff] (!%p2498_p4) }
 0x221   : > { %1251 = vst [vmem:[#allocation2 + $0xe0] sm:$0xff] %v1187_v49  ;;  %1283 = vst [vmem:[#allocation2 + $0x1e0] sm:$0xff] %v1219_v50  ;;  %v1189_v59 = vadd.f32 %v1074_v57, %v548_v47  ;;  %v1221_v60 = vadd.f32 %v1154_v58, %v580_v48  ;;  %v1076_v61 = vpop.f32.mrb[31].mxu0  ;;  %v1156_v62 = vpop.f32.mrb[31].mxu1  ;;  %v1376_v45 = vadd.f32 (!%p2498_p4), %v3760_v18, %v1300_v41  ;;  %v1299_v47 = vld [vmem:[#allocation2 + $0x40] sm:$0xff] (!%p2498_p4)  ;;  %v1301_v48 = vld [vmem:[#allocation2 + $0x50] sm:$0xff] (!%p2498_p4)  ;;  %2701 = vmatprep.subr.bf16.mxu1 (!%p2498_p4), %v3047_v51 }
 0x222   : > { %1252 = vst [vmem:[#allocation2 + $0xe8] sm:$0xff] %v1188_v55  ;;  %1284 = vst [vmem:[#allocation2 + $0x1e8] sm:$0xff] %v1220_v56  ;;  %v1190_v63 = vadd.f32 %v1076_v61, %v549_v53  ;;  %v1222_v0 = vadd.f32 %v1156_v62, %v581_v54  ;;  %v1378_v46 = vadd.f32 (!%p2498_p4), %v3760_v18, %v1302_v42  ;;  %v1304_v50 = vld [vmem:[#allocation2 + $0x68] sm:$0xff] (!%p2498_p4)  ;;  %v1306_v54 = vld [vmem:[#allocation2 + $0x78] sm:$0xff] (!%p2498_p4)  ;;  %2702 = vmatpush3.bf16.msra.mxu1 (!%p2498_p4), %v3047_v51 }
 0x223   : > { %1253 = vst [vmem:[#allocation2 + $0xf0] sm:$0xff] %v1189_v59  ;;  %1285 = vst [vmem:[#allocation2 + $0x1f0] sm:$0xff] %v1221_v60  ;;  %2550 = vmatpush3.bf16.msra.mxu0 (!%p2498_p4), %v3040_v13  ;;  %v1433_v49 = vpack.c.bf16 (!%p2498_p4), %v1373_v44, %v1371_v43  ;;  %v3048_v53 = vld [vmem:[#allocation9 + $0x8] sm:$0xff] (!%p2498_p4)   ;;  %v3049_v55 = vld [vmem:[#allocation9 + $0x10] sm:$0xff] (!%p2498_p4)   ;;  %v1375_v56 = vadd.f32 (!%p2498_p4), %v3764_v25, %v1299_v47  ;;  %v1377_v57 = vadd.f32 (!%p2498_p4), %v3764_v25, %v1301_v48 }
 0x224   : > { %1254 = vst [vmem:[#allocation2 + $0xf8] sm:$0xff] %v1190_v63  ;;  %1286 = vst [vmem:[#allocation2 + $0x1f8] sm:$0xff] %v1222_v0  ;;  %2551 = vmatprep.subr.bf16.mxu0 (!%p2498_p4), %v3041_v14  ;;  %v1436_v52 = vpack.c.bf16 (!%p2498_p4), %v1378_v46, %v1376_v45  ;;  %2703 = vmatprep.subr.bf16.mxu1 (!%p2498_p4), %v3048_v53  ;;  %v1380_v58 = vadd.f32 (!%p2498_p4), %v3760_v18, %v1304_v50  ;;  %v3050_v60 = vld [vmem:[#allocation9 + $0x18] sm:$0xff] (!%p2498_p4)   ;;  %v1303_v61 = vld [vmem:[#allocation2 + $0x60] sm:$0xff] (!%p2498_p4) }
 0x225   : > { %v1382_v59 = vadd.f32 %v3760_v18, %v1306_v54  ;;  %v1305_v62 = vld [vmem:[#allocation2 + $0x70] sm:$0xff]  ;;  %v1435_v63 = vpack.c.bf16 %v1377_v57, %v1375_v56  ;;  %v1308_v0 = vld [vmem:[#allocation2 + $0x88] sm:$0xff]  ;;  %v1379_v3 = vadd.f32 %v3764_v25, %v1303_v61  ;;  %v1383_v13 = vadd.f32 %v3764_v25, %v1307_v9  ;;  %v1315_v31 = vld [vmem:[#allocation2 + $0xc0] sm:$0xff] }
 0x226   : > { %2704 = vmatpush3.bf16.msra.mxu1 %v3048_v53  ;;  %v1381_v4 = vadd.f32 %v3764_v25, %v1305_v62  ;;  %v1384_v5 = vadd.f32 %v3760_v18, %v1308_v0  ;;  %v1385_v14 = vadd.f32 %v3764_v25, %v1309_v10  ;;  %v1388_v15 = vadd.f32 %v3760_v18, %v1312_v11  ;;  %v1316_v22 = vld [vmem:[#allocation2 + $0xc8] sm:$0xff]  ;;  %v1317_v32 = vld [vmem:[#allocation2 + $0xd0] sm:$0xff]  ;;  %v1326_v44 = vld [vmem:[#allocation2 + $0x118] sm:$0xff] }
 0x227   : > { %2552 = vmatpush3.bf16.msra.mxu0 %v3042_v20  ;;  %2705 = vmatprep.subr.bf16.mxu1 %v3049_v55  ;;  %v1438_v2 = vpack.c.bf16 %v1382_v59, %v1380_v58  ;;  %v1311_v20 = vld [vmem:[#allocation2 + $0xa0] sm:$0xff]  ;;  %v1392_v27 = vadd.f32 %v3760_v18, %v1316_v22  ;;  %v1391_v35 = vadd.f32 %v3764_v25, %v1315_v31  ;;  %v1324_v43 = vld [vmem:[#allocation2 + $0x108] sm:$0xff]  ;;  %v1330_v54 = vld [vmem:[#allocation2 + $0x138] sm:$0xff] }
 0x228   : > { %2553 = vmatprep.subr.bf16.mxu0 %v3043_v23  ;;  %v1437_v7 = vpack.c.bf16 %v1381_v4, %v1379_v3  ;;  %v1440_v8 = vpack.c.bf16 %v1386_v6, %v1384_v5  ;;  %v1439_v17 = vpack.c.bf16 %v1385_v14, %v1383_v13  ;;  %v1442_v19 = vpack.c.bf16 %v1390_v16, %v1388_v15  ;;  %v1318_v23 = vld [vmem:[#allocation2 + $0xd8] sm:$0xff]  ;;  %v1319_v41 = vld [vmem:[#allocation2 + $0xe0] sm:$0xff]  ;;  %v1328_v53 = vld [vmem:[#allocation2 + $0x128] sm:$0xff] }
 0x229   : > { %v1387_v24 = vadd.f32 %v3764_v25, %v1311_v20  ;;  %v1394_v28 = vadd.f32 %v3760_v18, %v1318_v23  ;;  %v1320_v33 = vld [vmem:[#allocation2 + $0xe8] sm:$0xff]  ;;  %v1393_v36 = vadd.f32 %v3764_v25, %v1317_v32  ;;  %v1395_v45 = vadd.f32 %v3764_v25, %v1319_v41  ;;  %v1323_v51 = vld [vmem:[#allocation2 + $0x100] sm:$0xff]  ;;  %v1329_v62 = vld [vmem:[#allocation2 + $0x130] sm:$0xff] }
 0x22a   : > { %2706 = vmatpush3.bf16.msra.mxu1 %v3049_v55  ;;  %v1321_v42 = vld [vmem:[#allocation2 + $0xf0] sm:$0xff]  ;;  %v1400_v47 = vadd.f32 %v3760_v18, %v1324_v43  ;;  %v1402_v48 = vadd.f32 %v3760_v18, %v1326_v44  ;;  %v1399_v55 = vadd.f32 %v3764_v25, %v1323_v51  ;;  %v1404_v57 = vadd.f32 %v3760_v18, %v1328_v53  ;;  %v1327_v61 = vld [vmem:[#allocation2 + $0x120] sm:$0xff]  ;;  %v1334_v0 = vld [vmem:[#allocation2 + $0x158] sm:$0xff] }
 0x22b   : > { %2554 = vmatpush3.bf16.msra.mxu0 %v3044_v26  ;;  %2707 = vmatprep.subr.bf16.mxu1 %v3050_v60  ;;  %v1389_v26 = vadd.f32 %v3764_v25, %v1313_v21  ;;  %v1444_v30 = vpack.c.bf16 %v1394_v28, %v1392_v27  ;;  %v1443_v39 = vpack.c.bf16 %v1393_v36, %v1391_v35  ;;  %v1336_v9 = vld [vmem:[#allocation2 + $0x168] sm:$0xff]  ;;  %v1338_v10 = vld [vmem:[#allocation2 + $0x178] sm:$0xff]  ;;  %v3051_v27 = vld [vmem:[#allocation9 + $0x20] sm:$0xff]  }
 0x22c   : > { %2555 = vmatprep.subr.bf16.mxu0 %v3045_v29  ;;  %v1397_v46 = vadd.f32 %v3764_v25, %v1321_v42  ;;  %v1448_v50 = vpack.c.bf16 %v1402_v48, %v1400_v47  ;;  %v1406_v58 = vadd.f32 %v3760_v18, %v1330_v54  ;;  %v1403_v1 = vadd.f32 %v3764_v25, %v1327_v61  ;;  %v1340_v20 = vld [vmem:[#allocation2 + $0x188] sm:$0xff]  ;;  %v1342_v21 = vld [vmem:[#allocation2 + $0x198] sm:$0xff]  ;;  %v1341_v31 = vld [vmem:[#allocation2 + $0x190] sm:$0xff] }
 0x22d   : > { %v1441_v29 = vpack.c.bf16 %v1389_v26, %v1387_v24  ;;  %v1410_v4 = vadd.f32 %v3760_v18, %v1334_v0  ;;  %v1412_v13 = vadd.f32 %v3760_v18, %v1336_v9  ;;  %v1414_v14 = vadd.f32 %v3760_v18, %v1338_v10  ;;  %v1344_v32 = vld [vmem:[#allocation2 + $0x1a8] sm:$0xff]  ;;  %v1343_v42 = vld [vmem:[#allocation2 + $0x1a0] sm:$0xff]  ;;  %v1345_v43 = vld [vmem:[#allocation2 + $0x1b0] sm:$0xff] }
 0x22e   : > { %2708 = vmatpush3.bf16.msra.mxu1 %v3050_v60  ;;  %v1450_v60 = vpack.c.bf16 %v1406_v58, %v1404_v57  ;;  %v1416_v24 = vadd.f32 %v3760_v18, %v1340_v20  ;;  %v1418_v26 = vadd.f32 %v3760_v18, %v1342_v21  ;;  %v1417_v36 = vadd.f32 %v3764_v25, %v1341_v31  ;;  %v1348_v44 = vld [vmem:[#allocation2 + $0x1c8] sm:$0xff]  ;;  %v1347_v53 = vld [vmem:[#allocation2 + $0x1c0] sm:$0xff]  ;;  %v1349_v54 = vld [vmem:[#allocation2 + $0x1d0] sm:$0xff] }
 0x22f   : > { %2556 = vmatpush3.bf16.msra.mxu0 %v3046_v34  ;;  %v1322_v34 = vld [vmem:[#allocation2 + $0xf8] sm:$0xff]  ;;  %v1454_v16 = vpack.c.bf16 %v1414_v14, %v1412_v13  ;;  %2709 = vmatprep.subr.bf16.mxu1 %v3051_v27  ;;  %v1419_v47 = vadd.f32 %v3764_v25, %v1343_v42  ;;  %v1421_v48 = vadd.f32 %v3764_v25, %v1345_v43  ;;  %v1353_v0 = vld [vmem:[#allocation2 + $0x1f0] sm:$0xff]  ;;  %v3059_v42 = vld [vmem:[#allocation11 + $0x20] sm:$0xff]  }
 0x230   : > { %v1423_v57 = vadd.f32 %v3764_v25, %v1347_v53  ;;  %v1425_v58 = vadd.f32 %v3764_v25, %v1349_v54  ;;  %v3057_v31 = vld [vmem:[#allocation11 + $0x10] sm:$0xff]  }
 0x231   : > { %v1457_v51 = vpack.c.bf16 %v1421_v48, %v1419_v47  ;;  %v3060_v47 = vld [vmem:[#allocation11 + $0x28] sm:$0xff]  }
 0x232   : > { %1631 = vmatmul.mubr.bf16.vlgmr.msra.gmra.mrb[0].mxu0 %v1431_v37  ;;  %v1396_v37 = vadd.f32 %v3760_v18, %v1320_v33  ;;  %v1346_v33 = vld [vmem:[#allocation2 + $0x1b8] sm:$0xff]  ;;  %2710 = vmatpush3.bf16.msra.mxu1 %v3051_v27  ;;  %v1459_v61 = vpack.c.bf16 %v1425_v58, %v1423_v57 }
 0x233   : > { %1638 = vmatprep.mubr.bf16.mxu0 %v1434_v38  ;;  %v1398_v38 = vadd.f32 %v3760_v18, %v1322_v34  ;;  %v3052_v34 = vld [vmem:[#allocation9 + $0x28] sm:$0xff]  }
 0x234   : > { %2711 = vmatprep.subr.bf16.mxu1 %v3052_v34 }
 0x235   : > { %v1446_v40 = vpack.c.bf16 %v1398_v38, %v1396_v37  ;;  %v1420_v37 = vadd.f32 %v3760_v18, %v1344_v32  ;;  %v1422_v38 = vadd.f32 %v3760_v18, %v1346_v33 }
 0x236   : > { %2712 = vmatpush3.bf16.msra.mxu1 %v3052_v34 }
 0x237   : > { %v1458_v41 = vpack.c.bf16 %v1422_v38, %v1420_v37 }
 0x23a   : > { %1639 = vmatmul.mubr.bf16.gmra.mrb[4].mxu0 %v1433_v49  ;;  %v1445_v49 = vpack.c.bf16 %v1397_v46, %v1395_v45  ;;  %v1350_v45 = vld [vmem:[#allocation2 + $0x1d8] sm:$0xff] }
 0x23b   : > { %1646 = vmatprep.mubr.bf16.mxu0 %v1436_v52  ;;  %v1325_v52 = vld [vmem:[#allocation2 + $0x110] sm:$0xff]  ;;  %v3054_v46 = vld [vmem:[#allocation9 + $0x38] sm:$0xff]  }
 0x23c   : > { %v1401_v56 = vadd.f32 %v3764_v25, %v1325_v52 }
 0x23e   : > { %v1447_v59 = vpack.c.bf16 %v1401_v56, %v1399_v55  ;;  %v1352_v55 = vld [vmem:[#allocation2 + $0x1e8] sm:$0xff]  ;;  %v1354_v56 = vld [vmem:[#allocation2 + $0x1f8] sm:$0xff] }
 0x242   : > { %1647 = vmatmul.mubr.bf16.gmra.mrb[8].mxu0 %v1435_v63  ;;  %v1332_v63 = vld [vmem:[#allocation2 + $0x148] sm:$0xff] }
 0x243   : > { %1654 = vmatprep.mubr.bf16.mxu0 %v1438_v2  ;;  %v1405_v2 = vadd.f32 %v3764_v25, %v1329_v62  ;;  %v1408_v3 = vadd.f32 %v3760_v18, %v1332_v63  ;;  %v1351_v63 = vld [vmem:[#allocation2 + $0x1e0] sm:$0xff] }
 0x245   : > { %v1449_v5 = vpack.c.bf16 %v1405_v2, %v1403_v1  ;;  %v1452_v6 = vpack.c.bf16 %v1410_v4, %v1408_v3  ;;  %v1427_v1 = vadd.f32 %v3764_v25, %v1351_v63  ;;  %v1429_v2 = vadd.f32 %v3764_v25, %v1353_v0 }
 0x247   : > { %v1461_v3 = vpack.c.bf16 %v1429_v2, %v1427_v1 }
 0x24a   : > { %1655 = vmatmul.mubr.bf16.gmra.mrb[12].mxu0 %v1437_v7  ;;  %v1331_v7 = vld [vmem:[#allocation2 + $0x140] sm:$0xff] }
 0x24b   : > { %1662 = vmatprep.mubr.bf16.mxu0 %v1440_v8  ;;  %v1333_v8 = vld [vmem:[#allocation2 + $0x150] sm:$0xff]  ;;  %v1407_v11 = vadd.f32 %v3764_v25, %v1331_v7 }
 0x24c   : > { %v1409_v12 = vadd.f32 %v3764_v25, %v1333_v8  ;;  %v3055_v8 = vld [vmem:[#allocation11] sm:$0xff]  }
 0x24e   : > { %v1451_v15 = vpack.c.bf16 %v1409_v12, %v1407_v11 }
 0x252   : > { %1663 = vmatmul.mubr.bf16.gmra.mrb[16].mxu0 %v1439_v17  ;;  %v1335_v17 = vld [vmem:[#allocation2 + $0x160] sm:$0xff] }
 0x253   : > { %1670 = vmatprep.mubr.bf16.mxu0 %v1442_v19  ;;  %v1337_v19 = vld [vmem:[#allocation2 + $0x170] sm:$0xff]  ;;  %v1411_v22 = vadd.f32 %v3764_v25, %v1335_v17 }
 0x254   : > { %v1413_v23 = vadd.f32 %v3764_v25, %v1337_v19 }
 0x256   : > { %v1453_v28 = vpack.c.bf16 %v1413_v23, %v1411_v22 }
 0x25a   : > { %1671 = vmatmul.mubr.bf16.gmra.mrb[20].mxu0 %v1441_v29  ;;  %v1456_v29 = vpack.c.bf16 %v1418_v26, %v1416_v24  ;;  %v3056_v24 = vld [vmem:[#allocation11 + $0x8] sm:$0xff]  }
 0x25b   : > { %1678 = vmatprep.mubr.bf16.mxu0 %v1444_v30  ;;  %v1339_v30 = vld [vmem:[#allocation2 + $0x180] sm:$0xff] }
 0x25c   : > { %v1415_v35 = vadd.f32 %v3764_v25, %v1339_v30 }
 0x262   : > { %1679 = vmatmul.mubr.bf16.gmra.mrb[24].mxu0 %v1443_v39  ;;  %v3053_v39 = vld [vmem:[#allocation9 + $0x30] sm:$0xff]  }
 0x263   : > { %1686 = vmatprep.mubr.bf16.mxu0 %v1446_v40  ;;  %v1455_v40 = vpack.c.bf16 %v1417_v36, %v1415_v35  ;;  %2713 = vmatprep.subr.bf16.mxu1 %v3053_v39  ;;  %v3058_v36 = vld [vmem:[#allocation11 + $0x18] sm:$0xff]  }
 0x264   : > { %2714 = vmatpush3.bf16.msra.mxu1 %v3053_v39 }
 0x265   : > { %2715 = vmatprep.subr.bf16.mxu1 %v3054_v46 }
 0x268   : > { %2716 = vmatpush3.bf16.msra.mxu1 %v3054_v46 }
 0x269   : > { %2749 = vmatprep.subr.bf16.mxu1 %v3055_v8 }
 0x26a   : > { %1687 = vmatmul.mubr.bf16.gmra.mrb[28].mxu0 %v1445_v49  ;;  %v1424_v49 = vadd.f32 %v3760_v18, %v1348_v44 }
 0x26b   : > { %1694 = vmatprep.mubr.bf16.mxu0 %v1448_v50  ;;  %v1426_v50 = vadd.f32 %v3760_v18, %v1350_v45 }
 0x26d   : > { %v1460_v52 = vpack.c.bf16 %v1426_v50, %v1424_v49 }
 0x272   : > { %1695 = vmatmul.mubr.bf16.gmra.mrb[32].mxu0 %v1447_v59  ;;  %v1428_v59 = vadd.f32 %v3760_v18, %v1352_v55 }
 0x273   : > { %1702 = vmatprep.mubr.bf16.mxu0 %v1450_v60  ;;  %v1430_v60 = vadd.f32 %v3760_v18, %v1354_v56  ;;  %v3831_v18 = vld [vmem:[%s3984_s4] ss:$0 sm:$0xff] }
 0x275   : > { %v1462_v62 = vpack.c.bf16 %v1430_v60, %v1428_v59 }
 0x27a   : > { %1703 = vmatmul.mubr.bf16.gmra.mrb[36].mxu0 %v1449_v5 }
 0x27b   : > { %1710 = vmatprep.mubr.bf16.mxu0 %v1452_v6 }
 0x282   : > { %1711 = vmatmul.mubr.bf16.gmra.mrb[40].mxu0 %v1451_v15 }
 0x283   : > { %1718 = vmatprep.mubr.bf16.mxu0 %v1454_v16 }
 0x28a   : > { %1719 = vmatmul.mubr.bf16.gmra.mrb[44].mxu0 %v1453_v28 }
 0x28b   : > { %1726 = vmatprep.mubr.bf16.mxu0 %v1456_v29 }
 0x292   : > { %1727 = vmatmul.mubr.bf16.gmra.mrb[48].mxu0 %v1455_v40 }
 0x293   : > { %1734 = vmatprep.mubr.bf16.mxu0 %v1458_v41 }
 0x29a   : > { %1735 = vmatmul.mubr.bf16.gmra.mrb[52].mxu0 %v1457_v51 }
 0x29b   : > { %1742 = vmatprep.mubr.bf16.mxu0 %v1460_v52 }
 0x2a2   : > { %1743 = vmatmul.mubr.bf16.gmra.mrb[56].mxu0 %v1459_v61 }
 0x2a3   : > { %1750 = vmatprep.mubr.bf16.mxu0 %v1462_v62 }
 0x2aa   : > { %1751 = vmatmul.mubr.bf16.gmra.mrb[60].mxu0 %v1461_v3 }
 0x305   : > { %v2557_v4 = vpop.f32.mrb[0].mxu0 }
 0x306   : > { %v2558_v5 = vpop.f32.mrb[1].mxu0 }
 0x307   : > { %v2559_v6 = vadd.f32 %v2558_v5, %v2557_v4  ;;  %v2560_v7 = vpop.f32.mrb[2].mxu0 }
 0x308   : > { %v2561_v9 = vpop.f32.mrb[3].mxu0 }
 0x309   : > { %v2562_v10 = vadd.f32 %v2561_v9, %v2560_v7  ;;  %v1633_v11 = vadd.f32 %v2559_v6, %v3831_v18 }
 0x30b   : > { %v1636_v25 = vadd.f32 %v2562_v10, %v3831_v18 }
 0x30d   : > { %v2563_v12 = vpop.f32.mrb[4].mxu0  ;;  %v1759_v13 = vpack.c.bf16 %v1636_v25, %v1633_v11 }
 0x30e   : > { %v2564_v14 = vpop.f32.mrb[5].mxu0 }
 0x30f   : > { %v2565_v15 = vadd.f32 %v2564_v14, %v2563_v12  ;;  %v2566_v16 = vpop.f32.mrb[6].mxu0  ;;  %2717 = vmatprep.mubr.bf16.mxu1 %v1759_v13 }
 0x310   : > { %v2567_v17 = vpop.f32.mrb[7].mxu0 }
 0x311   : > { %v2568_v19 = vadd.f32 %v2567_v17, %v2566_v16  ;;  %v1641_v20 = vadd.f32 %v2565_v15, %v3831_v18 }
 0x313   : > { %v1644_v21 = vadd.f32 %v2568_v19, %v3831_v18 }
 0x315   : > { %v2569_v22 = vpop.f32.mrb[8].mxu0  ;;  %v1760_v23 = vpack.c.bf16 %v1644_v21, %v1641_v20 }
 0x316   : > { %v2570_v26 = vpop.f32.mrb[9].mxu0 }
 0x317   : > { %v2571_v27 = vadd.f32 %v2570_v26, %v2569_v22  ;;  %v2572_v28 = vpop.f32.mrb[10].mxu0  ;;  %2718 = vmatmul.mubr.bf16.vlgmr.msra.gmra.mrb[0].mxu1 %v1760_v23 }
 0x318   : > { %v2573_v29 = vpop.f32.mrb[11].mxu0  ;;  %2750 = vmatpush3.bf16.msra.mxu1 %v3055_v8 }
 0x319   : > { %v2574_v30 = vadd.f32 %v2573_v29, %v2572_v28  ;;  %2751 = vmatprep.subr.bf16.mxu1 %v3056_v24  ;;  %v1649_v32 = vadd.f32 %v2571_v27, %v3831_v18 }
 0x31b   : > { %v1652_v33 = vadd.f32 %v2574_v30, %v3831_v18 }
 0x31c   : > { %2752 = vmatpush3.bf16.msra.mxu1 %v3056_v24 }
 0x31d   : > { %v2575_v34 = vpop.f32.mrb[12].mxu0  ;;  %v1761_v35 = vpack.c.bf16 %v1652_v33, %v1649_v32  ;;  %2753 = vmatprep.subr.bf16.mxu1 %v3057_v31 }
 0x31e   : > { %v2576_v37 = vpop.f32.mrb[13].mxu0 }
 0x31f   : > { %v2577_v38 = vadd.f32 %v2576_v37, %v2575_v34  ;;  %v2578_v39 = vpop.f32.mrb[14].mxu0  ;;  %2721 = vmatprep.mubr.bf16.mxu1 %v1761_v35 }
 0x320   : > { %v2579_v40 = vpop.f32.mrb[15].mxu0  ;;  %2754 = vmatpush3.bf16.msra.mxu1 %v3057_v31 }
 0x321   : > { %v2580_v41 = vadd.f32 %v2579_v40, %v2578_v39  ;;  %2755 = vmatprep.subr.bf16.mxu1 %v3058_v36  ;;  %v1657_v43 = vadd.f32 %v2577_v38, %v3831_v18 }
 0x323   : > { %v1660_v44 = vadd.f32 %v2580_v41, %v3831_v18 }
 0x324   : > { %2756 = vmatpush3.bf16.msra.mxu1 %v3058_v36 }
 0x325   : > { %v2581_v45 = vpop.f32.mrb[16].mxu0  ;;  %v1762_v46 = vpack.c.bf16 %v1660_v44, %v1657_v43  ;;  %2757 = vmatprep.subr.bf16.mxu1 %v3059_v42 }
 0x326   : > { %v2582_v48 = vpop.f32.mrb[17].mxu0 }
 0x327   : > { %v2583_v49 = vadd.f32 %v2582_v48, %v2581_v45  ;;  %v2584_v50 = vpop.f32.mrb[18].mxu0  ;;  %2722 = vmatmul.mubr.bf16.gmra.mrb[4].mxu1 %v1762_v46 }
 0x328   : > { %v2585_v51 = vpop.f32.mrb[19].mxu0  ;;  %2758 = vmatpush3.bf16.msra.mxu1 %v3059_v42 }
 0x329   : > { %v2586_v52 = vadd.f32 %v2585_v51, %v2584_v50  ;;  %2759 = vmatprep.subr.bf16.mxu1 %v3060_v47  ;;  %v1665_v53 = vadd.f32 %v2583_v49, %v3831_v18 }
 0x32b   : > { %v1668_v54 = vadd.f32 %v2586_v52, %v3831_v18 }
 0x32c   : > { %2760 = vmatpush3.bf16.msra.mxu1 %v3060_v47 }
 0x32d   : > { %v2587_v55 = vpop.f32.mrb[20].mxu0  ;;  %v1763_v56 = vpack.c.bf16 %v1668_v54, %v1665_v53 }
 0x32e   : > { %v2588_v57 = vpop.f32.mrb[21].mxu0 }
 0x32f   : > { %v2589_v58 = vadd.f32 %v2588_v57, %v2587_v55  ;;  %v2590_v59 = vpop.f32.mrb[22].mxu0  ;;  %2725 = vmatprep.mubr.bf16.mxu1 %v1763_v56 }
 0x330   : > { %v2591_v60 = vpop.f32.mrb[23].mxu0 }
 0x331   : > { %v2592_v61 = vadd.f32 %v2591_v60, %v2590_v59  ;;  %v1673_v62 = vadd.f32 %v2589_v58, %v3831_v18 }
 0x333   : > { %v1676_v63 = vadd.f32 %v2592_v61, %v3831_v18 }
 0x335   : > { %v2593_v0 = vpop.f32.mrb[24].mxu0  ;;  %v1764_v1 = vpack.c.bf16 %v1676_v63, %v1673_v62  ;;  %v3061_v62 = vld [vmem:[#allocation11 + $0x30] sm:$0xff]  }
 0x336   : > { %v2594_v2 = vpop.f32.mrb[25].mxu0  ;;  %2761 = vmatprep.subr.bf16.mxu1 %v3061_v62 }
 0x337   : > { %v2595_v3 = vadd.f32 %v2594_v2, %v2593_v0  ;;  %v2596_v4 = vpop.f32.mrb[26].mxu0  ;;  %2726 = vmatmul.mubr.bf16.gmra.mrb[8].mxu1 %v1764_v1 }
 0x338   : > { %v2597_v5 = vpop.f32.mrb[27].mxu0  ;;  %2762 = vmatpush3.bf16.msra.mxu1 %v3061_v62 }
 0x339   : > { %v2598_v6 = vadd.f32 %v2597_v5, %v2596_v4  ;;  %v1681_v7 = vadd.f32 %v2595_v3, %v3831_v18  ;;  %v3062_v3 = vld [vmem:[#allocation11 + $0x38] sm:$0xff]  }
 0x33a   : > { %2763 = vmatprep.subr.bf16.mxu1 %v3062_v3 }
 0x33b   : > { %v1684_v8 = vadd.f32 %v2598_v6, %v3831_v18 }
 0x33c   : > { %2764 = vmatpush3.bf16.msra.mxu1 %v3062_v3 }
 0x33d   : > { %v2599_v9 = vpop.f32.mrb[28].mxu0  ;;  %v1765_v10 = vpack.c.bf16 %v1684_v8, %v1681_v7 }
 0x33e   : > { %v2600_v11 = vpop.f32.mrb[29].mxu0 }
 0x33f   : > { %v2601_v25 = vadd.f32 %v2600_v11, %v2599_v9  ;;  %v2602_v12 = vpop.f32.mrb[30].mxu0  ;;  %2729 = vmatprep.mubr.bf16.mxu1 %v1765_v10 }
 0x340   : > { %v2603_v13 = vpop.f32.mrb[31].mxu0 }
 0x341   : > { %v2604_v14 = vadd.f32 %v2603_v13, %v2602_v12  ;;  %v1689_v15 = vadd.f32 %v2601_v25, %v3831_v18 }
 0x343   : > { %v1692_v16 = vadd.f32 %v2604_v14, %v3831_v18 }
 0x345   : > { %v2605_v17 = vpop.f32.mrb[32].mxu0  ;;  %v1766_v19 = vpack.c.bf16 %v1692_v16, %v1689_v15 }
 0x346   : > { %v2606_v20 = vpop.f32.mrb[33].mxu0 }
 0x347   : > { %v2607_v21 = vadd.f32 %v2606_v20, %v2605_v17  ;;  %v2608_v22 = vpop.f32.mrb[34].mxu0  ;;  %2730 = vmatmul.mubr.bf16.gmra.mrb[12].mxu1 %v1766_v19 }
 0x348   : > { %v2609_v23 = vpop.f32.mrb[35].mxu0 }
 0x349   : > { %v2610_v24 = vadd.f32 %v2609_v23, %v2608_v22  ;;  %v1697_v26 = vadd.f32 %v2607_v21, %v3831_v18 }
 0x34b   : > { %v1700_v27 = vadd.f32 %v2610_v24, %v3831_v18 }
 0x34d   : > { %v2611_v28 = vpop.f32.mrb[36].mxu0  ;;  %v1767_v29 = vpack.c.bf16 %v1700_v27, %v1697_v26 }
 0x34e   : > { %v2612_v30 = vpop.f32.mrb[37].mxu0 }
 0x34f   : > { %v2613_v31 = vadd.f32 %v2612_v30, %v2611_v28  ;;  %v2614_v32 = vpop.f32.mrb[38].mxu0  ;;  %2733 = vmatprep.mubr.bf16.mxu1 %v1767_v29 }
 0x350   : > { %v2615_v33 = vpop.f32.mrb[39].mxu0 }
 0x351   : > { %v2616_v34 = vadd.f32 %v2615_v33, %v2614_v32  ;;  %v1705_v35 = vadd.f32 %v2613_v31, %v3831_v18  ;;  %v3868_v32 = vld [vmem:[%s4017_s6] ss:$0 sm:$0xff] }
 0x353   : > { %v1708_v36 = vadd.f32 %v2616_v34, %v3831_v18 }
 0x355   : > { %v2617_v37 = vpop.f32.mrb[40].mxu0  ;;  %v1768_v38 = vpack.c.bf16 %v1708_v36, %v1705_v35 }
 0x356   : > { %v2618_v39 = vpop.f32.mrb[41].mxu0 }
 0x357   : > { %v2619_v40 = vadd.f32 %v2618_v39, %v2617_v37  ;;  %v2620_v41 = vpop.f32.mrb[42].mxu0  ;;  %2734 = vmatmul.mubr.bf16.gmra.mrb[16].mxu1 %v1768_v38 }
 0x358   : > { %v2621_v42 = vpop.f32.mrb[43].mxu0 }
 0x359   : > { %v2622_v43 = vadd.f32 %v2621_v42, %v2620_v41  ;;  %v1713_v44 = vadd.f32 %v2619_v40, %v3831_v18 }
 0x35b   : > { %v1716_v45 = vadd.f32 %v2622_v43, %v3831_v18 }
 0x35d   : > { %v2623_v46 = vpop.f32.mrb[44].mxu0  ;;  %v1769_v47 = vpack.c.bf16 %v1716_v45, %v1713_v44 }
 0x35e   : > { %v2624_v48 = vpop.f32.mrb[45].mxu0 }
 0x35f   : > { %v2625_v49 = vadd.f32 %v2624_v48, %v2623_v46  ;;  %v2626_v50 = vpop.f32.mrb[46].mxu0  ;;  %2737 = vmatprep.mubr.bf16.mxu1 %v1769_v47 }
 0x360   : > { %v2627_v51 = vpop.f32.mrb[47].mxu0 }
 0x361   : > { %v2628_v52 = vadd.f32 %v2627_v51, %v2626_v50  ;;  %v1721_v53 = vadd.f32 %v2625_v49, %v3831_v18 }
 0x363   : > { %v1724_v54 = vadd.f32 %v2628_v52, %v3831_v18 }
 0x365   : > { %v2629_v55 = vpop.f32.mrb[48].mxu0  ;;  %v1770_v56 = vpack.c.bf16 %v1724_v54, %v1721_v53 }
 0x366   : > { %v2630_v57 = vpop.f32.mrb[49].mxu0 }
 0x367   : > { %v2631_v58 = vadd.f32 %v2630_v57, %v2629_v55  ;;  %v2632_v59 = vpop.f32.mrb[50].mxu0  ;;  %2738 = vmatmul.mubr.bf16.gmra.mrb[20].mxu1 %v1770_v56 }
 0x368   : > { %v2633_v60 = vpop.f32.mrb[51].mxu0 }
 0x369   : > { %v2634_v61 = vadd.f32 %v2633_v60, %v2632_v59  ;;  %v1729_v63 = vadd.f32 %v2631_v58, %v3831_v18 }
 0x36b   : > { %v1732_v0 = vadd.f32 %v2634_v61, %v3831_v18 }
 0x36d   : > { %v2635_v1 = vpop.f32.mrb[52].mxu0  ;;  %v1771_v2 = vpack.c.bf16 %v1732_v0, %v1729_v63 }
 0x36e   : > { %v2636_v4 = vpop.f32.mrb[53].mxu0 }
 0x36f   : > { %v2637_v5 = vadd.f32 %v2636_v4, %v2635_v1  ;;  %v2638_v6 = vpop.f32.mrb[54].mxu0  ;;  %2741 = vmatprep.mubr.bf16.mxu1 %v1771_v2 }
 0x370   : > { %v2639_v7 = vpop.f32.mrb[55].mxu0 }
 0x371   : > { %v2640_v8 = vadd.f32 %v2639_v7, %v2638_v6  ;;  %v1737_v9 = vadd.f32 %v2637_v5, %v3831_v18 }
 0x373   : > { %v1740_v10 = vadd.f32 %v2640_v8, %v3831_v18 }
 0x375   : > { %v2641_v11 = vpop.f32.mrb[56].mxu0  ;;  %v1772_v25 = vpack.c.bf16 %v1740_v10, %v1737_v9 }
 0x376   : > { %v2642_v12 = vpop.f32.mrb[57].mxu0 }
 0x377   : > { %v2643_v13 = vadd.f32 %v2642_v12, %v2641_v11  ;;  %v2644_v14 = vpop.f32.mrb[58].mxu0  ;;  %2742 = vmatmul.mubr.bf16.gmra.mrb[24].mxu1 %v1772_v25 }
 0x378   : > { %v2645_v15 = vpop.f32.mrb[59].mxu0 }
 0x379   : > { %v2646_v16 = vadd.f32 %v2645_v15, %v2644_v14  ;;  %v1745_v17 = vadd.f32 %v2643_v13, %v3831_v18 }
 0x37b   : > { %v1748_v19 = vadd.f32 %v2646_v16, %v3831_v18 }
 0x37d   : > { %v2647_v20 = vpop.f32.mrb[60].mxu0  ;;  %v1773_v21 = vpack.c.bf16 %v1748_v19, %v1745_v17 }
 0x37e   : > { %v2648_v22 = vpop.f32.mrb[61].mxu0 }
 0x37f   : > { %v2649_v23 = vadd.f32 %v2648_v22, %v2647_v20  ;;  %v2650_v24 = vpop.f32.mrb[62].mxu0  ;;  %2745 = vmatprep.mubr.bf16.mxu1 %v1773_v21 }
 0x380   : > { %v2651_v26 = vpop.f32.mrb[63].mxu0 }
 0x381   : > { %v2652_v27 = vadd.f32 %v2651_v26, %v2650_v24  ;;  %v1753_v28 = vadd.f32 %v2649_v23, %v3831_v18 }
 0x383   : > { %v1756_v29 = vadd.f32 %v2652_v27, %v3831_v18 }
 0x385   : > { %v1774_v30 = vpack.c.bf16 %v1756_v29, %v1753_v28 }
 0x387   : > { %2746 = vmatmul.mubr.bf16.gmra.mrb[28].mxu1 %v1774_v30 }
 0x3ea   : > { %v2719_v31 = vpop.f32.mrb[0].mxu1 }
 0x3eb   : > { %v1880_v33 = vpop.f32.mrb[1].mxu1  ;;  %v1889_v35 = vadd.f32 %v2719_v31, %v3868_v32 }
 0x3ec   : > { %v2720_v34 = vpop.f32.mrb[2].mxu1  ;;  %v1881_v38 = vadd.f32 %v3868_v32, %v1880_v33 }
 0x3ed   : > { %v1892_v36 = vadd.f32 %v2720_v34, %v3868_v32  ;;  %v1883_v37 = vpop.f32.mrb[3].mxu1 }
 0x3ee   : > { %v1884_v39 = vadd.f32 %v3868_v32, %v1883_v37 }
 0x3ef   : > { %v2008_v18 = vpack.c.bf16 %v1892_v36, %v1889_v35 }
 0x3f0   : > { %v2007_v40 = vpack.c.bf16 %v1884_v39, %v1881_v38 }
 0x3f2   : > { %2765 = vmatprep.mubr.bf16.mxu1 %v2007_v40 }
 0x3f3   : > { %2766 = vmatmul.mubr.bf16.vlgmr.msra.gmra.mrb[32].mxu1 %v2008_v18 }
 0x3fa   : > { %v2723_v41 = vpop.f32.mrb[4].mxu1 }
 0x3fb   : > { %v1896_v42 = vpop.f32.mrb[5].mxu1  ;;  %v1905_v44 = vadd.f32 %v2723_v41, %v3868_v32 }
 0x3fc   : > { %v2724_v43 = vpop.f32.mrb[6].mxu1  ;;  %v1897_v47 = vadd.f32 %v3868_v32, %v1896_v42 }
 0x3fd   : > { %v1908_v45 = vadd.f32 %v2724_v43, %v3868_v32  ;;  %v1899_v46 = vpop.f32.mrb[7].mxu1 }
 0x3fe   : > { %v1900_v48 = vadd.f32 %v3868_v32, %v1899_v46 }
 0x3ff   : > { %v2010_v49 = vpack.c.bf16 %v1908_v45, %v1905_v44 }
 0x400   : > { %v2009_v50 = vpack.c.bf16 %v1900_v48, %v1897_v47  ;;  %v3905_v48 = vld [vmem:[%s4018_s20] ss:$0 sm:$0xff] }
 0x402   : > { %2769 = vmatprep.mubr.bf16.mxu1 %v2009_v50 }
 0x403   : > { %2770 = vmatmul.mubr.bf16.gmra.mrb[36].mxu1 %v2010_v49 }
 0x40a   : > { %v2727_v51 = vpop.f32.mrb[8].mxu1 }
 0x40b   : > { %v1912_v52 = vpop.f32.mrb[9].mxu1  ;;  %v1921_v54 = vadd.f32 %v2727_v51, %v3868_v32 }
 0x40c   : > { %v2728_v53 = vpop.f32.mrb[10].mxu1  ;;  %v1913_v57 = vadd.f32 %v3868_v32, %v1912_v52 }
 0x40d   : > { %v1924_v55 = vadd.f32 %v2728_v53, %v3868_v32  ;;  %v1915_v56 = vpop.f32.mrb[11].mxu1 }
 0x40e   : > { %v1916_v58 = vadd.f32 %v3868_v32, %v1915_v56 }
 0x40f   : > { %v2012_v59 = vpack.c.bf16 %v1924_v55, %v1921_v54 }
 0x410   : > { %v2011_v60 = vpack.c.bf16 %v1916_v58, %v1913_v57 }
 0x412   : > { %2773 = vmatprep.mubr.bf16.mxu1 %v2011_v60 }
 0x413   : > { %2774 = vmatmul.mubr.bf16.gmra.mrb[40].mxu1 %v2012_v59 }
 0x41a   : > { %v2731_v61 = vpop.f32.mrb[12].mxu1 }
 0x41b   : > { %v1928_v62 = vpop.f32.mrb[13].mxu1  ;;  %v1937_v0 = vadd.f32 %v2731_v61, %v3868_v32 }
 0x41c   : > { %v2732_v63 = vpop.f32.mrb[14].mxu1  ;;  %v1929_v3 = vadd.f32 %v3868_v32, %v1928_v62 }
 0x41d   : > { %v1940_v1 = vadd.f32 %v2732_v63, %v3868_v32  ;;  %v1931_v2 = vpop.f32.mrb[15].mxu1 }
 0x41e   : > { %v1932_v4 = vadd.f32 %v3868_v32, %v1931_v2 }
 0x41f   : > { %v2014_v5 = vpack.c.bf16 %v1940_v1, %v1937_v0 }
 0x420   : > { %v2013_v6 = vpack.c.bf16 %v1932_v4, %v1929_v3 }
 0x422   : > { %2777 = vmatprep.mubr.bf16.mxu1 %v2013_v6 }
 0x423   : > { %2778 = vmatmul.mubr.bf16.gmra.mrb[44].mxu1 %v2014_v5 }
 0x42a   : > { %v2735_v7 = vpop.f32.mrb[16].mxu1 }
 0x42b   : > { %v1944_v8 = vpop.f32.mrb[17].mxu1  ;;  %v1953_v10 = vadd.f32 %v2735_v7, %v3868_v32 }
 0x42c   : > { %v2736_v9 = vpop.f32.mrb[18].mxu1  ;;  %v1945_v12 = vadd.f32 %v3868_v32, %v1944_v8 }
 0x42d   : > { %v1956_v11 = vadd.f32 %v2736_v9, %v3868_v32  ;;  %v1947_v25 = vpop.f32.mrb[19].mxu1 }
 0x42e   : > { %v1948_v13 = vadd.f32 %v3868_v32, %v1947_v25 }
 0x42f   : > { %v2016_v14 = vpack.c.bf16 %v1956_v11, %v1953_v10 }
 0x430   : > { %v2015_v15 = vpack.c.bf16 %v1948_v13, %v1945_v12 }
 0x432   : > { %2781 = vmatprep.mubr.bf16.mxu1 %v2015_v15 }
 0x433   : > { %2782 = vmatmul.mubr.bf16.gmra.mrb[48].mxu1 %v2016_v14 }
 0x43a   : > { %v2739_v16 = vpop.f32.mrb[20].mxu1 }
 0x43b   : > { %v1960_v17 = vpop.f32.mrb[21].mxu1  ;;  %v1969_v20 = vadd.f32 %v2739_v16, %v3868_v32 }
 0x43c   : > { %v2740_v19 = vpop.f32.mrb[22].mxu1  ;;  %v1961_v23 = vadd.f32 %v3868_v32, %v1960_v17 }
 0x43d   : > { %v1972_v21 = vadd.f32 %v2740_v19, %v3868_v32  ;;  %v1963_v22 = vpop.f32.mrb[23].mxu1 }
 0x43e   : > { %v1964_v24 = vadd.f32 %v3868_v32, %v1963_v22 }
 0x43f   : > { %v2018_v26 = vpack.c.bf16 %v1972_v21, %v1969_v20 }
 0x440   : > { %v2017_v27 = vpack.c.bf16 %v1964_v24, %v1961_v23 }
 0x442   : > { %2785 = vmatprep.mubr.bf16.mxu1 %v2017_v27 }
 0x443   : > { %2786 = vmatmul.mubr.bf16.gmra.mrb[52].mxu1 %v2018_v26 }
 0x44a   : > { %v2743_v28 = vpop.f32.mrb[24].mxu1 }
 0x44b   : > { %v1976_v29 = vpop.f32.mrb[25].mxu1  ;;  %v1985_v31 = vadd.f32 %v2743_v28, %v3868_v32 }
 0x44c   : > { %v2744_v30 = vpop.f32.mrb[26].mxu1  ;;  %v1977_v35 = vadd.f32 %v3868_v32, %v1976_v29 }
 0x44d   : > { %v1988_v33 = vadd.f32 %v2744_v30, %v3868_v32  ;;  %v1979_v34 = vpop.f32.mrb[27].mxu1 }
 0x44e   : > { %v1980_v36 = vadd.f32 %v3868_v32, %v1979_v34 }
 0x44f   : > { %v2020_v37 = vpack.c.bf16 %v1988_v33, %v1985_v31 }
 0x450   : > { %v2019_v38 = vpack.c.bf16 %v1980_v36, %v1977_v35 }
 0x452   : > { %2789 = vmatprep.mubr.bf16.mxu1 %v2019_v38 }
 0x453   : > { %2790 = vmatmul.mubr.bf16.gmra.mrb[56].mxu1 %v2020_v37 }
 0x45a   : > { %v2747_v39 = vpop.f32.mrb[28].mxu1 }
 0x45b   : > { %v1992_v18 = vpop.f32.mrb[29].mxu1  ;;  %v2001_v41 = vadd.f32 %v2747_v39, %v3868_v32 }
 0x45c   : > { %v2748_v40 = vpop.f32.mrb[30].mxu1  ;;  %v1993_v44 = vadd.f32 %v3868_v32, %v1992_v18 }
 0x45d   : > { %v2004_v42 = vadd.f32 %v2748_v40, %v3868_v32  ;;  %v1995_v43 = vpop.f32.mrb[31].mxu1 }
 0x45e   : > { %v1996_v45 = vadd.f32 %v3868_v32, %v1995_v43 }
 0x45f   : > { %v2022_v46 = vpack.c.bf16 %v2004_v42, %v2001_v41 }
 0x460   : > { %v2021_v47 = vpack.c.bf16 %v1996_v45, %v1993_v44 }
 0x462   : > { %2793 = vmatprep.mubr.bf16.mxu1 %v2021_v47 }
 0x463   : > { %2794 = vmatmul.mubr.bf16.gmra.mrb[60].mxu1 %v2022_v46 }
 0x4c6   : > { %v2767_v49 = vpop.f32.mrb[32].mxu1 }
 0x4c7   : > { %v2137_v50 = vadd.f32 %v2767_v49, %v3905_v48  ;;  %v2128_v51 = vpop.f32.mrb[33].mxu1 }
 0x4c8   : > { %v2129_v52 = vadd.f32 %v3905_v48, %v2128_v51  ;;  %v2768_v53 = vpop.f32.mrb[34].mxu1 }
 0x4c9   : > { %2257 = vst [vmem:[#allocation12 + $0x10] sm:$0xff] %v2137_v50  ;;  %v2140_v54 = vadd.f32 %v2768_v53, %v3905_v48  ;;  %v2131_v32 = vpop.f32.mrb[35].mxu1 }
 0x4ca   : > { %2255 = vst [vmem:[#allocation12] sm:$0xff] %v2129_v52  ;;  %v2132_v55 = vadd.f32 %v3905_v48, %v2131_v32 }
 0x4cb   : > { %2258 = vst [vmem:[#allocation12 + $0x18] sm:$0xff] %v2140_v54 }
 0x4cc   : > { %2256 = vst [vmem:[#allocation12 + $0x8] sm:$0xff] %v2132_v55 }
 0x4d6   : > { %v2771_v56 = vpop.f32.mrb[36].mxu1 }
 0x4d7   : > { %v2153_v57 = vadd.f32 %v2771_v56, %v3905_v48  ;;  %v2144_v58 = vpop.f32.mrb[37].mxu1 }
 0x4d8   : > { %v2145_v59 = vadd.f32 %v3905_v48, %v2144_v58  ;;  %v2772_v60 = vpop.f32.mrb[38].mxu1 }
 0x4d9   : > { %2261 = vst [vmem:[#allocation12 + $0x30] sm:$0xff] %v2153_v57  ;;  %v2156_v61 = vadd.f32 %v2772_v60, %v3905_v48  ;;  %v2147_v62 = vpop.f32.mrb[39].mxu1 }
 0x4da   : > { %2259 = vst [vmem:[#allocation12 + $0x20] sm:$0xff] %v2145_v59  ;;  %v2148_v63 = vadd.f32 %v3905_v48, %v2147_v62 }
 0x4db   : > { %2262 = vst [vmem:[#allocation12 + $0x38] sm:$0xff] %v2156_v61 }
 0x4dc   : > { %2260 = vst [vmem:[#allocation12 + $0x28] sm:$0xff] %v2148_v63 }
 0x4e6   : > { %v2775_v0 = vpop.f32.mrb[40].mxu1 }
 0x4e7   : > { %v2169_v1 = vadd.f32 %v2775_v0, %v3905_v48  ;;  %v2160_v2 = vpop.f32.mrb[41].mxu1 }
 0x4e8   : > { %v2161_v3 = vadd.f32 %v3905_v48, %v2160_v2  ;;  %v2776_v4 = vpop.f32.mrb[42].mxu1 }
 0x4e9   : > { %2265 = vst [vmem:[#allocation12 + $0x50] sm:$0xff] %v2169_v1  ;;  %v2172_v5 = vadd.f32 %v2776_v4, %v3905_v48  ;;  %v2163_v6 = vpop.f32.mrb[43].mxu1 }
 0x4ea   : > { %2263 = vst [vmem:[#allocation12 + $0x40] sm:$0xff] %v2161_v3  ;;  %v2164_v7 = vadd.f32 %v3905_v48, %v2163_v6 }
 0x4eb   : > { %2266 = vst [vmem:[#allocation12 + $0x58] sm:$0xff] %v2172_v5 }
 0x4ec   : > { %2264 = vst [vmem:[#allocation12 + $0x48] sm:$0xff] %v2164_v7 }
 0x4f6   : > { %v2779_v8 = vpop.f32.mrb[44].mxu1 }
 0x4f7   : > { %v2185_v9 = vadd.f32 %v2779_v8, %v3905_v48  ;;  %v2176_v10 = vpop.f32.mrb[45].mxu1 }
 0x4f8   : > { %v2177_v11 = vadd.f32 %v3905_v48, %v2176_v10  ;;  %v2780_v25 = vpop.f32.mrb[46].mxu1 }
 0x4f9   : > { %2269 = vst [vmem:[#allocation12 + $0x70] sm:$0xff] %v2185_v9  ;;  %v2188_v12 = vadd.f32 %v2780_v25, %v3905_v48  ;;  %v2179_v13 = vpop.f32.mrb[47].mxu1 }
 0x4fa   : > { %2267 = vst [vmem:[#allocation12 + $0x60] sm:$0xff] %v2177_v11  ;;  %v2180_v14 = vadd.f32 %v3905_v48, %v2179_v13 }
 0x4fb   : > { %2270 = vst [vmem:[#allocation12 + $0x78] sm:$0xff] %v2188_v12 }
 0x4fc   : > { %2268 = vst [vmem:[#allocation12 + $0x68] sm:$0xff] %v2180_v14 }
 0x506   : > { %v2783_v15 = vpop.f32.mrb[48].mxu1 }
 0x507   : > { %v2201_v16 = vadd.f32 %v2783_v15, %v3905_v48  ;;  %v2192_v17 = vpop.f32.mrb[49].mxu1 }
 0x508   : > { %v2193_v19 = vadd.f32 %v3905_v48, %v2192_v17  ;;  %v2784_v20 = vpop.f32.mrb[50].mxu1 }
 0x509   : > { %2273 = vst [vmem:[#allocation12 + $0x90] sm:$0xff] %v2201_v16  ;;  %v2204_v21 = vadd.f32 %v2784_v20, %v3905_v48  ;;  %v2195_v22 = vpop.f32.mrb[51].mxu1 }
 0x50a   : > { %2271 = vst [vmem:[#allocation12 + $0x80] sm:$0xff] %v2193_v19  ;;  %v2196_v23 = vadd.f32 %v3905_v48, %v2195_v22 }
 0x50b   : > { %2274 = vst [vmem:[#allocation12 + $0x98] sm:$0xff] %v2204_v21 }
 0x50c   : > { %2272 = vst [vmem:[#allocation12 + $0x88] sm:$0xff] %v2196_v23 }
 0x516   : > { %v2787_v24 = vpop.f32.mrb[52].mxu1 }
 0x517   : > { %v2217_v26 = vadd.f32 %v2787_v24, %v3905_v48  ;;  %v2208_v27 = vpop.f32.mrb[53].mxu1 }
 0x518   : > { %v2209_v28 = vadd.f32 %v3905_v48, %v2208_v27  ;;  %v2788_v29 = vpop.f32.mrb[54].mxu1 }
 0x519   : > { %2277 = vst [vmem:[#allocation12 + $0xb0] sm:$0xff] %v2217_v26  ;;  %v2220_v30 = vadd.f32 %v2788_v29, %v3905_v48  ;;  %v2211_v31 = vpop.f32.mrb[55].mxu1 }
 0x51a   : > { %2275 = vst [vmem:[#allocation12 + $0xa0] sm:$0xff] %v2209_v28  ;;  %v2212_v33 = vadd.f32 %v3905_v48, %v2211_v31 }
 0x51b   : > { %2278 = vst [vmem:[#allocation12 + $0xb8] sm:$0xff] %v2220_v30 }
 0x51c   : > { %2276 = vst [vmem:[#allocation12 + $0xa8] sm:$0xff] %v2212_v33 }
 0x526   : > { %v2791_v34 = vpop.f32.mrb[56].mxu1 }
 0x527   : > { %v2233_v35 = vadd.f32 %v2791_v34, %v3905_v48  ;;  %v2224_v36 = vpop.f32.mrb[57].mxu1 }
 0x528   : > { %v2225_v37 = vadd.f32 %v3905_v48, %v2224_v36  ;;  %v2792_v38 = vpop.f32.mrb[58].mxu1 }
 0x529   : > { %2281 = vst [vmem:[#allocation12 + $0xd0] sm:$0xff] %v2233_v35  ;;  %v2236_v39 = vadd.f32 %v2792_v38, %v3905_v48  ;;  %v2227_v18 = vpop.f32.mrb[59].mxu1 }
 0x52a   : > { %2279 = vst [vmem:[#allocation12 + $0xc0] sm:$0xff] %v2225_v37  ;;  %v2228_v40 = vadd.f32 %v3905_v48, %v2227_v18 }
 0x52b   : > { %2282 = vst [vmem:[#allocation12 + $0xd8] sm:$0xff] %v2236_v39 }
 0x52c   : > { %2280 = vst [vmem:[#allocation12 + $0xc8] sm:$0xff] %v2228_v40 }
 0x536   : > { %v2795_v41 = vpop.f32.mrb[60].mxu1 }
 0x537   : > { %v2249_v42 = vadd.f32 %v2795_v41, %v3905_v48  ;;  %v2240_v43 = vpop.f32.mrb[61].mxu1 }
 0x538   : > { %v2241_v44 = vadd.f32 %v3905_v48, %v2240_v43  ;;  %v2796_v45 = vpop.f32.mrb[62].mxu1 }
 0x539   : > { %2285 = vst [vmem:[#allocation12 + $0xf0] sm:$0xff] %v2249_v42  ;;  %v2252_v46 = vadd.f32 %v2796_v45, %v3905_v48  ;;  %v2243_v47 = vpop.f32.mrb[63].mxu1 }
 0x53a   : > { %2283 = vst [vmem:[#allocation12 + $0xe0] sm:$0xff] %v2241_v44  ;;  %v2244_v49 = vadd.f32 %v3905_v48, %v2243_v47 }
 0x53b   : > { %2286 = vst [vmem:[#allocation12 + $0xf8] sm:$0xff] %v2252_v46 }
 0x53c   : > { %2284 = vst [vmem:[#allocation12 + $0xe8] sm:$0xff] %v2244_v49 }
 0x53d PF: > { %p2873_p7 = scmp.eq.s32.totalorder %s3394_s15, 1  ;;  %s3312_s29 = smov [#allocation12]  }
 0x53e   : > { %s2296_s26 = sshll.u32 %s3312_s29, 4  ;;  %s2297_s26 = int_to_ptr.vmem [resolvable:$true] %s2296_s26 }
 0x53f   : > { %s3207_s27 = scalar_lea.vmem %s2297_s26, 4096  ;;  %p3214_p1 = scmp.lt.s32.totalorder %s2297_s26, %s2297_s26 }
 0x540   : > { %p3208_p9 = scmp.ne.s32.totalorder %s2297_s26, %s3207_s27  ;;  %p3215_p3 = scmp.lt.s32.totalorder %s3207_s27, %s3207_s27 }
 0x542   : > { %p3209_p5 = pnand %p3208_p9, %p2873_p7  ;;  %p3216_p2 = por %p3215_p3, %p3214_p1 }
 0x544   : > { %p3210_p10 = pneg %p3209_p5 }
 0x546   : > { %p3217_p13 = pnand %p3216_p2, %p3210_p10 }
 0x548   : > { %3220 = shalt.err (!%p3217_p13)
}
 0x549   : > { %s4019_s21 = sld [smem:[#allocation23_spill]] }
 0x54f   : > { %s3221_s19 = scalar_lea.hbm %s4019_s21, 4096 }
 0x550   : > { %p3222_p0 = scmp.ne.s32.totalorder %s4019_s21, %s3221_s19  ;;  %p3227_p11 = scmp.lt.u32.totalorder %s3221_s19, %s4019_s21 }
 0x552   : > { %p3223_p6 = pnand %p3222_p0, %p2873_p7 }
 0x554   : > { %p3224_p8 = pneg %p3223_p6 }
 0x556   : > { %p3229_p12 = pnand %p3227_p11, %p3224_p8 }
 0x558   : > { %3232 = shalt.err (!%p3229_p12)
}
 0x559   : > { %s3313_s17 = smov 128   ;;  %s3314_s18 = smov 8  }
 0x55a   : > { %2846 = dma.vmem_to_hbm [thread:$0]  (%p2873_p7), %s2297_s26, 4096, %s4019_s21, [#allocation5], %s3313_s17, %s3313_s17, %s3314_s18  }
 0x55b   : > { %3274 = dma.done.wait (%p2873_p7), [#allocation5], 4096  }
 0x55c   : > { %3276 = vsyncadd (%p2873_p7), [#allocation5], 4294963200 }
 0x55d PF: > { %s27_s14 = sadd.s32 1, %s3299_s14   ;;  %s4020_s8 = smov %s4027_s30 }
 0x55e   : > { %p24_p4 = scmp.ge.s32.totalorder %s27_s14, 4   ;;  %s4021_s30 = smov %s3283_s10 }
 0x55f   : > { %s4022_s10 = smov %s3287_s11  ;;  %s4023_s11 = smov %s3530_s25 }
 0x560   : > { %s4024_s12 = smov %s3295_s13  ;;  %s4025_s13 = smov %s4020_s8 }
 0x561   :  { %26 = sbr.rel (!%p24_p4) target bundleno = 15 (0xf), region = 127 }
 0x568   :  { %2312 = vsyncpa [#allocation4], 1 }
 0x569   :  { %2314 = vsyncpa [#allocation4 + $0x1], 1 }
 0x56a   :  { %2315 = vsyncpa [#allocation7], 1 }
 0x56b   :  { %2317 = vsyncpa [#allocation7 + $0x1], 1 }
 0x56c   :  { %2318 = vsyncpa [#allocation10], 1 }
 0x56d   :  { %2319 = vsyncpa [#allocation5], 1 }
 0x56e   :  { %2321 = vsyncpa [#allocation5 + $0x1], 1 }

// kernel: tpu_custom_call.1
= control target key start
LH: loop header
LB: loop body
LE: loop exit
PB: predicated region body
PF: predicated region fallthrough
CT: control target
= control target key end

     0   :  { %s3980_s0 = inlined_call_operand.hbm [shape: bf16[256,512], index: 0, kind: input, shape index: {}]   ;;  %s3981_s1 = inlined_call_operand.hbm [shape: bf16[512,256], index: 1, kind: input, shape index: {}]   ;;  %s3982_s2 = inlined_call_operand.vmem [shape: f32[1,256], index: 2, kind: input, shape index: {}]   ;;  %s3983_s3 = inlined_call_operand.hbm [shape: bf16[256,128], index: 3, kind: input, shape index: {}]   ;;  %s3984_s4 = inlined_call_operand.vmem [shape: f32[1,128], index: 4, kind: input, shape index: {}]   ;;  %s3985_s5 = inlined_call_operand.hbm [shape: bf16[128,128], index: 5, kind: input, shape index: {}]   ;;  %s3986_s6 = inlined_call_operand.vmem [shape: f32[1,128], index: 6, kind: input, shape index: {}]   ;;  %s3987_s7 = inlined_call_operand.hbm [shape: bf16[128,128], index: 7, kind: input, shape index: {}]   ;;  %s3988_s8 = inlined_call_operand.vmem [shape: f32[1,128], index: 8, kind: input, shape index: {}]   ;;  %s3989_s9 = inlined_call_operand.hbm [shape: f32[256,128], index: 9, kind: output, shape index: {}]  }
   0x1   :  { %3995 = sst [smem:[#allocation18_spill]] %s3980_s0 }
   0x2   :  { %3996 = sst [smem:[#allocation19_spill]] %s3983_s3 }
   0x3   :  { %3997 = sst [smem:[#allocation20_spill]] %s3985_s5 }
   0x4   :  { %3998 = sst [smem:[#allocation21_spill]] %s3986_s6 }
   0x5   :  { %3999 = sst [smem:[#allocation22_spill]] %s3988_s8 }
   0x6   :  { %4000 = sst [smem:[#allocation23_spill]] %s3989_s9 }
   0x7   :  { %14 = vsyncpa [#allocation4], 0 }
   0x8   :  { %16 = vsyncpa [#allocation4 + $0x1], 0 }
   0x9   :  { %17 = vsyncpa [#allocation7], 0 }
   0xa   :  { %19 = vsyncpa [#allocation7 + $0x1], 0 }
   0xb   :  { %20 = vsyncpa [#allocation10], 0 }
   0xc   :  { %21 = vsyncpa [#allocation5], 0  ;;  %s3365_s30 = smov 0   ;;  %s3367_s10 = smov 0  }
   0xd   :  { %s3369_s11 = smov 0   ;;  %s3371_s12 = smov 0  }
   0xe   :  { %s3373_s13 = smov 0   ;;  %s3375_s14 = smov 0  }
   0xf LB: > { %s3394_s15 = sadd.s32 4294967295, %s3299_s14   ;;  %p55_p0 = scmp.ne.s32.totalorder %s3287_s11, %s3283_s10  ;;  %s3299_s14 = sphi %s3375_s14, %s27_s14   ;;  %s3295_s13 = sphi %s3373_s13, %s4025_s13   ;;  %s3291_s12 = sphi %s3371_s12, %s4024_s12   ;;  %s3287_s11 = sphi %s3369_s11, %s4023_s11   ;;  %s3283_s10 = sphi %s3367_s10, %s4022_s10   ;;  %s3279_s30 = sphi %s3365_s30, %s4021_s30  }
  0x10   : > { %p56_p1 = scmp.eq.s32.totalorder %s3299_s14, 0  ;;  %p61_p2 = scmp.ne.s32.totalorder %s3283_s10, %s3279_s30 }
  0x11   : > { %p3990_p3 = scmp.eq.s32.totalorder %s3394_s15, 0  ;;  %p2415_p5 = scmp.ge.s32.totalorder %s3299_s14, 1 }
  0x12   : > { %p57_p4 = por %p56_p1, %p55_p0  ;;  %p271_p7 = scmp.lt.s32.totalorder %s3299_s14, 3 }
  0x13   : > { %p3405_p6 = por %p3990_p3, %p61_p2  ;;  %s3301_s19 = smov [#allocation8]  }
  0x14   : > { %p3410_p8 = pnand %p2415_p5, %p271_p7  ;;  %s286_s20 = sshll.u32 %s3301_s19, 4  ;;  %s3414_s20 = int_to_ptr.vmem [resolvable:$true] %s286_s20 }
  0x15   : > { %s4001_s17 = scalar_select %p3405_p6, 1, 0 }
  0x16   : > { %s4002_s18 = scalar_select %p3410_p8, 1, 0 }
  0x17   : > { %p2849_p9 = pneg %p3410_p8  ;;  %p2869_p10 = scmp.lt.s32.totalorder %s3299_s14, 2 }
  0x18   : > { %s3302_s23 = smov [#allocation9]   ;;  %s4005_s3 = sld [smem:[#allocation19_spill]] }
  0x19   : > { %p3421_p11 = pnand %p2849_p9, %p3990_p3  ;;  %p3425_p12 = pnand %p2869_p10, %p57_p4 }
  0x1a   : > { %s302_s24 = sshll.u32 %s3302_s23, 4  ;;  %s3429_s24 = int_to_ptr.vmem [resolvable:$true] %s302_s24 }
  0x1b   : > { %s4004_s22 = scalar_select %p3425_p12, 1, 0 }
  0x1c   : > { %p3439_p0 = pneg %p3421_p11 }
  0x1e   : > { %s3063_s27 = scalar_lea.hbm %s4005_s3, 2048 }
  0x1f   : > { %p3064_p13 = scmp.ne.s32.totalorder %s4005_s3, %s3063_s27  ;;  %p3070_p4 = scmp.lt.u32.totalorder %s3063_s27, %s4005_s3 }
  0x21   : > { %p3066_p1 = pnand %p3439_p0, %p3064_p13 }
  0x23   : > { %p3067_p2 = pneg %p3066_p1 }
  0x25   : > { %p3072_p5 = pnand %p3070_p4, %p3067_p2 }
  0x27   : > { %3075 = shalt.err (!%p3072_p5)
}
  0x28   : > { %s3076_s25 = scalar_lea.vmem %s3414_s20, 2048  ;;  %p3084_p3 = scmp.lt.s32.totalorder %s3414_s20, %s3414_s20 }
  0x29   : > { %p3077_p7 = scmp.ne.s32.totalorder %s3414_s20, %s3076_s25  ;;  %p3085_p6 = scmp.lt.s32.totalorder %s3076_s25, %s3076_s25 }
  0x2b   : > { %p3079_p9 = pnand %p3077_p7, %p3439_p0  ;;  %p3086_p13 = por %p3085_p6, %p3084_p3 }
  0x2d   : > { %p3080_p10 = pneg %p3079_p9 }
  0x2f   : > { %p3087_p1 = pnand %p3086_p13, %p3080_p10 }
  0x31   : > { %3090 = shalt.err (!%p3087_p1)
}
  0x32   : > { %s3303_s26 = smov 64   ;;  %s3304_s27 = smov 4  }
  0x33   : > { %2852 = dma.hbm_to_vmem [thread:$0]  (!%p3421_p11), %s4005_s3, 2048, %s3414_s20, [#allocation7], %s3303_s26, %s3303_s26, %s3304_s27  }
  0x34   : > { %s4007_s5 = sld [smem:[#allocation20_spill]] }
  0x3a   : > { %s3091_s25 = scalar_lea.hbm %s4007_s5, 1024 }
  0x3b   : > { %p3092_p3 = scmp.ne.s32.totalorder %s4007_s5, %s3091_s25  ;;  %p3098_p4 = scmp.lt.u32.totalorder %s3091_s25, %s4007_s5 }
  0x3d   : > { %p3094_p6 = pnand %p3092_p3, %p3439_p0 }
  0x3f   : > { %p3095_p2 = pneg %p3094_p6 }
  0x41   : > { %p3100_p5 = pnand %p3098_p4, %p3095_p2 }
  0x43   : > { %3103 = shalt.err (!%p3100_p5)
}
  0x44   : > { %s3104_s20 = scalar_lea.vmem %s3429_s24, 1024  ;;  %p3112_p13 = scmp.lt.s32.totalorder %s3429_s24, %s3429_s24 }
  0x45   : > { %p3105_p7 = scmp.ne.s32.totalorder %s3429_s24, %s3104_s20  ;;  %p3113_p1 = scmp.lt.s32.totalorder %s3104_s20, %s3104_s20 }
  0x47   : > { %p3107_p9 = pnand %p3105_p7, %p3439_p0  ;;  %p3114_p3 = por %p3113_p1, %p3112_p13 }
  0x49   : > { %p3108_p10 = pneg %p3107_p9 }
  0x4b   : > { %p3115_p6 = pnand %p3114_p3, %p3108_p10 }
  0x4d   : > { %3118 = shalt.err (!%p3115_p6)
}
  0x4e   : > { %2855 = dma.hbm_to_vmem [thread:$0]  (!%p3421_p11), %s4007_s5, 1024, %s3429_s24, [#allocation10], %s3303_s26, %s3303_s26, %s3304_s27  }
  0x4f   : > { %s3305_s9 = smov [#allocation11]   ;;  %s3119_s19 = scalar_lea.hbm %s3987_s7, 1024 }
  0x50   : > { %s318_s16 = sshll.u32 %s3305_s9, 4  ;;  %p3120_p2 = scmp.ne.s32.totalorder %s3987_s7, %s3119_s19  ;;  %s319_s16 = int_to_ptr.vmem [resolvable:$true] %s318_s16 }
  0x51   : > { %p3126_p7 = scmp.lt.u32.totalorder %s3119_s19, %s3987_s7 }
  0x52   : > { %p3122_p4 = pnand %p3120_p2, %p3439_p0 }
  0x54   : > { %p3123_p5 = pneg %p3122_p4 }
  0x56   : > { %p3128_p9 = pnand %p3126_p7, %p3123_p5 }
  0x58   : > { %3131 = shalt.err (!%p3128_p9)
}
  0x59   : > { %s3132_s24 = scalar_lea.vmem %s319_s16, 1024  ;;  %p3140_p3 = scmp.lt.s32.totalorder %s319_s16, %s319_s16 }
  0x5a   : > { %p3133_p10 = scmp.ne.s32.totalorder %s319_s16, %s3132_s24  ;;  %p3141_p6 = scmp.lt.s32.totalorder %s3132_s24, %s3132_s24 }
  0x5c   : > { %p3135_p13 = pnand %p3133_p10, %p3439_p0  ;;  %p3142_p8 = por %p3141_p6, %p3140_p3 }
  0x5e   : > { %p3136_p1 = pneg %p3135_p13 }
  0x60   : > { %p3143_p12 = pnand %p3142_p8, %p3136_p1 }
  0x62   : > { %3146 = shalt.err (!%p3143_p12)
}
  0x63   : > { %2858 = dma.hbm_to_vmem [thread:$0]  (!%p3421_p11), %s3987_s7, 1024, %s319_s16, [#allocation10], %s3303_s26, %s3303_s26, %s3304_s27  }
  0x64   : > { %s36_s30 = sadd.s32 1, %s3295_s13  ;;  %s335_s8 = sand.u32 1, %s3287_s11  }
  0x65   : > { %p37_p8 = scmp.ge.s32.totalorder %s36_s30, 2  ;;  %s3512_s21 = sshll.u32 %s335_s8, 8 }
  0x66   : > { %s2538_s9 = sshll.u32 %s3295_s13, 7  ;;  %s4008_s0 = sld [smem:[#allocation18_spill]] }
  0x67   : > { %s4027_s30 = smov (%p37_p8, %s36_s30), 0  ;;  %s339_s27 = scalar_lea.vmem [#allocation3], %s3512_s21 }
  0x68   : > { %s44_s26 = ssub.s32 %s3295_s13, %s4027_s30  ;;  %s349_s16 = sshll.u32 %s339_s27, 4  ;;  %s3525_s16 = int_to_ptr.vmem [resolvable:$true] %s349_s16 }
  0x69   : > { %p46_p11 = scmp.eq.s32.totalorder %s44_s26, 0  ;;  %s4009_s23 = sadd.s32 1, %s3287_s11 }
  0x6a   : > { %s359_s20 = sand.u32 1, %s3299_s14   ;;  %s3533_s24 = scalar_lea.sflag [#allocation4], %s335_s8 }
  0x6b   : > { %s3530_s25 = scalar_select %p46_p11, %s3287_s11, %s4009_s23  }
  0x6c   : > { %s3520_s19 = scalar_lea.hbm %s4008_s0, %s2538_s9  ;;  %p4010_p0 = scmp.ne.s32.totalorder %s4004_s22, 0 }
  0x6d   : > { %s3147_s3 = scalar_lea.hbm %s3520_s19, 4096  ;;  %s3152_s28 = scalar_lea.hbm %s4008_s0, 8192 }
  0x6e   : > { %p3148_p12 = scmp.ne.s32.totalorder %s3520_s19, %s3147_s3  ;;  %p3149_p2 = pneg %p4010_p0 }
  0x6f   : > { %p3153_p7 = scmp.lt.u32.totalorder %s3520_s19, %s4008_s0  ;;  %p3154_p9 = scmp.lt.u32.totalorder %s3152_s28, %s3147_s3 }
  0x70   : > { %p3150_p4 = pnand %p3149_p2, %p3148_p12  ;;  %p3156_p13 = scmp.lt.u32.totalorder %s3147_s3, %s3520_s19 }
  0x71   : > { %p3155_p10 = por %p3154_p9, %p3153_p7 }
  0x72   : > { %p3151_p5 = pneg %p3150_p4 }
  0x73   : > { %p3157_p1 = por %p3156_p13, %p3155_p10 }
  0x75   : > { %p3158_p3 = pnand %p3157_p1, %p3151_p5 }
  0x77   : > { %3161 = shalt.err (!%p3158_p3)
}
  0x78   : > { %s3162_s8 = scalar_lea.vmem %s3525_s16, 4096  ;;  %s3306_s27 = smov [#allocation3]  }
  0x79   : > { %p3163_p6 = scmp.ne.s32.totalorder %s3525_s16, %s3162_s8  ;;  %s3167_s23 = sshll.u32 %s3306_s27, 4  ;;  %s3168_s23 = int_to_ptr.vmem [resolvable:$false] %s3167_s23 }
  0x7a   : > { %s3169_s6 = scalar_lea.vmem %s3168_s23, 8192  ;;  %p3170_p12 = scmp.lt.s32.totalorder %s3525_s16, %s3168_s23 }
  0x7b   : > { %p3165_p8 = pnand %p3163_p6, %p3149_p2  ;;  %p3171_p4 = scmp.lt.s32.totalorder %s3169_s6, %s3162_s8 }
  0x7d   : > { %p3166_p11 = pneg %p3165_p8  ;;  %p3172_p7 = por %p3171_p4, %p3170_p12 }
  0x7f   : > { %p3173_p9 = pnand %p3172_p7, %p3166_p11 }
  0x81   : > { %3176 = shalt.err (!%p3173_p9)
}
  0x82   : > { %s3307_s3 = smov 256   ;;  %s3308_s9 = smov 128  }
  0x83   : > { %s3309_s28 = smov 8   ;;  %s2540_s29 = sshll.u32 %s3295_s13, 12 }
  0x84   : > { %2862 = dma.hbm_to_vmem [thread:$0]  (!%p4010_p0), %s3520_s19, 4096, %s3525_s16, %s3533_s24, %s3307_s3, %s3308_s9, %s3309_s28  }
  0x85   : > { %s363_s26 = scalar_lea.vmem [#allocation6], %s3512_s21  ;;  %s3568_s6 = scalar_lea.hbm %s3981_s1, %s2540_s29 }
  0x86   : > { %s371_s8 = sshll.u32 %s363_s26, 4  ;;  %s3574_s0 = scalar_lea.sflag [#allocation7], %s359_s20  ;;  %s3570_s8 = int_to_ptr.vmem [resolvable:$true] %s371_s8 }
  0x87   : > { %s3177_s5 = scalar_lea.hbm %s3568_s6, 4096  ;;  %s3182_s16 = scalar_lea.hbm %s3981_s1, 8192 }
  0x88   : > { %p3178_p5 = scmp.ne.s32.totalorder %s3568_s6, %s3177_s5  ;;  %p3183_p1 = scmp.lt.u32.totalorder %s3568_s6, %s3981_s1 }
  0x89   : > { %p3184_p3 = scmp.lt.u32.totalorder %s3182_s16, %s3177_s5  ;;  %p3186_p8 = scmp.lt.u32.totalorder %s3177_s5, %s3568_s6 }
  0x8a   : > { %p3180_p10 = pnand %p3178_p5, %p3149_p2 }
  0x8b   : > { %p3185_p6 = por %p3184_p3, %p3183_p1 }
  0x8c   : > { %p3181_p13 = pneg %p3180_p10 }
  0x8d   : > { %p3187_p11 = por %p3186_p8, %p3185_p6 }
  0x8f   : > { %p3188_p12 = pnand %p3187_p11, %p3181_p13 }
  0x91   : > { %3191 = shalt.err (!%p3188_p12)
}
  0x92   : > { %s3192_s20 = scalar_lea.vmem %s3570_s8, 4096  ;;  %s3310_s29 = smov [#allocation6]  }
  0x93   : > { %p3193_p4 = scmp.ne.s32.totalorder %s3570_s8, %s3192_s20  ;;  %s3197_s26 = sshll.u32 %s3310_s29, 4  ;;  %s3198_s26 = int_to_ptr.vmem [resolvable:$false] %s3197_s26 }
  0x94   : > { %s3199_s27 = scalar_lea.vmem %s3198_s26, 8192  ;;  %p3200_p5 = scmp.lt.s32.totalorder %s3570_s8, %s3198_s26 }
  0x95   : > { %p3195_p7 = pnand %p3193_p4, %p3149_p2  ;;  %p3201_p10 = scmp.lt.s32.totalorder %s3199_s27, %s3192_s20 }
  0x97   : > { %p3196_p9 = pneg %p3195_p7  ;;  %p3202_p1 = por %p3201_p10, %p3200_p5 }
  0x99   : > { %p3203_p3 = pnand %p3202_p1, %p3196_p9 }
  0x9b   : > { %3206 = shalt.err (!%p3203_p3)
}
  0x9c   : > { %2865 = dma.hbm_to_vmem [thread:$0]  (!%p4010_p0), %s3568_s6, 4096, %s3570_s8, %s3574_s0, %s3308_s9, %s3308_s9, %s3309_s28  }
  0x9d   : > { %p4011_p2 = scmp.ne.s32.totalorder %s4002_s18, 0 }
  0x9e   : > { %s385_s5 = sand.u32 (!%p4011_p2), 1, %s3283_s10   ;;  %p4012_p13 = scmp.ne.s32.totalorder (!%p4011_p2), %s4001_s17, 0 }
  0x9f   : > { %383 = sbr.rel (%p4011_p2) target bundleno = 1373 (0x55d), region = 56  ;;  %s2428_s23 = sshll.u32 (!%p4011_p2), %s385_s5, 8 }
  0xa0   : > { %s386_s21 = scalar_lea.sflag (!%p4011_p2), [#allocation4], %s385_s5  ;;  %s3606_s19 = scalar_lea.vmem (!%p4011_p2), [#allocation3], %s2428_s23 }
  0xa6   : > { %3258 = dma.done.wait (%p4012_p13), %s386_s21, 4096  }
  0xa7   : > { %3260 = vsyncadd (%p4012_p13), %s386_s21, 4294963200  ;;  %s394_s22 = sand.u32 1, %s3394_s15   ;;  %s3613_s0 = scalar_lea.vmem [#allocation6], %s2428_s23 }
  0xa8   : > { %s395_s16 = scalar_lea.sflag [#allocation7], %s394_s22 }
  0xa9   : > { %3262 = dma.done.wait (%p4012_p13), %s395_s16, 4096  }
  0xaa   : > { %3264 = vsyncadd (%p4012_p13), %s395_s16, 4294963200  ;;  %p4013_p0 = scmp.eq.s32.totalorder %s3394_s15, 0 }
  0xac   : > { %3266 = dma.done.wait (%p4013_p0), [#allocation7], 2048   ;;  %p4014_p6 = pmov %p4013_p0 }
  0xad   : > { %p4015_p8 = pmov %p4013_p0 }
  0xae   : > { %3268 = vsyncadd (%p4014_p6), [#allocation7], 4294965248 }
  0xaf   : > { %3270 = dma.done.wait (%p4015_p8), [#allocation10], 2048   ;;  %p4016_p11 = pmov %p4013_p0 }
  0xb0   : > { %p2433_p12 = scmp.ne.s32.totalorder %s3291_s12, 0 }
  0xb1   : > { %3272 = vsyncadd (%p4016_p11), [#allocation10], 4294965248  ;;  %v3311_v0 = vmov (!%p2433_p12), 0.0  }
  0xb2   : > { %453 = sbr.rel (%p2433_p12) target bundleno = 210 (0xd2), region = 80  ;;  %454 = vst [vmem:[#allocation2] sm:$0xff] (!%p2433_p12), %v3311_v0  ;;  %455 = vst [vmem:[#allocation2 + $0x8] sm:$0xff] (!%p2433_p12), %v3311_v0 }
  0xb3   : > { %456 = vst [vmem:[#allocation2 + $0x10] sm:$0xff] (!%p2433_p12), %v3311_v0  ;;  %457 = vst [vmem:[#allocation2 + $0x18] sm:$0xff] (!%p2433_p12), %v3311_v0 }
  0xb4   : > { %458 = vst [vmem:[#allocation2 + $0x20] sm:$0xff] (!%p2433_p12), %v3311_v0  ;;  %459 = vst [vmem:[#allocation2 + $0x28] sm:$0xff] (!%p2433_p12), %v3311_v0 }
  0xb5   : > { %460 = vst [vmem:[#allocation2 + $0x30] sm:$0xff] (!%p2433_p12), %v3311_v0  ;;  %461 = vst [vmem:[#allocation2 + $0x38] sm:$0xff] (!%p2433_p12), %v3311_v0 }
  0xb6   : > { %462 = vst [vmem:[#allocation2 + $0x40] sm:$0xff] (!%p2433_p12), %v3311_v0  ;;  %463 = vst [vmem:[#allocation2 + $0x48] sm:$0xff] (!%p2433_p12), %v3311_v0 }
  0xb7   : > { %464 = vst [vmem:[#allocation2 + $0x50] sm:$0xff] (!%p2433_p12), %v3311_v0  ;;  %465 = vst [vmem:[#allocation2 + $0x58] sm:$0xff] (!%p2433_p12), %v3311_v0 }
  0xb8   : > { %466 = vst [vmem:[#allocation2 + $0x60] sm:$0xff] (!%p2433_p12), %v3311_v0  ;;  %467 = vst [vmem:[#allocation2 + $0x68] sm:$0xff] (!%p2433_p12), %v3311_v0 }
  0xb9   : > { %468 = vst [vmem:[#allocation2 + $0x70] sm:$0xff] %v3311_v0  ;;  %469 = vst [vmem:[#allocation2 + $0x78] sm:$0xff] %v3311_v0 }
  0xba   : > { %470 = vst [vmem:[#allocation2 + $0x80] sm:$0xff] %v3311_v0  ;;  %471 = vst [vmem:[#allocation2 + $0x88] sm:$0xff] %v3311_v0 }
  0xbb   : > { %472 = vst [vmem:[#allocation2 + $0x90] sm:$0xff] %v3311_v0  ;;  %473 = vst [vmem:[#allocation2 + $0x98] sm:$0xff] %v3311_v0 }
  0xbc   : > { %474 = vst [vmem:[#allocation2 + $0xa0] sm:$0xff] %v3311_v0  ;;  %475 = vst [vmem:[#allocation2 + $0xa8] sm:$0xff] %v3311_v0 }
  0xbd   : > { %476 = vst [vmem:[#allocation2 + $0xb0] sm:$0xff] %v3311_v0  ;;  %477 = vst [vmem:[#allocation2 + $0xb8] sm:$0xff] %v3311_v0 }
  0xbe   : > { %478 = vst [vmem:[#allocation2 + $0xc0] sm:$0xff] %v3311_v0  ;;  %479 = vst [vmem:[#allocation2 + $0xc8] sm:$0xff] %v3311_v0 }
  0xbf   : > { %480 = vst [vmem:[#allocation2 + $0xd0] sm:$0xff] %v3311_v0  ;;  %481 = vst [vmem:[#allocation2 + $0xd8] sm:$0xff] %v3311_v0 }
  0xc0   : > { %482 = vst [vmem:[#allocation2 + $0xe0] sm:$0xff] %v3311_v0  ;;  %483 = vst [vmem:[#allocation2 + $0xe8] sm:$0xff] %v3311_v0 }
  0xc1   : > { %484 = vst [vmem:[#allocation2 + $0xf0] sm:$0xff] %v3311_v0  ;;  %485 = vst [vmem:[#allocation2 + $0xf8] sm:$0xff] %v3311_v0 }
  0xc2   : > { %486 = vst [vmem:[#allocation2 + $0x100] sm:$0xff] %v3311_v0  ;;  %487 = vst [vmem:[#allocation2 + $0x108] sm:$0xff] %v3311_v0 }
  0xc3   : > { %488 = vst [vmem:[#allocation2 + $0x110] sm:$0xff] %v3311_v0  ;;  %489 = vst [vmem:[#allocation2 + $0x118] sm:$0xff] %v3311_v0 }
  0xc4   : > { %490 = vst [vmem:[#allocation2 + $0x120] sm:$0xff] %v3311_v0  ;;  %491 = vst [vmem:[#allocation2 + $0x128] sm:$0xff] %v3311_v0 }
  0xc5   : > { %492 = vst [vmem:[#allocation2 + $0x130] sm:$0xff] %v3311_v0  ;;  %493 = vst [vmem:[#allocation2 + $0x138] sm:$0xff] %v3311_v0 }
  0xc6   : > { %494 = vst [vmem:[#allocation2 + $0x140] sm:$0xff] %v3311_v0  ;;  %495 = vst [vmem:[#allocation2 + $0x148] sm:$0xff] %v3311_v0 }
  0xc7   : > { %496 = vst [vmem:[#allocation2 + $0x150] sm:$0xff] %v3311_v0  ;;  %497 = vst [vmem:[#allocation2 + $0x158] sm:$0xff] %v3311_v0 }
  0xc8   : > { %498 = vst [vmem:[#allocation2 + $0x160] sm:$0xff] %v3311_v0  ;;  %499 = vst [vmem:[#allocation2 + $0x168] sm:$0xff] %v3311_v0 }
  0xc9   : > { %500 = vst [vmem:[#allocation2 + $0x170] sm:$0xff] %v3311_v0  ;;  %501 = vst [vmem:[#allocation2 + $0x178] sm:$0xff] %v3311_v0 }
  0xca   : > { %502 = vst [vmem:[#allocation2 + $0x180] sm:$0xff] %v3311_v0  ;;  %503 = vst [vmem:[#allocation2 + $0x188] sm:$0xff] %v3311_v0 }
  0xcb   : > { %504 = vst [vmem:[#allocation2 + $0x190] sm:$0xff] %v3311_v0  ;;  %505 = vst [vmem:[#allocation2 + $0x198] sm:$0xff] %v3311_v0 }
  0xcc   : > { %506 = vst [vmem:[#allocation2 + $0x1a0] sm:$0xff] %v3311_v0  ;;  %507 = vst [vmem:[#allocation2 + $0x1a8] sm:$0xff] %v3311_v0 }
  0xcd   : > { %508 = vst [vmem:[#allocation2 + $0x1b0] sm:$0xff] %v3311_v0  ;;  %509 = vst [vmem:[#allocation2 + $0x1b8] sm:$0xff] %v3311_v0 }
  0xce   : > { %510 = vst [vmem:[#allocation2 + $0x1c0] sm:$0xff] %v3311_v0  ;;  %511 = vst [vmem:[#allocation2 + $0x1c8] sm:$0xff] %v3311_v0 }
  0xcf   : > { %512 = vst [vmem:[#allocation2 + $0x1d0] sm:$0xff] %v3311_v0  ;;  %513 = vst [vmem:[#allocation2 + $0x1d8] sm:$0xff] %v3311_v0 }
  0xd0   : > { %514 = vst [vmem:[#allocation2 + $0x1e0] sm:$0xff] %v3311_v0  ;;  %515 = vst [vmem:[#allocation2 + $0x1e8] sm:$0xff] %v3311_v0 }
  0xd1   : > { %516 = vst [vmem:[#allocation2 + $0x1f0] sm:$0xff] %v3311_v0  ;;  %517 = vst [vmem:[#allocation2 + $0x1f8] sm:$0xff] %v3311_v0 }
  0xd2 PF: > { %v2935_v1 = vld [vmem:[%s3613_s0 + $0x4] ss:$8 sps:$4 sm:$0xff]   ;;  %v2937_v2 = vld [vmem:[%s3613_s0] ss:$8 sps:$4 sm:$0xff]   ;;  %v2938_v3 = vld [vmem:[%s3613_s0 + $0x14] ss:$8 sps:$4 sm:$0xff]  }
  0xd3   : > { %966 = vmatprep.subr.bf16.mxu0 %v2935_v1  ;;  %2797 = vmatprep.subr.bf16.mxu1 %v2935_v1  ;;  %v2940_v4 = vld [vmem:[%s3613_s0 + $0x10] ss:$8 sps:$4 sm:$0xff]   ;;  %v2941_v5 = vld [vmem:[%s3613_s0 + $0x24] ss:$8 sps:$4 sm:$0xff]   ;;  %v2943_v6 = vld [vmem:[%s3613_s0 + $0x20] ss:$8 sps:$4 sm:$0xff]  }
  0xd4   : > { %967 = vmatpush1.bf16.msra.mxu0 %v2937_v2  ;;  %2813 = vmatpush1.bf16.msra.mxu1 %v2937_v2  ;;  %v2944_v7 = vld [vmem:[%s3613_s0 + $0x34] ss:$8 sps:$4 sm:$0xff]   ;;  %v2946_v8 = vld [vmem:[%s3613_s0 + $0x30] ss:$8 sps:$4 sm:$0xff]   ;;  %v2947_v9 = vld [vmem:[%s3613_s0 + $0x44] ss:$8 sps:$4 sm:$0xff]  }
  0xd5   : > { %968 = vmatprep.subr.bf16.mxu0 %v2938_v3  ;;  %2798 = vmatprep.subr.bf16.mxu1 %v2938_v3  ;;  %v2949_v10 = vld [vmem:[%s3613_s0 + $0x40] ss:$8 sps:$4 sm:$0xff]   ;;  %v2950_v11 = vld [vmem:[%s3613_s0 + $0x54] ss:$8 sps:$4 sm:$0xff]   ;;  %v2952_v12 = vld [vmem:[%s3613_s0 + $0x50] ss:$8 sps:$4 sm:$0xff]  }
  0xd6   : > { %v2953_v13 = vld [vmem:[%s3613_s0 + $0x64] ss:$8 sps:$4 sm:$0xff]   ;;  %v2955_v15 = vld [vmem:[%s3613_s0 + $0x60] ss:$8 sps:$4 sm:$0xff]   ;;  %v2956_v17 = vld [vmem:[%s3613_s0 + $0x74] ss:$8 sps:$4 sm:$0xff]  }
  0xd7   : > { %v2985_v14 = vld [vmem:[%s3606_s19 + $0x4] ss:$8 sps:$4 sm:$0xff]   ;;  %v2958_v18 = vld [vmem:[%s3613_s0 + $0x70] ss:$8 sps:$4 sm:$0xff]   ;;  %v2961_v20 = vld [vmem:[%s3613_s0 + $0x80] ss:$8 sps:$4 sm:$0xff]  }
  0xd8   : > { %969 = vmatpush1.bf16.msra.mxu0 %v2940_v4  ;;  %2814 = vmatpush1.bf16.msra.mxu1 %v2940_v4  ;;  %v2988_v16 = vld [vmem:[%s3606_s19 + $0x84] ss:$8 sps:$4 sm:$0xff]   ;;  %v2962_v21 = vld [vmem:[%s3613_s0 + $0x94] ss:$8 sps:$4 sm:$0xff]   ;;  %v2964_v22 = vld [vmem:[%s3613_s0 + $0x90] ss:$8 sps:$4 sm:$0xff]  }
  0xd9   : > { %970 = vmatprep.subr.bf16.mxu0 %v2941_v5  ;;  %2799 = vmatprep.subr.bf16.mxu1 %v2941_v5  ;;  %v2959_v19 = vld [vmem:[%s3613_s0 + $0x84] ss:$8 sps:$4 sm:$0xff]   ;;  %v2967_v24 = vld [vmem:[%s3613_s0 + $0xa0] ss:$8 sps:$4 sm:$0xff]   ;;  %v2968_v25 = vld [vmem:[%s3613_s0 + $0xb4] ss:$8 sps:$4 sm:$0xff]  }
  0xda   : > { %998 = vmatprep.mubr.bf16.mxu0 %v2985_v14  ;;  %1078 = vmatprep.mubr.bf16.mxu1 %v2988_v16  ;;  %v2965_v23 = vld [vmem:[%s3613_s0 + $0xa4] ss:$8 sps:$4 sm:$0xff]   ;;  %v2970_v26 = vld [vmem:[%s3613_s0 + $0xb0] ss:$8 sps:$4 sm:$0xff]   ;;  %v2973_v28 = vld [vmem:[%s3613_s0 + $0xc0] ss:$8 sps:$4 sm:$0xff]  }
  0xdb   : > { %v2971_v27 = vld [vmem:[%s3613_s0 + $0xc4] ss:$8 sps:$4 sm:$0xff]   ;;  %v2974_v29 = vld [vmem:[%s3613_s0 + $0xd4] ss:$8 sps:$4 sm:$0xff]   ;;  %v2976_v30 = vld [vmem:[%s3613_s0 + $0xd0] ss:$8 sps:$4 sm:$0xff]  }
  0xdc   : > { %971 = vmatpush1.bf16.msra.mxu0 %v2943_v6  ;;  %2815 = vmatpush1.bf16.msra.mxu1 %v2943_v6  ;;  %v2977_v31 = vld [vmem:[%s3613_s0 + $0xe4] ss:$8 sps:$4 sm:$0xff]   ;;  %v2979_v32 = vld [vmem:[%s3613_s0 + $0xe0] ss:$8 sps:$4 sm:$0xff]   ;;  %v2980_v33 = vld [vmem:[%s3613_s0 + $0xf4] ss:$8 sps:$4 sm:$0xff]  }
  0xdd   : > { %972 = vmatprep.subr.bf16.mxu0 %v2944_v7  ;;  %2800 = vmatprep.subr.bf16.mxu1 %v2944_v7  ;;  %v2982_v34 = vld [vmem:[%s3613_s0 + $0xf0] ss:$8 sps:$4 sm:$0xff]   ;;  %v2983_v35 = vld [vmem:[%s3606_s19] ss:$8 sps:$4 sm:$0xff]   ;;  %v2989_v37 = vld [vmem:[%s3606_s19 + $0x14] ss:$8 sps:$4 sm:$0xff]  }
  0xde   : > { %v2986_v36 = vld [vmem:[%s3606_s19 + $0x80] ss:$8 sps:$4 sm:$0xff]   ;;  %v2991_v38 = vld [vmem:[%s3606_s19 + $0x94] ss:$8 sps:$4 sm:$0xff]   ;;  %v2993_v39 = vld [vmem:[%s3606_s19 + $0x10] ss:$8 sps:$4 sm:$0xff]  }
  0xdf   : > { %v2994_v40 = vld [vmem:[%s3606_s19 + $0x90] ss:$8 sps:$4 sm:$0xff]   ;;  %v2995_v41 = vld [vmem:[%s3606_s19 + $0x24] ss:$8 sps:$4 sm:$0xff]   ;;  %v2999_v43 = vld [vmem:[%s3606_s19 + $0x20] ss:$8 sps:$4 sm:$0xff]  }
  0xe0   : > { %973 = vmatpush1.bf16.msra.mxu0 %v2946_v8  ;;  %2816 = vmatpush1.bf16.msra.mxu1 %v2946_v8  ;;  %v2997_v42 = vld [vmem:[%s3606_s19 + $0xa4] ss:$8 sps:$4 sm:$0xff]   ;;  %v3000_v44 = vld [vmem:[%s3606_s19 + $0xa0] ss:$8 sps:$4 sm:$0xff]   ;;  %v3001_v45 = vld [vmem:[%s3606_s19 + $0x34] ss:$8 sps:$4 sm:$0xff]  }
  0xe1   : > { %974 = vmatprep.subr.bf16.mxu0 %v2947_v9  ;;  %2801 = vmatprep.subr.bf16.mxu1 %v2947_v9  ;;  %v3003_v46 = vld [vmem:[%s3606_s19 + $0xb4] ss:$8 sps:$4 sm:$0xff]   ;;  %v3005_v47 = vld [vmem:[%s3606_s19 + $0x30] ss:$8 sps:$4 sm:$0xff]   ;;  %v3007_v49 = vld [vmem:[%s3606_s19 + $0x44] ss:$8 sps:$4 sm:$0xff]  }
  0xe2   : > { %v3006_v48 = vld [vmem:[%s3606_s19 + $0xb0] ss:$8 sps:$4 sm:$0xff]   ;;  %v3009_v50 = vld [vmem:[%s3606_s19 + $0xc4] ss:$8 sps:$4 sm:$0xff]   ;;  %v3011_v51 = vld [vmem:[%s3606_s19 + $0x40] ss:$8 sps:$4 sm:$0xff]  }
  0xe3   : > { %v3012_v52 = vld [vmem:[%s3606_s19 + $0xc0] ss:$8 sps:$4 sm:$0xff]   ;;  %v3013_v53 = vld [vmem:[%s3606_s19 + $0x54] ss:$8 sps:$4 sm:$0xff]   ;;  %v3017_v55 = vld [vmem:[%s3606_s19 + $0x50] ss:$8 sps:$4 sm:$0xff]  }
  0xe4   : > { %975 = vmatpush1.bf16.msra.mxu0 %v2949_v10  ;;  %2817 = vmatpush1.bf16.msra.mxu1 %v2949_v10  ;;  %v3015_v54 = vld [vmem:[%s3606_s19 + $0xd4] ss:$8 sps:$4 sm:$0xff]   ;;  %v3018_v56 = vld [vmem:[%s3606_s19 + $0xd0] ss:$8 sps:$4 sm:$0xff]   ;;  %v3019_v57 = vld [vmem:[%s3606_s19 + $0x64] ss:$8 sps:$4 sm:$0xff]  }
  0xe5   : > { %976 = vmatprep.subr.bf16.mxu0 %v2950_v11  ;;  %2802 = vmatprep.subr.bf16.mxu1 %v2950_v11  ;;  %v3021_v58 = vld [vmem:[%s3606_s19 + $0xe4] ss:$8 sps:$4 sm:$0xff]   ;;  %v3023_v59 = vld [vmem:[%s3606_s19 + $0x60] ss:$8 sps:$4 sm:$0xff]   ;;  %v3025_v61 = vld [vmem:[%s3606_s19 + $0x74] ss:$8 sps:$4 sm:$0xff]  }
  0xe6   : > { %v3024_v60 = vld [vmem:[%s3606_s19 + $0xe0] ss:$8 sps:$4 sm:$0xff]   ;;  %v3027_v62 = vld [vmem:[%s3606_s19 + $0xf4] ss:$8 sps:$4 sm:$0xff]   ;;  %v3029_v63 = vld [vmem:[%s3606_s19 + $0x70] ss:$8 sps:$4 sm:$0xff]  }
  0xe7   : > { %v3030_v0 = vld [vmem:[%s3606_s19 + $0xf0] ss:$8 sps:$4 sm:$0xff]   ;;  %v518_v1 = vld [vmem:[#allocation2] sm:$0xff]  ;;  %v519_v3 = vld [vmem:[#allocation2 + $0x8] sm:$0xff]  ;;  %p2498_p4 = scmp.ne.s32.totalorder %s3291_s12, 1 }
  0xe8   : > { %977 = vmatpush1.bf16.msra.mxu0 %v2952_v12  ;;  %2818 = vmatpush1.bf16.msra.mxu1 %v2952_v12  ;;  %v550_v2 = vld [vmem:[#allocation2 + $0x100] sm:$0xff]  ;;  %v551_v4 = vld [vmem:[#allocation2 + $0x108] sm:$0xff]  ;;  %v520_v7 = vld [vmem:[#allocation2 + $0x10] sm:$0xff]  ;;  %s4017_s6 = sld [smem:[#allocation21_spill]] (!%p2498_p4)  ;;  %s4018_s20 = sld [smem:[#allocation22_spill]] (!%p2498_p4) }
  0xe9   : > { %978 = vmatprep.subr.bf16.mxu0 %v2953_v13  ;;  %2803 = vmatprep.subr.bf16.mxu1 %v2953_v13  ;;  %v552_v8 = vld [vmem:[#allocation2 + $0x110] sm:$0xff]  ;;  %v521_v13 = vld [vmem:[#allocation2 + $0x18] sm:$0xff] }
  0xea   : > { %v553_v14 = vld [vmem:[#allocation2 + $0x118] sm:$0xff] }
  0xec   : > { %979 = vmatpush1.bf16.msra.mxu0 %v2955_v15  ;;  %2819 = vmatpush1.bf16.msra.mxu1 %v2955_v15 }
  0xed   : > { %980 = vmatprep.subr.bf16.mxu0 %v2956_v17  ;;  %2804 = vmatprep.subr.bf16.mxu1 %v2956_v17 }
  0xf0   : > { %981 = vmatpush1.bf16.msra.mxu0 %v2958_v18  ;;  %2820 = vmatpush1.bf16.msra.mxu1 %v2958_v18 }
  0xf1   : > { %982 = vmatprep.subr.bf16.mxu0 %v2959_v19  ;;  %2805 = vmatprep.subr.bf16.mxu1 %v2959_v19 }
  0xf4   : > { %983 = vmatpush1.bf16.msra.mxu0 %v2961_v20  ;;  %2821 = vmatpush1.bf16.msra.mxu1 %v2961_v20 }
  0xf5   : > { %984 = vmatprep.subr.bf16.mxu0 %v2962_v21  ;;  %2806 = vmatprep.subr.bf16.mxu1 %v2962_v21 }
  0xf8   : > { %985 = vmatpush1.bf16.msra.mxu0 %v2964_v22  ;;  %2822 = vmatpush1.bf16.msra.mxu1 %v2964_v22 }
  0xf9   : > { %986 = vmatprep.subr.bf16.mxu0 %v2965_v23  ;;  %2807 = vmatprep.subr.bf16.mxu1 %v2965_v23 }
  0xfc   : > { %987 = vmatpush1.bf16.msra.mxu0 %v2967_v24  ;;  %2823 = vmatpush1.bf16.msra.mxu1 %v2967_v24 }
  0xfd   : > { %988 = vmatprep.subr.bf16.mxu0 %v2968_v25  ;;  %2808 = vmatprep.subr.bf16.mxu1 %v2968_v25  ;;  %v522_v25 = vld [vmem:[#allocation2 + $0x20] sm:$0xff] }
 0x100   : > { %989 = vmatpush1.bf16.msra.mxu0 %v2970_v26  ;;  %2824 = vmatpush1.bf16.msra.mxu1 %v2970_v26  ;;  %v554_v26 = vld [vmem:[#allocation2 + $0x120] sm:$0xff] }
 0x101   : > { %990 = vmatprep.subr.bf16.mxu0 %v2971_v27  ;;  %2809 = vmatprep.subr.bf16.mxu1 %v2971_v27  ;;  %v523_v27 = vld [vmem:[#allocation2 + $0x28] sm:$0xff] }
 0x104   : > { %991 = vmatpush1.bf16.msra.mxu0 %v2973_v28  ;;  %2825 = vmatpush1.bf16.msra.mxu1 %v2973_v28  ;;  %v555_v28 = vld [vmem:[#allocation2 + $0x128] sm:$0xff] }
 0x105   : > { %992 = vmatprep.subr.bf16.mxu0 %v2974_v29  ;;  %2810 = vmatprep.subr.bf16.mxu1 %v2974_v29 }
 0x108   : > { %993 = vmatpush1.bf16.msra.mxu0 %v2976_v30  ;;  %2826 = vmatpush1.bf16.msra.mxu1 %v2976_v30 }
 0x109   : > { %994 = vmatprep.subr.bf16.mxu0 %v2977_v31  ;;  %2811 = vmatprep.subr.bf16.mxu1 %v2977_v31  ;;  %v524_v31 = vld [vmem:[#allocation2 + $0x30] sm:$0xff] }
 0x10c   : > { %995 = vmatpush1.bf16.msra.mxu0 %v2979_v32  ;;  %2827 = vmatpush1.bf16.msra.mxu1 %v2979_v32  ;;  %v556_v32 = vld [vmem:[#allocation2 + $0x130] sm:$0xff] }
 0x10d   : > { %996 = vmatprep.subr.bf16.mxu0 %v2980_v33  ;;  %2812 = vmatprep.subr.bf16.mxu1 %v2980_v33 }
 0x110   : > { %997 = vmatpush1.bf16.msra.mxu0 %v2982_v34  ;;  %2828 = vmatpush1.bf16.msra.mxu1 %v2982_v34 }
 0x113   : > { %999 = vmatmul.mubr.bf16.vlgmr.msra.gmra.mrb[0].mxu0 %v2983_v35  ;;  %1079 = vmatmul.mubr.bf16.vlgmr.msra.gmra.mrb[0].mxu1 %v2986_v36 }
 0x114   : > { %1008 = vmatprep.mubr.bf16.mxu0 %v2989_v37  ;;  %1088 = vmatprep.mubr.bf16.mxu1 %v2991_v38  ;;  %v525_v37 = vld [vmem:[#allocation2 + $0x38] sm:$0xff] }
 0x115   : > { %v557_v38 = vld [vmem:[#allocation2 + $0x138] sm:$0xff] }
 0x11b   : > { %1009 = vmatmul.mubr.bf16.gmra.mrb[4].mxu0 %v2993_v39  ;;  %1089 = vmatmul.mubr.bf16.gmra.mrb[4].mxu1 %v2994_v40 }
 0x11c   : > { %1018 = vmatprep.mubr.bf16.mxu0 %v2995_v41  ;;  %1098 = vmatprep.mubr.bf16.mxu1 %v2997_v42 }
 0x123   : > { %1019 = vmatmul.mubr.bf16.gmra.mrb[8].mxu0 %v2999_v43  ;;  %1099 = vmatmul.mubr.bf16.gmra.mrb[8].mxu1 %v3000_v44 }
 0x124   : > { %1028 = vmatprep.mubr.bf16.mxu0 %v3001_v45  ;;  %1108 = vmatprep.mubr.bf16.mxu1 %v3003_v46 }
 0x12b   : > { %1029 = vmatmul.mubr.bf16.gmra.mrb[12].mxu0 %v3005_v47  ;;  %1109 = vmatmul.mubr.bf16.gmra.mrb[12].mxu1 %v3006_v48 }
 0x12c   : > { %1038 = vmatprep.mubr.bf16.mxu0 %v3007_v49  ;;  %1118 = vmatprep.mubr.bf16.mxu1 %v3009_v50  ;;  %v526_v49 = vld [vmem:[#allocation2 + $0x40] sm:$0xff] }
 0x12d   : > { %v558_v50 = vld [vmem:[#allocation2 + $0x140] sm:$0xff] }
 0x133   : > { %1039 = vmatmul.mubr.bf16.gmra.mrb[16].mxu0 %v3011_v51  ;;  %1119 = vmatmul.mubr.bf16.gmra.mrb[16].mxu1 %v3012_v52  ;;  %v527_v51 = vld [vmem:[#allocation2 + $0x48] sm:$0xff] }
 0x134   : > { %1048 = vmatprep.mubr.bf16.mxu0 %v3013_v53  ;;  %1128 = vmatprep.mubr.bf16.mxu1 %v3015_v54  ;;  %v559_v52 = vld [vmem:[#allocation2 + $0x148] sm:$0xff] }
 0x13b   : > { %1049 = vmatmul.mubr.bf16.gmra.mrb[20].mxu0 %v3017_v55  ;;  %1129 = vmatmul.mubr.bf16.gmra.mrb[20].mxu1 %v3018_v56  ;;  %v528_v55 = vld [vmem:[#allocation2 + $0x50] sm:$0xff] }
 0x13c   : > { %1058 = vmatprep.mubr.bf16.mxu0 %v3019_v57  ;;  %1138 = vmatprep.mubr.bf16.mxu1 %v3021_v58  ;;  %v560_v56 = vld [vmem:[#allocation2 + $0x150] sm:$0xff] }
 0x143   : > { %1059 = vmatmul.mubr.bf16.gmra.mrb[24].mxu0 %v3023_v59  ;;  %1139 = vmatmul.mubr.bf16.gmra.mrb[24].mxu1 %v3024_v60 }
 0x144   : > { %1068 = vmatprep.mubr.bf16.mxu0 %v3025_v61  ;;  %1148 = vmatprep.mubr.bf16.mxu1 %v3027_v62  ;;  %v529_v61 = vld [vmem:[#allocation2 + $0x58] sm:$0xff] }
 0x145   : > { %v561_v62 = vld [vmem:[#allocation2 + $0x158] sm:$0xff] }
 0x14b   : > { %1069 = vmatmul.mubr.bf16.gmra.mrb[28].mxu0 %v3029_v63  ;;  %1149 = vmatmul.mubr.bf16.gmra.mrb[28].mxu1 %v3030_v0 }
 0x1e6   : > { %v1000_v5 = vpop.f32.mrb[0].mxu0  ;;  %v1080_v6 = vpop.f32.mrb[0].mxu1 }
 0x1e7   : > { %v1159_v9 = vadd.f32 %v1000_v5, %v518_v1  ;;  %v1191_v10 = vadd.f32 %v1080_v6, %v550_v2  ;;  %v1002_v11 = vpop.f32.mrb[1].mxu0  ;;  %v1082_v12 = vpop.f32.mrb[1].mxu1 }
 0x1e8   : > { %v1160_v15 = vadd.f32 %v1002_v11, %v519_v3  ;;  %v1192_v16 = vadd.f32 %v1082_v12, %v551_v4  ;;  %v1004_v17 = vpop.f32.mrb[2].mxu0  ;;  %v1084_v18 = vpop.f32.mrb[2].mxu1  ;;  %v531_v11 = vld [vmem:[#allocation2 + $0x68] sm:$0xff] }
 0x1e9   : > { %1223 = vst [vmem:[#allocation2] sm:$0xff] %v1159_v9  ;;  %1255 = vst [vmem:[#allocation2 + $0x100] sm:$0xff] %v1191_v10  ;;  %v1161_v19 = vadd.f32 %v1004_v17, %v520_v7  ;;  %v1193_v20 = vadd.f32 %v1084_v18, %v552_v8  ;;  %v1006_v21 = vpop.f32.mrb[3].mxu0  ;;  %v1086_v22 = vpop.f32.mrb[3].mxu1  ;;  %v530_v9 = vld [vmem:[#allocation2 + $0x60] sm:$0xff]  ;;  %v563_v12 = vld [vmem:[#allocation2 + $0x168] sm:$0xff] }
 0x1ea   : > { %1224 = vst [vmem:[#allocation2 + $0x8] sm:$0xff] %v1160_v15  ;;  %1256 = vst [vmem:[#allocation2 + $0x108] sm:$0xff] %v1192_v16  ;;  %v1162_v23 = vadd.f32 %v1006_v21, %v521_v13  ;;  %v1194_v24 = vadd.f32 %v1086_v22, %v553_v14  ;;  %v562_v10 = vld [vmem:[#allocation2 + $0x160] sm:$0xff]  ;;  %v532_v15 = vld [vmem:[#allocation2 + $0x70] sm:$0xff] }
 0x1eb   : > { %1225 = vst [vmem:[#allocation2 + $0x10] sm:$0xff] %v1161_v19  ;;  %1257 = vst [vmem:[#allocation2 + $0x110] sm:$0xff] %v1193_v20  ;;  %v564_v16 = vld [vmem:[#allocation2 + $0x170] sm:$0xff]  ;;  %v533_v21 = vld [vmem:[#allocation2 + $0x78] sm:$0xff] }
 0x1ec   : > { %1226 = vst [vmem:[#allocation2 + $0x18] sm:$0xff] %v1162_v23  ;;  %1258 = vst [vmem:[#allocation2 + $0x118] sm:$0xff] %v1194_v24  ;;  %v565_v22 = vld [vmem:[#allocation2 + $0x178] sm:$0xff] }
 0x1ee   : > { %v1010_v29 = vpop.f32.mrb[4].mxu0  ;;  %v1090_v30 = vpop.f32.mrb[4].mxu1 }
 0x1ef   : > { %v1163_v33 = vadd.f32 %v1010_v29, %v522_v25  ;;  %v1195_v34 = vadd.f32 %v1090_v30, %v554_v26  ;;  %v1012_v35 = vpop.f32.mrb[5].mxu0  ;;  %v1092_v36 = vpop.f32.mrb[5].mxu1 }
 0x1f0   : > { %v1164_v39 = vadd.f32 %v1012_v35, %v523_v27  ;;  %v1196_v40 = vadd.f32 %v1092_v36, %v555_v28  ;;  %v1014_v41 = vpop.f32.mrb[6].mxu0  ;;  %v1094_v42 = vpop.f32.mrb[6].mxu1  ;;  %v535_v35 = vld [vmem:[#allocation2 + $0x88] sm:$0xff] }
 0x1f1   : > { %1227 = vst [vmem:[#allocation2 + $0x20] sm:$0xff] %v1163_v33  ;;  %1259 = vst [vmem:[#allocation2 + $0x120] sm:$0xff] %v1195_v34  ;;  %v1165_v43 = vadd.f32 %v1014_v41, %v524_v31  ;;  %v1197_v44 = vadd.f32 %v1094_v42, %v556_v32  ;;  %v1016_v45 = vpop.f32.mrb[7].mxu0  ;;  %v1096_v46 = vpop.f32.mrb[7].mxu1  ;;  %v534_v33 = vld [vmem:[#allocation2 + $0x80] sm:$0xff]  ;;  %v567_v36 = vld [vmem:[#allocation2 + $0x188] sm:$0xff] }
 0x1f2   : > { %1228 = vst [vmem:[#allocation2 + $0x28] sm:$0xff] %v1164_v39  ;;  %1260 = vst [vmem:[#allocation2 + $0x128] sm:$0xff] %v1196_v40  ;;  %v1166_v47 = vadd.f32 %v1016_v45, %v525_v37  ;;  %v1198_v48 = vadd.f32 %v1096_v46, %v557_v38  ;;  %v566_v34 = vld [vmem:[#allocation2 + $0x180] sm:$0xff]  ;;  %v536_v39 = vld [vmem:[#allocation2 + $0x90] sm:$0xff] }
 0x1f3   : > { %1229 = vst [vmem:[#allocation2 + $0x30] sm:$0xff] %v1165_v43  ;;  %1261 = vst [vmem:[#allocation2 + $0x130] sm:$0xff] %v1197_v44  ;;  %v568_v40 = vld [vmem:[#allocation2 + $0x190] sm:$0xff]  ;;  %v537_v45 = vld [vmem:[#allocation2 + $0x98] sm:$0xff] }
 0x1f4   : > { %1230 = vst [vmem:[#allocation2 + $0x38] sm:$0xff] %v1166_v47  ;;  %1262 = vst [vmem:[#allocation2 + $0x138] sm:$0xff] %v1198_v48  ;;  %v569_v46 = vld [vmem:[#allocation2 + $0x198] sm:$0xff] }
 0x1f6   : > { %v1020_v53 = vpop.f32.mrb[8].mxu0  ;;  %v1100_v54 = vpop.f32.mrb[8].mxu1 }
 0x1f7   : > { %v1167_v57 = vadd.f32 %v1020_v53, %v526_v49  ;;  %v1199_v58 = vadd.f32 %v1100_v54, %v558_v50  ;;  %v1022_v59 = vpop.f32.mrb[9].mxu0  ;;  %v1102_v60 = vpop.f32.mrb[9].mxu1 }
 0x1f8   : > { %v1168_v63 = vadd.f32 %v1022_v59, %v527_v51  ;;  %v1200_v0 = vadd.f32 %v1102_v60, %v559_v52  ;;  %v1024_v1 = vpop.f32.mrb[10].mxu0  ;;  %v1104_v2 = vpop.f32.mrb[10].mxu1  ;;  %v539_v59 = vld [vmem:[#allocation2 + $0xa8] sm:$0xff] }
 0x1f9   : > { %1231 = vst [vmem:[#allocation2 + $0x40] sm:$0xff] %v1167_v57  ;;  %1263 = vst [vmem:[#allocation2 + $0x140] sm:$0xff] %v1199_v58  ;;  %v1169_v3 = vadd.f32 %v1024_v1, %v528_v55  ;;  %v1201_v4 = vadd.f32 %v1104_v2, %v560_v56  ;;  %v1026_v5 = vpop.f32.mrb[11].mxu0  ;;  %v1106_v6 = vpop.f32.mrb[11].mxu1  ;;  %v538_v57 = vld [vmem:[#allocation2 + $0xa0] sm:$0xff]  ;;  %v571_v60 = vld [vmem:[#allocation2 + $0x1a8] sm:$0xff] }
 0x1fa   : > { %1232 = vst [vmem:[#allocation2 + $0x48] sm:$0xff] %v1168_v63  ;;  %1264 = vst [vmem:[#allocation2 + $0x148] sm:$0xff] %v1200_v0  ;;  %v1170_v7 = vadd.f32 %v1026_v5, %v529_v61  ;;  %v1202_v8 = vadd.f32 %v1106_v6, %v561_v62  ;;  %v570_v58 = vld [vmem:[#allocation2 + $0x1a0] sm:$0xff]  ;;  %v540_v63 = vld [vmem:[#allocation2 + $0xb0] sm:$0xff] }
 0x1fb   : > { %1233 = vst [vmem:[#allocation2 + $0x50] sm:$0xff] %v1169_v3  ;;  %1265 = vst [vmem:[#allocation2 + $0x150] sm:$0xff] %v1201_v4  ;;  %v572_v0 = vld [vmem:[#allocation2 + $0x1b0] sm:$0xff]  ;;  %v541_v5 = vld [vmem:[#allocation2 + $0xb8] sm:$0xff] }
 0x1fc   : > { %1234 = vst [vmem:[#allocation2 + $0x58] sm:$0xff] %v1170_v7  ;;  %1266 = vst [vmem:[#allocation2 + $0x158] sm:$0xff] %v1202_v8  ;;  %v573_v6 = vld [vmem:[#allocation2 + $0x1b8] sm:$0xff] }
 0x1fe   : > { %v1030_v13 = vpop.f32.mrb[12].mxu0  ;;  %v1110_v14 = vpop.f32.mrb[12].mxu1 }
 0x1ff   : > { %v1171_v17 = vadd.f32 %v1030_v13, %v530_v9  ;;  %v1203_v18 = vadd.f32 %v1110_v14, %v562_v10  ;;  %v1032_v19 = vpop.f32.mrb[13].mxu0  ;;  %v1112_v20 = vpop.f32.mrb[13].mxu1 }
 0x200   : > { %v1172_v23 = vadd.f32 %v1032_v19, %v531_v11  ;;  %v1204_v24 = vadd.f32 %v1112_v20, %v563_v12  ;;  %v1034_v25 = vpop.f32.mrb[14].mxu0  ;;  %v1114_v26 = vpop.f32.mrb[14].mxu1  ;;  %v543_v19 = vld [vmem:[#allocation2 + $0xc8] sm:$0xff] }
 0x201   : > { %1235 = vst [vmem:[#allocation2 + $0x60] sm:$0xff] %v1171_v17  ;;  %1267 = vst [vmem:[#allocation2 + $0x160] sm:$0xff] %v1203_v18  ;;  %v1173_v27 = vadd.f32 %v1034_v25, %v532_v15  ;;  %v1205_v28 = vadd.f32 %v1114_v26, %v564_v16  ;;  %v1036_v29 = vpop.f32.mrb[15].mxu0  ;;  %v1116_v30 = vpop.f32.mrb[15].mxu1  ;;  %v542_v17 = vld [vmem:[#allocation2 + $0xc0] sm:$0xff]  ;;  %v575_v20 = vld [vmem:[#allocation2 + $0x1c8] sm:$0xff] }
 0x202   : > { %1236 = vst [vmem:[#allocation2 + $0x68] sm:$0xff] %v1172_v23  ;;  %1268 = vst [vmem:[#allocation2 + $0x168] sm:$0xff] %v1204_v24  ;;  %v1174_v31 = vadd.f32 %v1036_v29, %v533_v21  ;;  %v1206_v32 = vadd.f32 %v1116_v30, %v565_v22  ;;  %v574_v18 = vld [vmem:[#allocation2 + $0x1c0] sm:$0xff]  ;;  %v544_v23 = vld [vmem:[#allocation2 + $0xd0] sm:$0xff] }
 0x203   : > { %1237 = vst [vmem:[#allocation2 + $0x70] sm:$0xff] %v1173_v27  ;;  %1269 = vst [vmem:[#allocation2 + $0x170] sm:$0xff] %v1205_v28  ;;  %v576_v24 = vld [vmem:[#allocation2 + $0x1d0] sm:$0xff]  ;;  %v545_v29 = vld [vmem:[#allocation2 + $0xd8] sm:$0xff] }
 0x204   : > { %1238 = vst [vmem:[#allocation2 + $0x78] sm:$0xff] %v1174_v31  ;;  %1270 = vst [vmem:[#allocation2 + $0x178] sm:$0xff] %v1206_v32  ;;  %v577_v30 = vld [vmem:[#allocation2 + $0x1d8] sm:$0xff] }
 0x206   : > { %v1040_v37 = vpop.f32.mrb[16].mxu0  ;;  %v1120_v38 = vpop.f32.mrb[16].mxu1 }
 0x207   : > { %v1175_v41 = vadd.f32 %v1040_v37, %v534_v33  ;;  %v1207_v42 = vadd.f32 %v1120_v38, %v566_v34  ;;  %v1042_v43 = vpop.f32.mrb[17].mxu0  ;;  %v1122_v44 = vpop.f32.mrb[17].mxu1 }
 0x208   : > { %v1176_v47 = vadd.f32 %v1042_v43, %v535_v35  ;;  %v1208_v48 = vadd.f32 %v1122_v44, %v567_v36  ;;  %v1044_v49 = vpop.f32.mrb[18].mxu0  ;;  %v1124_v50 = vpop.f32.mrb[18].mxu1  ;;  %v547_v43 = vld [vmem:[#allocation2 + $0xe8] sm:$0xff] }
 0x209   : > { %1239 = vst [vmem:[#allocation2 + $0x80] sm:$0xff] %v1175_v41  ;;  %1271 = vst [vmem:[#allocation2 + $0x180] sm:$0xff] %v1207_v42  ;;  %v1177_v51 = vadd.f32 %v1044_v49, %v536_v39  ;;  %v1209_v52 = vadd.f32 %v1124_v50, %v568_v40  ;;  %v1046_v53 = vpop.f32.mrb[19].mxu0  ;;  %v1126_v54 = vpop.f32.mrb[19].mxu1  ;;  %v546_v41 = vld [vmem:[#allocation2 + $0xe0] sm:$0xff]  ;;  %v579_v44 = vld [vmem:[#allocation2 + $0x1e8] sm:$0xff] }
 0x20a   : > { %1240 = vst [vmem:[#allocation2 + $0x88] sm:$0xff] %v1176_v47  ;;  %1272 = vst [vmem:[#allocation2 + $0x188] sm:$0xff] %v1208_v48  ;;  %v1178_v55 = vadd.f32 %v1046_v53, %v537_v45  ;;  %v1210_v56 = vadd.f32 %v1126_v54, %v569_v46  ;;  %v578_v42 = vld [vmem:[#allocation2 + $0x1e0] sm:$0xff]  ;;  %v548_v47 = vld [vmem:[#allocation2 + $0xf0] sm:$0xff] }
 0x20b   : > { %1241 = vst [vmem:[#allocation2 + $0x90] sm:$0xff] %v1177_v51  ;;  %1273 = vst [vmem:[#allocation2 + $0x190] sm:$0xff] %v1209_v52  ;;  %v580_v48 = vld [vmem:[#allocation2 + $0x1f0] sm:$0xff]  ;;  %v549_v53 = vld [vmem:[#allocation2 + $0xf8] sm:$0xff] }
 0x20c   : > { %1242 = vst [vmem:[#allocation2 + $0x98] sm:$0xff] %v1178_v55  ;;  %1274 = vst [vmem:[#allocation2 + $0x198] sm:$0xff] %v1210_v56  ;;  %v581_v54 = vld [vmem:[#allocation2 + $0x1f8] sm:$0xff] }
 0x20e   : > { %v1050_v61 = vpop.f32.mrb[20].mxu0  ;;  %v1130_v62 = vpop.f32.mrb[20].mxu1 }
 0x20f   : > { %v1179_v1 = vadd.f32 %v1050_v61, %v538_v57  ;;  %v1211_v2 = vadd.f32 %v1130_v62, %v570_v58  ;;  %v1052_v3 = vpop.f32.mrb[21].mxu0  ;;  %v1132_v4 = vpop.f32.mrb[21].mxu1 }
 0x210   : > { %v1180_v7 = vadd.f32 %v1052_v3, %v539_v59  ;;  %v1212_v8 = vadd.f32 %v1132_v4, %v571_v60  ;;  %v1054_v9 = vpop.f32.mrb[22].mxu0  ;;  %v1134_v10 = vpop.f32.mrb[22].mxu1  ;;  %v3033_v3 = vld [vmem:[#allocation8 + $0x48] sm:$0xff] (!%p2498_p4)  }
 0x211   : > { %1243 = vst [vmem:[#allocation2 + $0xa0] sm:$0xff] %v1179_v1  ;;  %1275 = vst [vmem:[#allocation2 + $0x1a0] sm:$0xff] %v1211_v2  ;;  %v1181_v11 = vadd.f32 %v1054_v9, %v540_v63  ;;  %v1213_v12 = vadd.f32 %v1134_v10, %v572_v0  ;;  %v1056_v13 = vpop.f32.mrb[23].mxu0  ;;  %v1136_v14 = vpop.f32.mrb[23].mxu1  ;;  %v3031_v1 = vld [vmem:[#allocation8 + $0x40] sm:$0xff] (!%p2498_p4)   ;;  %v3034_v4 = vld [vmem:[#allocation8 + $0x8] sm:$0xff] (!%p2498_p4)  }
 0x212   : > { %1244 = vst [vmem:[#allocation2 + $0xa8] sm:$0xff] %v1180_v7  ;;  %1276 = vst [vmem:[#allocation2 + $0x1a8] sm:$0xff] %v1212_v8  ;;  %v1182_v15 = vadd.f32 %v1056_v13, %v541_v5  ;;  %v1214_v16 = vadd.f32 %v1136_v14, %v573_v6  ;;  %v3032_v2 = vld [vmem:[#allocation8] sm:$0xff] (!%p2498_p4)   ;;  %2541 = vmatprep.subr.bf16.mxu0 (!%p2498_p4), %v3031_v1  ;;  %v3035_v5 = vld [vmem:[#allocation8 + $0x50] sm:$0xff] (!%p2498_p4)   ;;  %v1357_v6 = vlaneseq (!%p2498_p4) }
 0x213   : > { %1245 = vst [vmem:[#allocation2 + $0xb0] sm:$0xff] %v1181_v11  ;;  %1277 = vst [vmem:[#allocation2 + $0x1b0] sm:$0xff] %v1213_v12  ;;  %2542 = vmatpush3.bf16.msra.mxu0 (!%p2498_p4), %v3032_v2  ;;  %v3036_v7 = vld [vmem:[#allocation8 + $0x10] sm:$0xff] (!%p2498_p4)   ;;  %v3037_v8 = vld [vmem:[#allocation8 + $0x58] sm:$0xff] (!%p2498_p4)  }
 0x214   : > { %1246 = vst [vmem:[#allocation2 + $0xb8] sm:$0xff] %v1182_v15  ;;  %1278 = vst [vmem:[#allocation2 + $0x1b8] sm:$0xff] %v1214_v16  ;;  %2543 = vmatprep.subr.bf16.mxu0 (!%p2498_p4), %v3033_v3  ;;  %v1358_v9 = vshrl.u32 (!%p2498_p4), %v1357_v6, 7  ;;  %v3038_v10 = vld [vmem:[#allocation8 + $0x18] sm:$0xff] (!%p2498_p4)   ;;  %v3039_v11 = vld [vmem:[#allocation8 + $0x60] sm:$0xff] (!%p2498_p4)  }
 0x215   : > { %v3040_v13 = vld [vmem:[#allocation8 + $0x20] sm:$0xff] (!%p2498_p4)   ;;  %v3041_v14 = vld [vmem:[#allocation8 + $0x68] sm:$0xff] (!%p2498_p4)   ;;  %v1294_v16 = vld [vmem:[#allocation2 + $0x18] sm:$0xff] (!%p2498_p4) }
 0x216   : > { %v1060_v21 = vpop.f32.mrb[24].mxu0  ;;  %v1140_v22 = vpop.f32.mrb[24].mxu1  ;;  %v1363_v12 = vsub.s32 (!%p2498_p4), 1, %v1358_v9  ;;  %v1292_v15 = vld [vmem:[#allocation2 + $0x8] sm:$0xff] (!%p2498_p4)  ;;  %v1310_v1 = vld [vmem:[#allocation2 + $0x98] sm:$0xff] (!%p2498_p4) }
 0x217   : > { %v1183_v25 = vadd.f32 %v1060_v21, %v542_v17  ;;  %v1215_v26 = vadd.f32 %v1140_v22, %v574_v18  ;;  %v1062_v27 = vpop.f32.mrb[25].mxu0  ;;  %v1142_v28 = vpop.f32.mrb[25].mxu1  ;;  %2544 = vmatpush3.bf16.msra.mxu0 (!%p2498_p4), %v3034_v4  ;;  %v1355_v17 = vld [vmem:[%s3982_s2] sm:$0x3] (!%p2498_p4) }
 0x218   : > { %v1184_v31 = vadd.f32 %v1062_v27, %v543_v19  ;;  %v1216_v32 = vadd.f32 %v1142_v28, %v575_v20  ;;  %v1064_v33 = vpop.f32.mrb[26].mxu0  ;;  %v1144_v34 = vpop.f32.mrb[26].mxu1  ;;  %2545 = vmatprep.subr.bf16.mxu0 (!%p2498_p4), %v3035_v5  ;;  %v3760_v18 = vrot.slane (!%p2498_p4), %v1355_v17, %v1363_v12  ;;  %v1359_v19 = vsub.s32 (!%p2498_p4), 0, %v1358_v9  ;;  %v3042_v20 = vld [vmem:[#allocation8 + $0x28] sm:$0xff] (!%p2498_p4)   ;;  %v1291_v27 = vld [vmem:[#allocation2] sm:$0xff] (!%p2498_p4)  ;;  %v1293_v28 = vld [vmem:[#allocation2 + $0x10] sm:$0xff] (!%p2498_p4) }
 0x219   : > { %1247 = vst [vmem:[#allocation2 + $0xc0] sm:$0xff] %v1183_v25  ;;  %1279 = vst [vmem:[#allocation2 + $0x1c0] sm:$0xff] %v1215_v26  ;;  %v1185_v35 = vadd.f32 %v1064_v33, %v544_v23  ;;  %v1217_v36 = vadd.f32 %v1144_v34, %v576_v24  ;;  %v1066_v37 = vpop.f32.mrb[27].mxu0  ;;  %v1146_v38 = vpop.f32.mrb[27].mxu1  ;;  %v3043_v23 = vld [vmem:[#allocation8 + $0x70] sm:$0xff] (!%p2498_p4)   ;;  %v3046_v34 = vld [vmem:[#allocation8 + $0x38] sm:$0xff] (!%p2498_p4)  }
 0x21a   : > { %1248 = vst [vmem:[#allocation2 + $0xc8] sm:$0xff] %v1184_v31  ;;  %1280 = vst [vmem:[#allocation2 + $0x1c8] sm:$0xff] %v1216_v32  ;;  %v1186_v39 = vadd.f32 %v1066_v37, %v545_v29  ;;  %v1218_v40 = vadd.f32 %v1146_v38, %v577_v30  ;;  %v1368_v21 = vadd.f32 (!%p2498_p4), %v3760_v18, %v1292_v15  ;;  %v3044_v26 = vld [vmem:[#allocation8 + $0x30] sm:$0xff] (!%p2498_p4)   ;;  %v3045_v29 = vld [vmem:[#allocation8 + $0x78] sm:$0xff] (!%p2498_p4)  }
 0x21b   : > { %1249 = vst [vmem:[#allocation2 + $0xd0] sm:$0xff] %v1185_v35  ;;  %1281 = vst [vmem:[#allocation2 + $0x1d0] sm:$0xff] %v1217_v36  ;;  %2546 = vmatpush3.bf16.msra.mxu0 (!%p2498_p4), %v3036_v7  ;;  %v1370_v22 = vadd.f32 (!%p2498_p4), %v3760_v18, %v1294_v16  ;;  %v3764_v25 = vrot.slane (!%p2498_p4), %v1355_v17, %v1359_v19  ;;  %v1296_v30 = vld [vmem:[#allocation2 + $0x28] sm:$0xff] (!%p2498_p4)  ;;  %v1298_v31 = vld [vmem:[#allocation2 + $0x38] sm:$0xff] (!%p2498_p4)  ;;  %v1386_v6 = vadd.f32 (!%p2498_p4), %v3760_v18, %v1310_v1 }
 0x21c   : > { %1250 = vst [vmem:[#allocation2 + $0xd8] sm:$0xff] %v1186_v39  ;;  %1282 = vst [vmem:[#allocation2 + $0x1d8] sm:$0xff] %v1218_v40  ;;  %2547 = vmatprep.subr.bf16.mxu0 (!%p2498_p4), %v3037_v8  ;;  %v1372_v35 = vadd.f32 (!%p2498_p4), %v3760_v18, %v1296_v30  ;;  %v1374_v36 = vadd.f32 (!%p2498_p4), %v3760_v18, %v1298_v31  ;;  %v1295_v39 = vld [vmem:[#allocation2 + $0x20] sm:$0xff] (!%p2498_p4)  ;;  %v1297_v40 = vld [vmem:[#allocation2 + $0x30] sm:$0xff] (!%p2498_p4) }
 0x21d   : > { %v1432_v24 = vpack.c.bf16 (!%p2498_p4), %v1370_v22, %v1368_v21  ;;  %v1367_v32 = vadd.f32 (!%p2498_p4), %v3764_v25, %v1291_v27  ;;  %v1369_v33 = vadd.f32 (!%p2498_p4), %v3764_v25, %v1293_v28  ;;  %v1307_v9 = vld [vmem:[#allocation2 + $0x80] sm:$0xff] (!%p2498_p4)  ;;  %v1314_v12 = vld [vmem:[#allocation2 + $0xb8] sm:$0xff] (!%p2498_p4)  ;;  %v1313_v21 = vld [vmem:[#allocation2 + $0xb0] sm:$0xff] (!%p2498_p4) }
 0x21e   : > { %v1070_v45 = vpop.f32.mrb[28].mxu0  ;;  %v1150_v46 = vpop.f32.mrb[28].mxu1  ;;  %1290 = sbr.rel (%p2498_p4) target bundleno = 1341 (0x53d), region = 84  ;;  %v1434_v38 = vpack.c.bf16 (!%p2498_p4), %v1374_v36, %v1372_v35  ;;  %v1390_v16 = vadd.f32 (!%p2498_p4), %v3760_v18, %v1314_v12 }
 0x21f   : > { %v1187_v49 = vadd.f32 %v1070_v45, %v546_v41  ;;  %v1219_v50 = vadd.f32 %v1150_v46, %v578_v42  ;;  %v1072_v51 = vpop.f32.mrb[29].mxu0  ;;  %v1152_v52 = vpop.f32.mrb[29].mxu1  ;;  %2548 = vmatpush3.bf16.msra.mxu0 (!%p2498_p4), %v3038_v10  ;;  %1630 = vmatprep.mubr.bf16.mxu0 (!%p2498_p4), %v1432_v24  ;;  %v1431_v37 = vpack.c.bf16 (!%p2498_p4), %v1369_v33, %v1367_v32  ;;  %v1300_v41 = vld [vmem:[#allocation2 + $0x48] sm:$0xff] (!%p2498_p4)  ;;  %v1302_v42 = vld [vmem:[#allocation2 + $0x58] sm:$0xff] (!%p2498_p4)  ;;  %v1309_v10 = vld [vmem:[#allocation2 + $0x90] sm:$0xff] (!%p2498_p4) }
 0x220   : > { %v1188_v55 = vadd.f32 %v1072_v51, %v547_v43  ;;  %v1220_v56 = vadd.f32 %v1152_v52, %v579_v44  ;;  %v1074_v57 = vpop.f32.mrb[30].mxu0  ;;  %v1154_v58 = vpop.f32.mrb[30].mxu1  ;;  %2549 = vmatprep.subr.bf16.mxu0 (!%p2498_p4), %v3039_v11  ;;  %v1371_v43 = vadd.f32 (!%p2498_p4), %v3764_v25, %v1295_v39  ;;  %v1373_v44 = vadd.f32 (!%p2498_p4), %v3764_v25, %v1297_v40  ;;  %v3047_v51 = vld [vmem:[#allocation9] sm:$0xff] (!%p2498_p4)   ;;  %v1312_v11 = vld [vmem:[#allocation2 + $0xa8] sm:$0xff] (!%p2498_p4) }
 0x221   : > { %1251 = vst [vmem:[#allocation2 + $0xe0] sm:$0xff] %v1187_v49  ;;  %1283 = vst [vmem:[#allocation2 + $0x1e0] sm:$0xff] %v1219_v50  ;;  %v1189_v59 = vadd.f32 %v1074_v57, %v548_v47  ;;  %v1221_v60 = vadd.f32 %v1154_v58, %v580_v48  ;;  %v1076_v61 = vpop.f32.mrb[31].mxu0  ;;  %v1156_v62 = vpop.f32.mrb[31].mxu1  ;;  %v1376_v45 = vadd.f32 (!%p2498_p4), %v3760_v18, %v1300_v41  ;;  %v1299_v47 = vld [vmem:[#allocation2 + $0x40] sm:$0xff] (!%p2498_p4)  ;;  %v1301_v48 = vld [vmem:[#allocation2 + $0x50] sm:$0xff] (!%p2498_p4)  ;;  %2701 = vmatprep.subr.bf16.mxu1 (!%p2498_p4), %v3047_v51 }
 0x222   : > { %1252 = vst [vmem:[#allocation2 + $0xe8] sm:$0xff] %v1188_v55  ;;  %1284 = vst [vmem:[#allocation2 + $0x1e8] sm:$0xff] %v1220_v56  ;;  %v1190_v63 = vadd.f32 %v1076_v61, %v549_v53  ;;  %v1222_v0 = vadd.f32 %v1156_v62, %v581_v54  ;;  %v1378_v46 = vadd.f32 (!%p2498_p4), %v3760_v18, %v1302_v42  ;;  %v1304_v50 = vld [vmem:[#allocation2 + $0x68] sm:$0xff] (!%p2498_p4)  ;;  %v1306_v54 = vld [vmem:[#allocation2 + $0x78] sm:$0xff] (!%p2498_p4)  ;;  %2702 = vmatpush3.bf16.msra.mxu1 (!%p2498_p4), %v3047_v51 }
 0x223   : > { %1253 = vst [vmem:[#allocation2 + $0xf0] sm:$0xff] %v1189_v59  ;;  %1285 = vst [vmem:[#allocation2 + $0x1f0] sm:$0xff] %v1221_v60  ;;  %2550 = vmatpush3.bf16.msra.mxu0 (!%p2498_p4), %v3040_v13  ;;  %v1433_v49 = vpack.c.bf16 (!%p2498_p4), %v1373_v44, %v1371_v43  ;;  %v3048_v53 = vld [vmem:[#allocation9 + $0x8] sm:$0xff] (!%p2498_p4)   ;;  %v3049_v55 = vld [vmem:[#allocation9 + $0x10] sm:$0xff] (!%p2498_p4)   ;;  %v1375_v56 = vadd.f32 (!%p2498_p4), %v3764_v25, %v1299_v47  ;;  %v1377_v57 = vadd.f32 (!%p2498_p4), %v3764_v25, %v1301_v48 }
 0x224   : > { %1254 = vst [vmem:[#allocation2 + $0xf8] sm:$0xff] %v1190_v63  ;;  %1286 = vst [vmem:[#allocation2 + $0x1f8] sm:$0xff] %v1222_v0  ;;  %2551 = vmatprep.subr.bf16.mxu0 (!%p2498_p4), %v3041_v14  ;;  %v1436_v52 = vpack.c.bf16 (!%p2498_p4), %v1378_v46, %v1376_v45  ;;  %2703 = vmatprep.subr.bf16.mxu1 (!%p2498_p4), %v3048_v53  ;;  %v1380_v58 = vadd.f32 (!%p2498_p4), %v3760_v18, %v1304_v50  ;;  %v3050_v60 = vld [vmem:[#allocation9 + $0x18] sm:$0xff] (!%p2498_p4)   ;;  %v1303_v61 = vld [vmem:[#allocation2 + $0x60] sm:$0xff] (!%p2498_p4) }
 0x225   : > { %v1382_v59 = vadd.f32 %v3760_v18, %v1306_v54  ;;  %v1305_v62 = vld [vmem:[#allocation2 + $0x70] sm:$0xff]  ;;  %v1435_v63 = vpack.c.bf16 %v1377_v57, %v1375_v56  ;;  %v1308_v0 = vld [vmem:[#allocation2 + $0x88] sm:$0xff]  ;;  %v1379_v3 = vadd.f32 %v3764_v25, %v1303_v61  ;;  %v1383_v13 = vadd.f32 %v3764_v25, %v1307_v9  ;;  %v1315_v31 = vld [vmem:[#allocation2 + $0xc0] sm:$0xff] }
 0x226   : > { %2704 = vmatpush3.bf16.msra.mxu1 %v3048_v53  ;;  %v1381_v4 = vadd.f32 %v3764_v25, %v1305_v62  ;;  %v1384_v5 = vadd.f32 %v3760_v18, %v1308_v0  ;;  %v1385_v14 = vadd.f32 %v3764_v25, %v1309_v10  ;;  %v1388_v15 = vadd.f32 %v3760_v18, %v1312_v11  ;;  %v1316_v22 = vld [vmem:[#allocation2 + $0xc8] sm:$0xff]  ;;  %v1317_v32 = vld [vmem:[#allocation2 + $0xd0] sm:$0xff]  ;;  %v1326_v44 = vld [vmem:[#allocation2 + $0x118] sm:$0xff] }
 0x227   : > { %2552 = vmatpush3.bf16.msra.mxu0 %v3042_v20  ;;  %2705 = vmatprep.subr.bf16.mxu1 %v3049_v55  ;;  %v1438_v2 = vpack.c.bf16 %v1382_v59, %v1380_v58  ;;  %v1311_v20 = vld [vmem:[#allocation2 + $0xa0] sm:$0xff]  ;;  %v1392_v27 = vadd.f32 %v3760_v18, %v1316_v22  ;;  %v1391_v35 = vadd.f32 %v3764_v25, %v1315_v31  ;;  %v1324_v43 = vld [vmem:[#allocation2 + $0x108] sm:$0xff]  ;;  %v1330_v54 = vld [vmem:[#allocation2 + $0x138] sm:$0xff] }
 0x228   : > { %2553 = vmatprep.subr.bf16.mxu0 %v3043_v23  ;;  %v1437_v7 = vpack.c.bf16 %v1381_v4, %v1379_v3  ;;  %v1440_v8 = vpack.c.bf16 %v1386_v6, %v1384_v5  ;;  %v1439_v17 = vpack.c.bf16 %v1385_v14, %v1383_v13  ;;  %v1442_v19 = vpack.c.bf16 %v1390_v16, %v1388_v15  ;;  %v1318_v23 = vld [vmem:[#allocation2 + $0xd8] sm:$0xff]  ;;  %v1319_v41 = vld [vmem:[#allocation2 + $0xe0] sm:$0xff]  ;;  %v1328_v53 = vld [vmem:[#allocation2 + $0x128] sm:$0xff] }
 0x229   : > { %v1387_v24 = vadd.f32 %v3764_v25, %v1311_v20  ;;  %v1394_v28 = vadd.f32 %v3760_v18, %v1318_v23  ;;  %v1320_v33 = vld [vmem:[#allocation2 + $0xe8] sm:$0xff]  ;;  %v1393_v36 = vadd.f32 %v3764_v25, %v1317_v32  ;;  %v1395_v45 = vadd.f32 %v3764_v25, %v1319_v41  ;;  %v1323_v51 = vld [vmem:[#allocation2 + $0x100] sm:$0xff]  ;;  %v1329_v62 = vld [vmem:[#allocation2 + $0x130] sm:$0xff] }
 0x22a   : > { %2706 = vmatpush3.bf16.msra.mxu1 %v3049_v55  ;;  %v1321_v42 = vld [vmem:[#allocation2 + $0xf0] sm:$0xff]  ;;  %v1400_v47 = vadd.f32 %v3760_v18, %v1324_v43  ;;  %v1402_v48 = vadd.f32 %v3760_v18, %v1326_v44  ;;  %v1399_v55 = vadd.f32 %v3764_v25, %v1323_v51  ;;  %v1404_v57 = vadd.f32 %v3760_v18, %v1328_v53  ;;  %v1327_v61 = vld [vmem:[#allocation2 + $0x120] sm:$0xff]  ;;  %v1334_v0 = vld [vmem:[#allocation2 + $0x158] sm:$0xff] }
 0x22b   : > { %2554 = vmatpush3.bf16.msra.mxu0 %v3044_v26  ;;  %2707 = vmatprep.subr.bf16.mxu1 %v3050_v60  ;;  %v1389_v26 = vadd.f32 %v3764_v25, %v1313_v21  ;;  %v1444_v30 = vpack.c.bf16 %v1394_v28, %v1392_v27  ;;  %v1443_v39 = vpack.c.bf16 %v1393_v36, %v1391_v35  ;;  %v1336_v9 = vld [vmem:[#allocation2 + $0x168] sm:$0xff]  ;;  %v1338_v10 = vld [vmem:[#allocation2 + $0x178] sm:$0xff]  ;;  %v3051_v27 = vld [vmem:[#allocation9 + $0x20] sm:$0xff]  }
 0x22c   : > { %2555 = vmatprep.subr.bf16.mxu0 %v3045_v29  ;;  %v1397_v46 = vadd.f32 %v3764_v25, %v1321_v42  ;;  %v1448_v50 = vpack.c.bf16 %v1402_v48, %v1400_v47  ;;  %v1406_v58 = vadd.f32 %v3760_v18, %v1330_v54  ;;  %v1403_v1 = vadd.f32 %v3764_v25, %v1327_v61  ;;  %v1340_v20 = vld [vmem:[#allocation2 + $0x188] sm:$0xff]  ;;  %v1342_v21 = vld [vmem:[#allocation2 + $0x198] sm:$0xff]  ;;  %v1341_v31 = vld [vmem:[#allocation2 + $0x190] sm:$0xff] }
 0x22d   : > { %v1441_v29 = vpack.c.bf16 %v1389_v26, %v1387_v24  ;;  %v1410_v4 = vadd.f32 %v3760_v18, %v1334_v0  ;;  %v1412_v13 = vadd.f32 %v3760_v18, %v1336_v9  ;;  %v1414_v14 = vadd.f32 %v3760_v18, %v1338_v10  ;;  %v1344_v32 = vld [vmem:[#allocation2 + $0x1a8] sm:$0xff]  ;;  %v1343_v42 = vld [vmem:[#allocation2 + $0x1a0] sm:$0xff]  ;;  %v1345_v43 = vld [vmem:[#allocation2 + $0x1b0] sm:$0xff] }
 0x22e   : > { %2708 = vmatpush3.bf16.msra.mxu1 %v3050_v60  ;;  %v1450_v60 = vpack.c.bf16 %v1406_v58, %v1404_v57  ;;  %v1416_v24 = vadd.f32 %v3760_v18, %v1340_v20  ;;  %v1418_v26 = vadd.f32 %v3760_v18, %v1342_v21  ;;  %v1417_v36 = vadd.f32 %v3764_v25, %v1341_v31  ;;  %v1348_v44 = vld [vmem:[#allocation2 + $0x1c8] sm:$0xff]  ;;  %v1347_v53 = vld [vmem:[#allocation2 + $0x1c0] sm:$0xff]  ;;  %v1349_v54 = vld [vmem:[#allocation2 + $0x1d0] sm:$0xff] }
 0x22f   : > { %2556 = vmatpush3.bf16.msra.mxu0 %v3046_v34  ;;  %v1322_v34 = vld [vmem:[#allocation2 + $0xf8] sm:$0xff]  ;;  %v1454_v16 = vpack.c.bf16 %v1414_v14, %v1412_v13  ;;  %2709 = vmatprep.subr.bf16.mxu1 %v3051_v27  ;;  %v1419_v47 = vadd.f32 %v3764_v25, %v1343_v42  ;;  %v1421_v48 = vadd.f32 %v3764_v25, %v1345_v43  ;;  %v1353_v0 = vld [vmem:[#allocation2 + $0x1f0] sm:$0xff]  ;;  %v3059_v42 = vld [vmem:[#allocation11 + $0x20] sm:$0xff]  }
 0x230   : > { %v1423_v57 = vadd.f32 %v3764_v25, %v1347_v53  ;;  %v1425_v58 = vadd.f32 %v3764_v25, %v1349_v54  ;;  %v3057_v31 = vld [vmem:[#allocation11 + $0x10] sm:$0xff]  }
 0x231   : > { %v1457_v51 = vpack.c.bf16 %v1421_v48, %v1419_v47  ;;  %v3060_v47 = vld [vmem:[#allocation11 + $0x28] sm:$0xff]  }
 0x232   : > { %1631 = vmatmul.mubr.bf16.vlgmr.msra.gmra.mrb[0].mxu0 %v1431_v37  ;;  %v1396_v37 = vadd.f32 %v3760_v18, %v1320_v33  ;;  %v1346_v33 = vld [vmem:[#allocation2 + $0x1b8] sm:$0xff]  ;;  %2710 = vmatpush3.bf16.msra.mxu1 %v3051_v27  ;;  %v1459_v61 = vpack.c.bf16 %v1425_v58, %v1423_v57 }
 0x233   : > { %1638 = vmatprep.mubr.bf16.mxu0 %v1434_v38  ;;  %v1398_v38 = vadd.f32 %v3760_v18, %v1322_v34  ;;  %v3052_v34 = vld [vmem:[#allocation9 + $0x28] sm:$0xff]  }
 0x234   : > { %2711 = vmatprep.subr.bf16.mxu1 %v3052_v34 }
 0x235   : > { %v1446_v40 = vpack.c.bf16 %v1398_v38, %v1396_v37  ;;  %v1420_v37 = vadd.f32 %v3760_v18, %v1344_v32  ;;  %v1422_v38 = vadd.f32 %v3760_v18, %v1346_v33 }
 0x236   : > { %2712 = vmatpush3.bf16.msra.mxu1 %v3052_v34 }
 0x237   : > { %v1458_v41 = vpack.c.bf16 %v1422_v38, %v1420_v37 }
 0x23a   : > { %1639 = vmatmul.mubr.bf16.gmra.mrb[4].mxu0 %v1433_v49  ;;  %v1445_v49 = vpack.c.bf16 %v1397_v46, %v1395_v45  ;;  %v1350_v45 = vld [vmem:[#allocation2 + $0x1d8] sm:$0xff] }
 0x23b   : > { %1646 = vmatprep.mubr.bf16.mxu0 %v1436_v52  ;;  %v1325_v52 = vld [vmem:[#allocation2 + $0x110] sm:$0xff]  ;;  %v3054_v46 = vld [vmem:[#allocation9 + $0x38] sm:$0xff]  }
 0x23c   : > { %v1401_v56 = vadd.f32 %v3764_v25, %v1325_v52 }
 0x23e   : > { %v1447_v59 = vpack.c.bf16 %v1401_v56, %v1399_v55  ;;  %v1352_v55 = vld [vmem:[#allocation2 + $0x1e8] sm:$0xff]  ;;  %v1354_v56 = vld [vmem:[#allocation2 + $0x1f8] sm:$0xff] }
 0x242   : > { %1647 = vmatmul.mubr.bf16.gmra.mrb[8].mxu0 %v1435_v63  ;;  %v1332_v63 = vld [vmem:[#allocation2 + $0x148] sm:$0xff] }
 0x243   : > { %1654 = vmatprep.mubr.bf16.mxu0 %v1438_v2  ;;  %v1405_v2 = vadd.f32 %v3764_v25, %v1329_v62  ;;  %v1408_v3 = vadd.f32 %v3760_v18, %v1332_v63  ;;  %v1351_v63 = vld [vmem:[#allocation2 + $0x1e0] sm:$0xff] }
 0x245   : > { %v1449_v5 = vpack.c.bf16 %v1405_v2, %v1403_v1  ;;  %v1452_v6 = vpack.c.bf16 %v1410_v4, %v1408_v3  ;;  %v1427_v1 = vadd.f32 %v3764_v25, %v1351_v63  ;;  %v1429_v2 = vadd.f32 %v3764_v25, %v1353_v0 }
 0x247   : > { %v1461_v3 = vpack.c.bf16 %v1429_v2, %v1427_v1 }
 0x24a   : > { %1655 = vmatmul.mubr.bf16.gmra.mrb[12].mxu0 %v1437_v7  ;;  %v1331_v7 = vld [vmem:[#allocation2 + $0x140] sm:$0xff] }
 0x24b   : > { %1662 = vmatprep.mubr.bf16.mxu0 %v1440_v8  ;;  %v1333_v8 = vld [vmem:[#allocation2 + $0x150] sm:$0xff]  ;;  %v1407_v11 = vadd.f32 %v3764_v25, %v1331_v7 }
 0x24c   : > { %v1409_v12 = vadd.f32 %v3764_v25, %v1333_v8  ;;  %v3055_v8 = vld [vmem:[#allocation11] sm:$0xff]  }
 0x24e   : > { %v1451_v15 = vpack.c.bf16 %v1409_v12, %v1407_v11 }
 0x252   : > { %1663 = vmatmul.mubr.bf16.gmra.mrb[16].mxu0 %v1439_v17  ;;  %v1335_v17 = vld [vmem:[#allocation2 + $0x160] sm:$0xff] }
 0x253   : > { %1670 = vmatprep.mubr.bf16.mxu0 %v1442_v19  ;;  %v1337_v19 = vld [vmem:[#allocation2 + $0x170] sm:$0xff]  ;;  %v1411_v22 = vadd.f32 %v3764_v25, %v1335_v17 }
 0x254   : > { %v1413_v23 = vadd.f32 %v3764_v25, %v1337_v19 }
 0x256   : > { %v1453_v28 = vpack.c.bf16 %v1413_v23, %v1411_v22 }
 0x25a   : > { %1671 = vmatmul.mubr.bf16.gmra.mrb[20].mxu0 %v1441_v29  ;;  %v1456_v29 = vpack.c.bf16 %v1418_v26, %v1416_v24  ;;  %v3056_v24 = vld [vmem:[#allocation11 + $0x8] sm:$0xff]  }
 0x25b   : > { %1678 = vmatprep.mubr.bf16.mxu0 %v1444_v30  ;;  %v1339_v30 = vld [vmem:[#allocation2 + $0x180] sm:$0xff] }
 0x25c   : > { %v1415_v35 = vadd.f32 %v3764_v25, %v1339_v30 }
 0x262   : > { %1679 = vmatmul.mubr.bf16.gmra.mrb[24].mxu0 %v1443_v39  ;;  %v3053_v39 = vld [vmem:[#allocation9 + $0x30] sm:$0xff]  }
 0x263   : > { %1686 = vmatprep.mubr.bf16.mxu0 %v1446_v40  ;;  %v1455_v40 = vpack.c.bf16 %v1417_v36, %v1415_v35  ;;  %2713 = vmatprep.subr.bf16.mxu1 %v3053_v39  ;;  %v3058_v36 = vld [vmem:[#allocation11 + $0x18] sm:$0xff]  }
 0x264   : > { %2714 = vmatpush3.bf16.msra.mxu1 %v3053_v39 }
 0x265   : > { %2715 = vmatprep.subr.bf16.mxu1 %v3054_v46 }
 0x268   : > { %2716 = vmatpush3.bf16.msra.mxu1 %v3054_v46 }
 0x269   : > { %2749 = vmatprep.subr.bf16.mxu1 %v3055_v8 }
 0x26a   : > { %1687 = vmatmul.mubr.bf16.gmra.mrb[28].mxu0 %v1445_v49  ;;  %v1424_v49 = vadd.f32 %v3760_v18, %v1348_v44 }
 0x26b   : > { %1694 = vmatprep.mubr.bf16.mxu0 %v1448_v50  ;;  %v1426_v50 = vadd.f32 %v3760_v18, %v1350_v45 }
 0x26d   : > { %v1460_v52 = vpack.c.bf16 %v1426_v50, %v1424_v49 }
 0x272   : > { %1695 = vmatmul.mubr.bf16.gmra.mrb[32].mxu0 %v1447_v59  ;;  %v1428_v59 = vadd.f32 %v3760_v18, %v1352_v55 }
 0x273   : > { %1702 = vmatprep.mubr.bf16.mxu0 %v1450_v60  ;;  %v1430_v60 = vadd.f32 %v3760_v18, %v1354_v56  ;;  %v3831_v18 = vld [vmem:[%s3984_s4] ss:$0 sm:$0xff] }
 0x275   : > { %v1462_v62 = vpack.c.bf16 %v1430_v60, %v1428_v59 }
 0x27a   : > { %1703 = vmatmul.mubr.bf16.gmra.mrb[36].mxu0 %v1449_v5 }
 0x27b   : > { %1710 = vmatprep.mubr.bf16.mxu0 %v1452_v6 }
 0x282   : > { %1711 = vmatmul.mubr.bf16.gmra.mrb[40].mxu0 %v1451_v15 }
 0x283   : > { %1718 = vmatprep.mubr.bf16.mxu0 %v1454_v16 }
 0x28a   : > { %1719 = vmatmul.mubr.bf16.gmra.mrb[44].mxu0 %v1453_v28 }
 0x28b   : > { %1726 = vmatprep.mubr.bf16.mxu0 %v1456_v29 }
 0x292   : > { %1727 = vmatmul.mubr.bf16.gmra.mrb[48].mxu0 %v1455_v40 }
 0x293   : > { %1734 = vmatprep.mubr.bf16.mxu0 %v1458_v41 }
 0x29a   : > { %1735 = vmatmul.mubr.bf16.gmra.mrb[52].mxu0 %v1457_v51 }
 0x29b   : > { %1742 = vmatprep.mubr.bf16.mxu0 %v1460_v52 }
 0x2a2   : > { %1743 = vmatmul.mubr.bf16.gmra.mrb[56].mxu0 %v1459_v61 }
 0x2a3   : > { %1750 = vmatprep.mubr.bf16.mxu0 %v1462_v62 }
 0x2aa   : > { %1751 = vmatmul.mubr.bf16.gmra.mrb[60].mxu0 %v1461_v3 }
 0x305   : > { %v2557_v4 = vpop.f32.mrb[0].mxu0 }
 0x306   : > { %v2558_v5 = vpop.f32.mrb[1].mxu0 }
 0x307   : > { %v2559_v6 = vadd.f32 %v2558_v5, %v2557_v4  ;;  %v2560_v7 = vpop.f32.mrb[2].mxu0 }
 0x308   : > { %v2561_v9 = vpop.f32.mrb[3].mxu0 }
 0x309   : > { %v2562_v10 = vadd.f32 %v2561_v9, %v2560_v7  ;;  %v1633_v11 = vadd.f32 %v2559_v6, %v3831_v18 }
 0x30b   : > { %v1636_v25 = vadd.f32 %v2562_v10, %v3831_v18 }
 0x30d   : > { %v2563_v12 = vpop.f32.mrb[4].mxu0  ;;  %v1759_v13 = vpack.c.bf16 %v1636_v25, %v1633_v11 }
 0x30e   : > { %v2564_v14 = vpop.f32.mrb[5].mxu0 }
 0x30f   : > { %v2565_v15 = vadd.f32 %v2564_v14, %v2563_v12  ;;  %v2566_v16 = vpop.f32.mrb[6].mxu0  ;;  %2717 = vmatprep.mubr.bf16.mxu1 %v1759_v13 }
 0x310   : > { %v2567_v17 = vpop.f32.mrb[7].mxu0 }
 0x311   : > { %v2568_v19 = vadd.f32 %v2567_v17, %v2566_v16  ;;  %v1641_v20 = vadd.f32 %v2565_v15, %v3831_v18 }
 0x313   : > { %v1644_v21 = vadd.f32 %v2568_v19, %v3831_v18 }
 0x315   : > { %v2569_v22 = vpop.f32.mrb[8].mxu0  ;;  %v1760_v23 = vpack.c.bf16 %v1644_v21, %v1641_v20 }
 0x316   : > { %v2570_v26 = vpop.f32.mrb[9].mxu0 }
 0x317   : > { %v2571_v27 = vadd.f32 %v2570_v26, %v2569_v22  ;;  %v2572_v28 = vpop.f32.mrb[10].mxu0  ;;  %2718 = vmatmul.mubr.bf16.vlgmr.msra.gmra.mrb[0].mxu1 %v1760_v23 }
 0x318   : > { %v2573_v29 = vpop.f32.mrb[11].mxu0  ;;  %2750 = vmatpush3.bf16.msra.mxu1 %v3055_v8 }
 0x319   : > { %v2574_v30 = vadd.f32 %v2573_v29, %v2572_v28  ;;  %2751 = vmatprep.subr.bf16.mxu1 %v3056_v24  ;;  %v1649_v32 = vadd.f32 %v2571_v27, %v3831_v18 }
 0x31b   : > { %v1652_v33 = vadd.f32 %v2574_v30, %v3831_v18 }
 0x31c   : > { %2752 = vmatpush3.bf16.msra.mxu1 %v3056_v24 }
 0x31d   : > { %v2575_v34 = vpop.f32.mrb[12].mxu0  ;;  %v1761_v35 = vpack.c.bf16 %v1652_v33, %v1649_v32  ;;  %2753 = vmatprep.subr.bf16.mxu1 %v3057_v31 }
 0x31e   : > { %v2576_v37 = vpop.f32.mrb[13].mxu0 }
 0x31f   : > { %v2577_v38 = vadd.f32 %v2576_v37, %v2575_v34  ;;  %v2578_v39 = vpop.f32.mrb[14].mxu0  ;;  %2721 = vmatprep.mubr.bf16.mxu1 %v1761_v35 }
 0x320   : > { %v2579_v40 = vpop.f32.mrb[15].mxu0  ;;  %2754 = vmatpush3.bf16.msra.mxu1 %v3057_v31 }
 0x321   : > { %v2580_v41 = vadd.f32 %v2579_v40, %v2578_v39  ;;  %2755 = vmatprep.subr.bf16.mxu1 %v3058_v36  ;;  %v1657_v43 = vadd.f32 %v2577_v38, %v3831_v18 }
 0x323   : > { %v1660_v44 = vadd.f32 %v2580_v41, %v3831_v18 }
 0x324   : > { %2756 = vmatpush3.bf16.msra.mxu1 %v3058_v36 }
 0x325   : > { %v2581_v45 = vpop.f32.mrb[16].mxu0  ;;  %v1762_v46 = vpack.c.bf16 %v1660_v44, %v1657_v43  ;;  %2757 = vmatprep.subr.bf16.mxu1 %v3059_v42 }
 0x326   : > { %v2582_v48 = vpop.f32.mrb[17].mxu0 }
 0x327   : > { %v2583_v49 = vadd.f32 %v2582_v48, %v2581_v45  ;;  %v2584_v50 = vpop.f32.mrb[18].mxu0  ;;  %2722 = vmatmul.mubr.bf16.gmra.mrb[4].mxu1 %v1762_v46 }
 0x328   : > { %v2585_v51 = vpop.f32.mrb[19].mxu0  ;;  %2758 = vmatpush3.bf16.msra.mxu1 %v3059_v42 }
 0x329   : > { %v2586_v52 = vadd.f32 %v2585_v51, %v2584_v50  ;;  %2759 = vmatprep.subr.bf16.mxu1 %v3060_v47  ;;  %v1665_v53 = vadd.f32 %v2583_v49, %v3831_v18 }
 0x32b   : > { %v1668_v54 = vadd.f32 %v2586_v52, %v3831_v18 }
 0x32c   : > { %2760 = vmatpush3.bf16.msra.mxu1 %v3060_v47 }
 0x32d   : > { %v2587_v55 = vpop.f32.mrb[20].mxu0  ;;  %v1763_v56 = vpack.c.bf16 %v1668_v54, %v1665_v53 }
 0x32e   : > { %v2588_v57 = vpop.f32.mrb[21].mxu0 }
 0x32f   : > { %v2589_v58 = vadd.f32 %v2588_v57, %v2587_v55  ;;  %v2590_v59 = vpop.f32.mrb[22].mxu0  ;;  %2725 = vmatprep.mubr.bf16.mxu1 %v1763_v56 }
 0x330   : > { %v2591_v60 = vpop.f32.mrb[23].mxu0 }
 0x331   : > { %v2592_v61 = vadd.f32 %v2591_v60, %v2590_v59  ;;  %v1673_v62 = vadd.f32 %v2589_v58, %v3831_v18 }
 0x333   : > { %v1676_v63 = vadd.f32 %v2592_v61, %v3831_v18 }
 0x335   : > { %v2593_v0 = vpop.f32.mrb[24].mxu0  ;;  %v1764_v1 = vpack.c.bf16 %v1676_v63, %v1673_v62  ;;  %v3061_v62 = vld [vmem:[#allocation11 + $0x30] sm:$0xff]  }
 0x336   : > { %v2594_v2 = vpop.f32.mrb[25].mxu0  ;;  %2761 = vmatprep.subr.bf16.mxu1 %v3061_v62 }
 0x337   : > { %v2595_v3 = vadd.f32 %v2594_v2, %v2593_v0  ;;  %v2596_v4 = vpop.f32.mrb[26].mxu0  ;;  %2726 = vmatmul.mubr.bf16.gmra.mrb[8].mxu1 %v1764_v1 }
 0x338   : > { %v2597_v5 = vpop.f32.mrb[27].mxu0  ;;  %2762 = vmatpush3.bf16.msra.mxu1 %v3061_v62 }
 0x339   : > { %v2598_v6 = vadd.f32 %v2597_v5, %v2596_v4  ;;  %v1681_v7 = vadd.f32 %v2595_v3, %v3831_v18  ;;  %v3062_v3 = vld [vmem:[#allocation11 + $0x38] sm:$0xff]  }
 0x33a   : > { %2763 = vmatprep.subr.bf16.mxu1 %v3062_v3 }
 0x33b   : > { %v1684_v8 = vadd.f32 %v2598_v6, %v3831_v18 }
 0x33c   : > { %2764 = vmatpush3.bf16.msra.mxu1 %v3062_v3 }
 0x33d   : > { %v2599_v9 = vpop.f32.mrb[28].mxu0  ;;  %v1765_v10 = vpack.c.bf16 %v1684_v8, %v1681_v7 }
 0x33e   : > { %v2600_v11 = vpop.f32.mrb[29].mxu0 }
 0x33f   : > { %v2601_v25 = vadd.f32 %v2600_v11, %v2599_v9  ;;  %v2602_v12 = vpop.f32.mrb[30].mxu0  ;;  %2729 = vmatprep.mubr.bf16.mxu1 %v1765_v10 }
 0x340   : > { %v2603_v13 = vpop.f32.mrb[31].mxu0 }
 0x341   : > { %v2604_v14 = vadd.f32 %v2603_v13, %v2602_v12  ;;  %v1689_v15 = vadd.f32 %v2601_v25, %v3831_v18 }
 0x343   : > { %v1692_v16 = vadd.f32 %v2604_v14, %v3831_v18 }
 0x345   : > { %v2605_v17 = vpop.f32.mrb[32].mxu0  ;;  %v1766_v19 = vpack.c.bf16 %v1692_v16, %v1689_v15 }
 0x346   : > { %v2606_v20 = vpop.f32.mrb[33].mxu0 }
 0x347   : > { %v2607_v21 = vadd.f32 %v2606_v20, %v2605_v17  ;;  %v2608_v22 = vpop.f32.mrb[34].mxu0  ;;  %2730 = vmatmul.mubr.bf16.gmra.mrb[12].mxu1 %v1766_v19 }
 0x348   : > { %v2609_v23 = vpop.f32.mrb[35].mxu0 }
 0x349   : > { %v2610_v24 = vadd.f32 %v2609_v23, %v2608_v22  ;;  %v1697_v26 = vadd.f32 %v2607_v21, %v3831_v18 }
 0x34b   : > { %v1700_v27 = vadd.f32 %v2610_v24, %v3831_v18 }
 0x34d   : > { %v2611_v28 = vpop.f32.mrb[36].mxu0  ;;  %v1767_v29 = vpack.c.bf16 %v1700_v27, %v1697_v26 }
 0x34e   : > { %v2612_v30 = vpop.f32.mrb[37].mxu0 }
 0x34f   : > { %v2613_v31 = vadd.f32 %v2612_v30, %v2611_v28  ;;  %v2614_v32 = vpop.f32.mrb[38].mxu0  ;;  %2733 = vmatprep.mubr.bf16.mxu1 %v1767_v29 }
 0x350   : > { %v2615_v33 = vpop.f32.mrb[39].mxu0 }
 0x351   : > { %v2616_v34 = vadd.f32 %v2615_v33, %v2614_v32  ;;  %v1705_v35 = vadd.f32 %v2613_v31, %v3831_v18  ;;  %v3868_v32 = vld [vmem:[%s4017_s6] ss:$0 sm:$0xff] }
 0x353   : > { %v1708_v36 = vadd.f32 %v2616_v34, %v3831_v18 }
 0x355   : > { %v2617_v37 = vpop.f32.mrb[40].mxu0  ;;  %v1768_v38 = vpack.c.bf16 %v1708_v36, %v1705_v35 }
 0x356   : > { %v2618_v39 = vpop.f32.mrb[41].mxu0 }
 0x357   : > { %v2619_v40 = vadd.f32 %v2618_v39, %v2617_v37  ;;  %v2620_v41 = vpop.f32.mrb[42].mxu0  ;;  %2734 = vmatmul.mubr.bf16.gmra.mrb[16].mxu1 %v1768_v38 }
 0x358   : > { %v2621_v42 = vpop.f32.mrb[43].mxu0 }
 0x359   : > { %v2622_v43 = vadd.f32 %v2621_v42, %v2620_v41  ;;  %v1713_v44 = vadd.f32 %v2619_v40, %v3831_v18 }
 0x35b   : > { %v1716_v45 = vadd.f32 %v2622_v43, %v3831_v18 }
 0x35d   : > { %v2623_v46 = vpop.f32.mrb[44].mxu0  ;;  %v1769_v47 = vpack.c.bf16 %v1716_v45, %v1713_v44 }
 0x35e   : > { %v2624_v48 = vpop.f32.mrb[45].mxu0 }
 0x35f   : > { %v2625_v49 = vadd.f32 %v2624_v48, %v2623_v46  ;;  %v2626_v50 = vpop.f32.mrb[46].mxu0  ;;  %2737 = vmatprep.mubr.bf16.mxu1 %v1769_v47 }
 0x360   : > { %v2627_v51 = vpop.f32.mrb[47].mxu0 }
 0x361   : > { %v2628_v52 = vadd.f32 %v2627_v51, %v2626_v50  ;;  %v1721_v53 = vadd.f32 %v2625_v49, %v3831_v18 }
 0x363   : > { %v1724_v54 = vadd.f32 %v2628_v52, %v3831_v18 }
 0x365   : > { %v2629_v55 = vpop.f32.mrb[48].mxu0  ;;  %v1770_v56 = vpack.c.bf16 %v1724_v54, %v1721_v53 }
 0x366   : > { %v2630_v57 = vpop.f32.mrb[49].mxu0 }
 0x367   : > { %v2631_v58 = vadd.f32 %v2630_v57, %v2629_v55  ;;  %v2632_v59 = vpop.f32.mrb[50].mxu0  ;;  %2738 = vmatmul.mubr.bf16.gmra.mrb[20].mxu1 %v1770_v56 }
 0x368   : > { %v2633_v60 = vpop.f32.mrb[51].mxu0 }
 0x369   : > { %v2634_v61 = vadd.f32 %v2633_v60, %v2632_v59  ;;  %v1729_v63 = vadd.f32 %v2631_v58, %v3831_v18 }
 0x36b   : > { %v1732_v0 = vadd.f32 %v2634_v61, %v3831_v18 }
 0x36d   : > { %v2635_v1 = vpop.f32.mrb[52].mxu0  ;;  %v1771_v2 = vpack.c.bf16 %v1732_v0, %v1729_v63 }
 0x36e   : > { %v2636_v4 = vpop.f32.mrb[53].mxu0 }
 0x36f   : > { %v2637_v5 = vadd.f32 %v2636_v4, %v2635_v1  ;;  %v2638_v6 = vpop.f32.mrb[54].mxu0  ;;  %2741 = vmatprep.mubr.bf16.mxu1 %v1771_v2 }
 0x370   : > { %v2639_v7 = vpop.f32.mrb[55].mxu0 }
 0x371   : > { %v2640_v8 = vadd.f32 %v2639_v7, %v2638_v6  ;;  %v1737_v9 = vadd.f32 %v2637_v5, %v3831_v18 }
 0x373   : > { %v1740_v10 = vadd.f32 %v2640_v8, %v3831_v18 }
 0x375   : > { %v2641_v11 = vpop.f32.mrb[56].mxu0  ;;  %v1772_v25 = vpack.c.bf16 %v1740_v10, %v1737_v9 }
 0x376   : > { %v2642_v12 = vpop.f32.mrb[57].mxu0 }
 0x377   : > { %v2643_v13 = vadd.f32 %v2642_v12, %v2641_v11  ;;  %v2644_v14 = vpop.f32.mrb[58].mxu0  ;;  %2742 = vmatmul.mubr.bf16.gmra.mrb[24].mxu1 %v1772_v25 }
 0x378   : > { %v2645_v15 = vpop.f32.mrb[59].mxu0 }
 0x379   : > { %v2646_v16 = vadd.f32 %v2645_v15, %v2644_v14  ;;  %v1745_v17 = vadd.f32 %v2643_v13, %v3831_v18 }
 0x37b   : > { %v1748_v19 = vadd.f32 %v2646_v16, %v3831_v18 }
 0x37d   : > { %v2647_v20 = vpop.f32.mrb[60].mxu0  ;;  %v1773_v21 = vpack.c.bf16 %v1748_v19, %v1745_v17 }
 0x37e   : > { %v2648_v22 = vpop.f32.mrb[61].mxu0 }
 0x37f   : > { %v2649_v23 = vadd.f32 %v2648_v22, %v2647_v20  ;;  %v2650_v24 = vpop.f32.mrb[62].mxu0  ;;  %2745 = vmatprep.mubr.bf16.mxu1 %v1773_v21 }
 0x380   : > { %v2651_v26 = vpop.f32.mrb[63].mxu0 }
 0x381   : > { %v2652_v27 = vadd.f32 %v2651_v26, %v2650_v24  ;;  %v1753_v28 = vadd.f32 %v2649_v23, %v3831_v18 }
 0x383   : > { %v1756_v29 = vadd.f32 %v2652_v27, %v3831_v18 }
 0x385   : > { %v1774_v30 = vpack.c.bf16 %v1756_v29, %v1753_v28 }
 0x387   : > { %2746 = vmatmul.mubr.bf16.gmra.mrb[28].mxu1 %v1774_v30 }
 0x3ea   : > { %v2719_v31 = vpop.f32.mrb[0].mxu1 }
 0x3eb   : > { %v1880_v33 = vpop.f32.mrb[1].mxu1  ;;  %v1889_v35 = vadd.f32 %v2719_v31, %v3868_v32 }
 0x3ec   : > { %v2720_v34 = vpop.f32.mrb[2].mxu1  ;;  %v1881_v38 = vadd.f32 %v3868_v32, %v1880_v33 }
 0x3ed   : > { %v1892_v36 = vadd.f32 %v2720_v34, %v3868_v32  ;;  %v1883_v37 = vpop.f32.mrb[3].mxu1 }
 0x3ee   : > { %v1884_v39 = vadd.f32 %v3868_v32, %v1883_v37 }
 0x3ef   : > { %v2008_v18 = vpack.c.bf16 %v1892_v36, %v1889_v35 }
 0x3f0   : > { %v2007_v40 = vpack.c.bf16 %v1884_v39, %v1881_v38 }
 0x3f2   : > { %2765 = vmatprep.mubr.bf16.mxu1 %v2007_v40 }
 0x3f3   : > { %2766 = vmatmul.mubr.bf16.vlgmr.msra.gmra.mrb[32].mxu1 %v2008_v18 }
 0x3fa   : > { %v2723_v41 = vpop.f32.mrb[4].mxu1 }
 0x3fb   : > { %v1896_v42 = vpop.f32.mrb[5].mxu1  ;;  %v1905_v44 = vadd.f32 %v2723_v41, %v3868_v32 }
 0x3fc   : > { %v2724_v43 = vpop.f32.mrb[6].mxu1  ;;  %v1897_v47 = vadd.f32 %v3868_v32, %v1896_v42 }
 0x3fd   : > { %v1908_v45 = vadd.f32 %v2724_v43, %v3868_v32  ;;  %v1899_v46 = vpop.f32.mrb[7].mxu1 }
 0x3fe   : > { %v1900_v48 = vadd.f32 %v3868_v32, %v1899_v46 }
 0x3ff   : > { %v2010_v49 = vpack.c.bf16 %v1908_v45, %v1905_v44 }
 0x400   : > { %v2009_v50 = vpack.c.bf16 %v1900_v48, %v1897_v47  ;;  %v3905_v48 = vld [vmem:[%s4018_s20] ss:$0 sm:$0xff] }
 0x402   : > { %2769 = vmatprep.mubr.bf16.mxu1 %v2009_v50 }
 0x403   : > { %2770 = vmatmul.mubr.bf16.gmra.mrb[36].mxu1 %v2010_v49 }
 0x40a   : > { %v2727_v51 = vpop.f32.mrb[8].mxu1 }
 0x40b   : > { %v1912_v52 = vpop.f32.mrb[9].mxu1  ;;  %v1921_v54 = vadd.f32 %v2727_v51, %v3868_v32 }
 0x40c   : > { %v2728_v53 = vpop.f32.mrb[10].mxu1  ;;  %v1913_v57 = vadd.f32 %v3868_v32, %v1912_v52 }
 0x40d   : > { %v1924_v55 = vadd.f32 %v2728_v53, %v3868_v32  ;;  %v1915_v56 = vpop.f32.mrb[11].mxu1 }
 0x40e   : > { %v1916_v58 = vadd.f32 %v3868_v32, %v1915_v56 }
 0x40f   : > { %v2012_v59 = vpack.c.bf16 %v1924_v55, %v1921_v54 }
 0x410   : > { %v2011_v60 = vpack.c.bf16 %v1916_v58, %v1913_v57 }
 0x412   : > { %2773 = vmatprep.mubr.bf16.mxu1 %v2011_v60 }
 0x413   : > { %2774 = vmatmul.mubr.bf16.gmra.mrb[40].mxu1 %v2012_v59 }
 0x41a   : > { %v2731_v61 = vpop.f32.mrb[12].mxu1 }
 0x41b   : > { %v1928_v62 = vpop.f32.mrb[13].mxu1  ;;  %v1937_v0 = vadd.f32 %v2731_v61, %v3868_v32 }
 0x41c   : > { %v2732_v63 = vpop.f32.mrb[14].mxu1  ;;  %v1929_v3 = vadd.f32 %v3868_v32, %v1928_v62 }
 0x41d   : > { %v1940_v1 = vadd.f32 %v2732_v63, %v3868_v32  ;;  %v1931_v2 = vpop.f32.mrb[15].mxu1 }
 0x41e   : > { %v1932_v4 = vadd.f32 %v3868_v32, %v1931_v2 }
 0x41f   : > { %v2014_v5 = vpack.c.bf16 %v1940_v1, %v1937_v0 }
 0x420   : > { %v2013_v6 = vpack.c.bf16 %v1932_v4, %v1929_v3 }
 0x422   : > { %2777 = vmatprep.mubr.bf16.mxu1 %v2013_v6 }
 0x423   : > { %2778 = vmatmul.mubr.bf16.gmra.mrb[44].mxu1 %v2014_v5 }
 0x42a   : > { %v2735_v7 = vpop.f32.mrb[16].mxu1 }
 0x42b   : > { %v1944_v8 = vpop.f32.mrb[17].mxu1  ;;  %v1953_v10 = vadd.f32 %v2735_v7, %v3868_v32 }
 0x42c   : > { %v2736_v9 = vpop.f32.mrb[18].mxu1  ;;  %v1945_v12 = vadd.f32 %v3868_v32, %v1944_v8 }
 0x42d   : > { %v1956_v11 = vadd.f32 %v2736_v9, %v3868_v32  ;;  %v1947_v25 = vpop.f32.mrb[19].mxu1 }
 0x42e   : > { %v1948_v13 = vadd.f32 %v3868_v32, %v1947_v25 }
 0x42f   : > { %v2016_v14 = vpack.c.bf16 %v1956_v11, %v1953_v10 }
 0x430   : > { %v2015_v15 = vpack.c.bf16 %v1948_v13, %v1945_v12 }
 0x432   : > { %2781 = vmatprep.mubr.bf16.mxu1 %v2015_v15 }
 0x433   : > { %2782 = vmatmul.mubr.bf16.gmra.mrb[48].mxu1 %v2016_v14 }
 0x43a   : > { %v2739_v16 = vpop.f32.mrb[20].mxu1 }
 0x43b   : > { %v1960_v17 = vpop.f32.mrb[21].mxu1  ;;  %v1969_v20 = vadd.f32 %v2739_v16, %v3868_v32 }
 0x43c   : > { %v2740_v19 = vpop.f32.mrb[22].mxu1  ;;  %v1961_v23 = vadd.f32 %v3868_v32, %v1960_v17 }
 0x43d   : > { %v1972_v21 = vadd.f32 %v2740_v19, %v3868_v32  ;;  %v1963_v22 = vpop.f32.mrb[23].mxu1 }
 0x43e   : > { %v1964_v24 = vadd.f32 %v3868_v32, %v1963_v22 }
 0x43f   : > { %v2018_v26 = vpack.c.bf16 %v1972_v21, %v1969_v20 }
 0x440   : > { %v2017_v27 = vpack.c.bf16 %v1964_v24, %v1961_v23 }
 0x442   : > { %2785 = vmatprep.mubr.bf16.mxu1 %v2017_v27 }
 0x443   : > { %2786 = vmatmul.mubr.bf16.gmra.mrb[52].mxu1 %v2018_v26 }
 0x44a   : > { %v2743_v28 = vpop.f32.mrb[24].mxu1 }
 0x44b   : > { %v1976_v29 = vpop.f32.mrb[25].mxu1  ;;  %v1985_v31 = vadd.f32 %v2743_v28, %v3868_v32 }
 0x44c   : > { %v2744_v30 = vpop.f32.mrb[26].mxu1  ;;  %v1977_v35 = vadd.f32 %v3868_v32, %v1976_v29 }
 0x44d   : > { %v1988_v33 = vadd.f32 %v2744_v30, %v3868_v32  ;;  %v1979_v34 = vpop.f32.mrb[27].mxu1 }
 0x44e   : > { %v1980_v36 = vadd.f32 %v3868_v32, %v1979_v34 }
 0x44f   : > { %v2020_v37 = vpack.c.bf16 %v1988_v33, %v1985_v31 }
 0x450   : > { %v2019_v38 = vpack.c.bf16 %v1980_v36, %v1977_v35 }
 0x452   : > { %2789 = vmatprep.mubr.bf16.mxu1 %v2019_v38 }
 0x453   : > { %2790 = vmatmul.mubr.bf16.gmra.mrb[56].mxu1 %v2020_v37 }
 0x45a   : > { %v2747_v39 = vpop.f32.mrb[28].mxu1 }
 0x45b   : > { %v1992_v18 = vpop.f32.mrb[29].mxu1  ;;  %v2001_v41 = vadd.f32 %v2747_v39, %v3868_v32 }
 0x45c   : > { %v2748_v40 = vpop.f32.mrb[30].mxu1  ;;  %v1993_v44 = vadd.f32 %v3868_v32, %v1992_v18 }
 0x45d   : > { %v2004_v42 = vadd.f32 %v2748_v40, %v3868_v32  ;;  %v1995_v43 = vpop.f32.mrb[31].mxu1 }
 0x45e   : > { %v1996_v45 = vadd.f32 %v3868_v32, %v1995_v43 }
 0x45f   : > { %v2022_v46 = vpack.c.bf16 %v2004_v42, %v2001_v41 }
 0x460   : > { %v2021_v47 = vpack.c.bf16 %v1996_v45, %v1993_v44 }
 0x462   : > { %2793 = vmatprep.mubr.bf16.mxu1 %v2021_v47 }
 0x463   : > { %2794 = vmatmul.mubr.bf16.gmra.mrb[60].mxu1 %v2022_v46 }
 0x4c6   : > { %v2767_v49 = vpop.f32.mrb[32].mxu1 }
 0x4c7   : > { %v2137_v50 = vadd.f32 %v2767_v49, %v3905_v48  ;;  %v2128_v51 = vpop.f32.mrb[33].mxu1 }
 0x4c8   : > { %v2129_v52 = vadd.f32 %v3905_v48, %v2128_v51  ;;  %v2768_v53 = vpop.f32.mrb[34].mxu1 }
 0x4c9   : > { %2257 = vst [vmem:[#allocation12 + $0x10] sm:$0xff] %v2137_v50  ;;  %v2140_v54 = vadd.f32 %v2768_v53, %v3905_v48  ;;  %v2131_v32 = vpop.f32.mrb[35].mxu1 }
 0x4ca   : > { %2255 = vst [vmem:[#allocation12] sm:$0xff] %v2129_v52  ;;  %v2132_v55 = vadd.f32 %v3905_v48, %v2131_v32 }
 0x4cb   : > { %2258 = vst [vmem:[#allocation12 + $0x18] sm:$0xff] %v2140_v54 }
 0x4cc   : > { %2256 = vst [vmem:[#allocation12 + $0x8] sm:$0xff] %v2132_v55 }
 0x4d6   : > { %v2771_v56 = vpop.f32.mrb[36].mxu1 }
 0x4d7   : > { %v2153_v57 = vadd.f32 %v2771_v56, %v3905_v48  ;;  %v2144_v58 = vpop.f32.mrb[37].mxu1 }
 0x4d8   : > { %v2145_v59 = vadd.f32 %v3905_v48, %v2144_v58  ;;  %v2772_v60 = vpop.f32.mrb[38].mxu1 }
 0x4d9   : > { %2261 = vst [vmem:[#allocation12 + $0x30] sm:$0xff] %v2153_v57  ;;  %v2156_v61 = vadd.f32 %v2772_v60, %v3905_v48  ;;  %v2147_v62 = vpop.f32.mrb[39].mxu1 }
 0x4da   : > { %2259 = vst [vmem:[#allocation12 + $0x20] sm:$0xff] %v2145_v59  ;;  %v2148_v63 = vadd.f32 %v3905_v48, %v2147_v62 }
 0x4db   : > { %2262 = vst [vmem:[#allocation12 + $0x38] sm:$0xff] %v2156_v61 }
 0x4dc   : > { %2260 = vst [vmem:[#allocation12 + $0x28] sm:$0xff] %v2148_v63 }
 0x4e6   : > { %v2775_v0 = vpop.f32.mrb[40].mxu1 }
 0x4e7   : > { %v2169_v1 = vadd.f32 %v2775_v0, %v3905_v48  ;;  %v2160_v2 = vpop.f32.mrb[41].mxu1 }
 0x4e8   : > { %v2161_v3 = vadd.f32 %v3905_v48, %v2160_v2  ;;  %v2776_v4 = vpop.f32.mrb[42].mxu1 }
 0x4e9   : > { %2265 = vst [vmem:[#allocation12 + $0x50] sm:$0xff] %v2169_v1  ;;  %v2172_v5 = vadd.f32 %v2776_v4, %v3905_v48  ;;  %v2163_v6 = vpop.f32.mrb[43].mxu1 }
 0x4ea   : > { %2263 = vst [vmem:[#allocation12 + $0x40] sm:$0xff] %v2161_v3  ;;  %v2164_v7 = vadd.f32 %v3905_v48, %v2163_v6 }
 0x4eb   : > { %2266 = vst [vmem:[#allocation12 + $0x58] sm:$0xff] %v2172_v5 }
 0x4ec   : > { %2264 = vst [vmem:[#allocation12 + $0x48] sm:$0xff] %v2164_v7 }
 0x4f6   : > { %v2779_v8 = vpop.f32.mrb[44].mxu1 }
 0x4f7   : > { %v2185_v9 = vadd.f32 %v2779_v8, %v3905_v48  ;;  %v2176_v10 = vpop.f32.mrb[45].mxu1 }
 0x4f8   : > { %v2177_v11 = vadd.f32 %v3905_v48, %v2176_v10  ;;  %v2780_v25 = vpop.f32.mrb[46].mxu1 }
 0x4f9   : > { %2269 = vst [vmem:[#allocation12 + $0x70] sm:$0xff] %v2185_v9  ;;  %v2188_v12 = vadd.f32 %v2780_v25, %v3905_v48  ;;  %v2179_v13 = vpop.f32.mrb[47].mxu1 }
 0x4fa   : > { %2267 = vst [vmem:[#allocation12 + $0x60] sm:$0xff] %v2177_v11  ;;  %v2180_v14 = vadd.f32 %v3905_v48, %v2179_v13 }
 0x4fb   : > { %2270 = vst [vmem:[#allocation12 + $0x78] sm:$0xff] %v2188_v12 }
 0x4fc   : > { %2268 = vst [vmem:[#allocation12 + $0x68] sm:$0xff] %v2180_v14 }
 0x506   : > { %v2783_v15 = vpop.f32.mrb[48].mxu1 }
 0x507   : > { %v2201_v16 = vadd.f32 %v2783_v15, %v3905_v48  ;;  %v2192_v17 = vpop.f32.mrb[49].mxu1 }
 0x508   : > { %v2193_v19 = vadd.f32 %v3905_v48, %v2192_v17  ;;  %v2784_v20 = vpop.f32.mrb[50].mxu1 }
 0x509   : > { %2273 = vst [vmem:[#allocation12 + $0x90] sm:$0xff] %v2201_v16  ;;  %v2204_v21 = vadd.f32 %v2784_v20, %v3905_v48  ;;  %v2195_v22 = vpop.f32.mrb[51].mxu1 }
 0x50a   : > { %2271 = vst [vmem:[#allocation12 + $0x80] sm:$0xff] %v2193_v19  ;;  %v2196_v23 = vadd.f32 %v3905_v48, %v2195_v22 }
 0x50b   : > { %2274 = vst [vmem:[#allocation12 + $0x98] sm:$0xff] %v2204_v21 }
 0x50c   : > { %2272 = vst [vmem:[#allocation12 + $0x88] sm:$0xff] %v2196_v23 }
 0x516   : > { %v2787_v24 = vpop.f32.mrb[52].mxu1 }
 0x517   : > { %v2217_v26 = vadd.f32 %v2787_v24, %v3905_v48  ;;  %v2208_v27 = vpop.f32.mrb[53].mxu1 }
 0x518   : > { %v2209_v28 = vadd.f32 %v3905_v48, %v2208_v27  ;;  %v2788_v29 = vpop.f32.mrb[54].mxu1 }
 0x519   : > { %2277 = vst [vmem:[#allocation12 + $0xb0] sm:$0xff] %v2217_v26  ;;  %v2220_v30 = vadd.f32 %v2788_v29, %v3905_v48  ;;  %v2211_v31 = vpop.f32.mrb[55].mxu1 }
 0x51a   : > { %2275 = vst [vmem:[#allocation12 + $0xa0] sm:$0xff] %v2209_v28  ;;  %v2212_v33 = vadd.f32 %v3905_v48, %v2211_v31 }
 0x51b   : > { %2278 = vst [vmem:[#allocation12 + $0xb8] sm:$0xff] %v2220_v30 }
 0x51c   : > { %2276 = vst [vmem:[#allocation12 + $0xa8] sm:$0xff] %v2212_v33 }
 0x526   : > { %v2791_v34 = vpop.f32.mrb[56].mxu1 }
 0x527   : > { %v2233_v35 = vadd.f32 %v2791_v34, %v3905_v48  ;;  %v2224_v36 = vpop.f32.mrb[57].mxu1 }
 0x528   : > { %v2225_v37 = vadd.f32 %v3905_v48, %v2224_v36  ;;  %v2792_v38 = vpop.f32.mrb[58].mxu1 }
 0x529   : > { %2281 = vst [vmem:[#allocation12 + $0xd0] sm:$0xff] %v2233_v35  ;;  %v2236_v39 = vadd.f32 %v2792_v38, %v3905_v48  ;;  %v2227_v18 = vpop.f32.mrb[59].mxu1 }
 0x52a   : > { %2279 = vst [vmem:[#allocation12 + $0xc0] sm:$0xff] %v2225_v37  ;;  %v2228_v40 = vadd.f32 %v3905_v48, %v2227_v18 }
 0x52b   : > { %2282 = vst [vmem:[#allocation12 + $0xd8] sm:$0xff] %v2236_v39 }
 0x52c   : > { %2280 = vst [vmem:[#allocation12 + $0xc8] sm:$0xff] %v2228_v40 }
 0x536   : > { %v2795_v41 = vpop.f32.mrb[60].mxu1 }
 0x537   : > { %v2249_v42 = vadd.f32 %v2795_v41, %v3905_v48  ;;  %v2240_v43 = vpop.f32.mrb[61].mxu1 }
 0x538   : > { %v2241_v44 = vadd.f32 %v3905_v48, %v2240_v43  ;;  %v2796_v45 = vpop.f32.mrb[62].mxu1 }
 0x539   : > { %2285 = vst [vmem:[#allocation12 + $0xf0] sm:$0xff] %v2249_v42  ;;  %v2252_v46 = vadd.f32 %v2796_v45, %v3905_v48  ;;  %v2243_v47 = vpop.f32.mrb[63].mxu1 }
 0x53a   : > { %2283 = vst [vmem:[#allocation12 + $0xe0] sm:$0xff] %v2241_v44  ;;  %v2244_v49 = vadd.f32 %v3905_v48, %v2243_v47 }
 0x53b   : > { %2286 = vst [vmem:[#allocation12 + $0xf8] sm:$0xff] %v2252_v46 }
 0x53c   : > { %2284 = vst [vmem:[#allocation12 + $0xe8] sm:$0xff] %v2244_v49 }
 0x53d PF: > { %p2873_p7 = scmp.eq.s32.totalorder %s3394_s15, 1  ;;  %s3312_s29 = smov [#allocation12]  }
 0x53e   : > { %s2296_s26 = sshll.u32 %s3312_s29, 4  ;;  %s2297_s26 = int_to_ptr.vmem [resolvable:$true] %s2296_s26 }
 0x53f   : > { %s3207_s27 = scalar_lea.vmem %s2297_s26, 4096  ;;  %p3214_p1 = scmp.lt.s32.totalorder %s2297_s26, %s2297_s26 }
 0x540   : > { %p3208_p9 = scmp.ne.s32.totalorder %s2297_s26, %s3207_s27  ;;  %p3215_p3 = scmp.lt.s32.totalorder %s3207_s27, %s3207_s27 }
 0x542   : > { %p3209_p5 = pnand %p3208_p9, %p2873_p7  ;;  %p3216_p2 = por %p3215_p3, %p3214_p1 }
 0x544   : > { %p3210_p10 = pneg %p3209_p5 }
 0x546   : > { %p3217_p13 = pnand %p3216_p2, %p3210_p10 }
 0x548   : > { %3220 = shalt.err (!%p3217_p13)
}
 0x549   : > { %s4019_s21 = sld [smem:[#allocation23_spill]] }
 0x54f   : > { %s3221_s19 = scalar_lea.hbm %s4019_s21, 4096 }
 0x550   : > { %p3222_p0 = scmp.ne.s32.totalorder %s4019_s21, %s3221_s19  ;;  %p3227_p11 = scmp.lt.u32.totalorder %s3221_s19, %s4019_s21 }
 0x552   : > { %p3223_p6 = pnand %p3222_p0, %p2873_p7 }
 0x554   : > { %p3224_p8 = pneg %p3223_p6 }
 0x556   : > { %p3229_p12 = pnand %p3227_p11, %p3224_p8 }
 0x558   : > { %3232 = shalt.err (!%p3229_p12)
}
 0x559   : > { %s3313_s17 = smov 128   ;;  %s3314_s18 = smov 8  }
 0x55a   : > { %2846 = dma.vmem_to_hbm [thread:$0]  (%p2873_p7), %s2297_s26, 4096, %s4019_s21, [#allocation5], %s3313_s17, %s3313_s17, %s3314_s18  }
 0x55b   : > { %3274 = dma.done.wait (%p2873_p7), [#allocation5], 4096  }
 0x55c   : > { %3276 = vsyncadd (%p2873_p7), [#allocation5], 4294963200 }
 0x55d PF: > { %s27_s14 = sadd.s32 1, %s3299_s14   ;;  %s4020_s8 = smov %s4027_s30 }
 0x55e   : > { %p24_p4 = scmp.ge.s32.totalorder %s27_s14, 4   ;;  %s4021_s30 = smov %s3283_s10 }
 0x55f   : > { %s4022_s10 = smov %s3287_s11  ;;  %s4023_s11 = smov %s3530_s25 }
 0x560   : > { %s4024_s12 = smov %s3295_s13  ;;  %s4025_s13 = smov %s4020_s8 }
 0x561   :  { %26 = sbr.rel (!%p24_p4) target bundleno = 15 (0xf), region = 127 }
 0x568   :  { %2312 = vsyncpa [#allocation4], 1 }
 0x569   :  { %2314 = vsyncpa [#allocation4 + $0x1], 1 }
 0x56a   :  { %2315 = vsyncpa [#allocation7], 1 }
 0x56b   :  { %2317 = vsyncpa [#allocation7 + $0x1], 1 }
 0x56c   :  { %2318 = vsyncpa [#allocation10], 1 }
 0x56d   :  { %2319 = vsyncpa [#allocation5], 1 }
 0x56e   :  { %2321 = vsyncpa [#allocation5 + $0x1], 1 }

</bundles_post_ra>
